<compile_context>
chip_gen: v7x
topology: tpu7x:2x2x1
jax: 0.10.0
libtpu: 0.0.40
codegen_flags: <defaults>
</compile_context>

<pallas_src>
import numpy as np

import jax
import jax.numpy as jnp
from jax.experimental import pallas as pl
from jax.experimental.pallas import tpu as pltpu


# ----------------------------------------------------------------------------
# Small helpers
# ----------------------------------------------------------------------------
def _round_up(x, m):
    return ((x + m - 1) // m) * m


def _vmem_capacity_bytes():
    """Generation-aware VMEM capacity (128 MiB v5e/v6e, 64 MiB v7x)."""
    try:
        cap = int(pltpu.get_tpu_info().vmem_capacity_bytes)
        if cap > 0:
            return cap
    except Exception:
        pass
    return 64 * 1024 * 1024          # conservative (v7x-level) fallback


# ----------------------------------------------------------------------------
# Pallas kernels
# ----------------------------------------------------------------------------
def _norm_kernel(x_ref, o_ref):
    """Per-row normalization: (x - mean) / (unbiased_std + 1e-5); f32 math, bf16 out."""
    x = x_ref[...]
    d = x.shape[-1]
    mean = jnp.sum(x, axis=-1, keepdims=True) * (1.0 / d)
    xc = x - mean
    var = jnp.sum(xc * xc, axis=-1, keepdims=True) * (1.0 / max(d - 1, 1))  # torch std: correction=1
    o_ref[...] = (xc / (jnp.sqrt(var) + 1e-5)).astype(o_ref.dtype)


def _matmul_bias_relu_kernel(a_ref, w_ref, b_ref, o_ref):
    """o = relu(a @ w + b); bf16 MXU operands, f32 accumulation + epilogue."""
    acc = jnp.dot(a_ref[...], w_ref[...], preferred_element_type=jnp.float32)
    o_ref[...] = jnp.maximum(acc + b_ref[...].astype(jnp.float32), 0.0).astype(o_ref.dtype)


def _make_tail_kernel(n_mats):
    """Fused tail: chain of matmul+bias+relu, all weights VMEM-resident."""
    def kernel(x_ref, *refs):
        o_ref = refs[-1]
        x = x_ref[...]
        for l in range(n_mats):
            w = refs[2 * l][...]
            b = refs[2 * l + 1][...]
            y = jnp.maximum(
                jnp.dot(x, w, preferred_element_type=jnp.float32)
                + b.astype(jnp.float32), 0.0)
            x = y.astype(jnp.bfloat16) if l + 1 < n_mats else y
        o_ref[...] = x.astype(o_ref.dtype)
    return kernel


# ----------------------------------------------------------------------------
# Pallas wrappers
# ----------------------------------------------------------------------------
def per_sample_normalize(x_flat, vmem_cap):
    """x_flat: [N, D] f32 -> [N, D] bf16, per-row normalization, VMEM-budgeted tiles."""
    n, d = x_flat.shape
    npad = _round_up(n, 8)
    if npad != n:
        x_flat = jnp.pad(x_flat, ((0, npad - n), (0, 0)))
    # f32 in (x2 double-buffer) + bf16 out (x2) = 12 B / element per row block
    budget = max(vmem_cap // 32, 512 * 1024)
    rb = max(8, min(npad, (budget // (d * 12)) // 8 * 8))
    while npad % rb:
        rb -= 8
    out = pl.pallas_call(
        _norm_kernel,
        out_shape=jax.ShapeDtypeStruct((npad, d), jnp.bfloat16),
        grid=(npad // rb,),
        in_specs=[pl.BlockSpec((rb, d), lambda i: (i, 0))],
        out_specs=pl.BlockSpec((rb, d), lambda i: (i, 0)),
        compiler_params=pltpu.CompilerParams(dimension_semantics=("parallel",)),
    )(x_flat)
    return out[:n] if npad != n else out


def _choose_m_tile(m_pad, kp, oc, vmem_cap):
    """Lane (M) tile: multiple of 128, VMEM-budgeted, >=2 tiles only when M is big."""
    if m_pad <= 512:
        return m_pad                          # single tile: no pointless grid steps on 1-TC chips
    budget = vmem_cap // 16
    denom = 4 * (kp + oc)                     # bf16 in+out blocks, double buffered, per M element
    tm_max = max(128, (budget // denom) // 128 * 128)
    cap = m_pad // 2 if m_pad >= 1024 else m_pad   # >=2 grid steps for v7x megacore when big
    cap = min(cap, tm_max)
    for tm in range(cap - cap % 128, 127, -128):
        if m_pad % tm == 0:
            return tm
    return 128


def conv_matmul_lanedense(wmat, patches, bcol, vmem_cap):
    """relu(W @ P + b): W [OC, Kp] bf16, P [Kp, M] bf16, b [OC, 1] f32 -> [OC, M] bf16."""
    oc, kp = wmat.shape
    m = patches.shape[1]
    m_pad = _round_up(m, 128)
    if m_pad != m:
        patches = jnp.pad(patches, ((0, 0), (0, m_pad - m)))
    tm = _choose_m_tile(m_pad, kp, oc, vmem_cap)
    cost = pl.CostEstimate(
        flops=int(2 * oc * kp * m_pad),
        transcendentals=0,
        bytes_accessed=int(kp * m_pad * 2 + oc * kp * 2 + oc * 4 + oc * m_pad * 2))
    y = pl.pallas_call(
        _matmul_bias_relu_kernel,
        out_shape=jax.ShapeDtypeStruct((oc, m_pad), jnp.bfloat16),
        grid=(m_pad // tm,),
        in_specs=[
            pl.BlockSpec((oc, kp), lambda i: (0, 0)),     # weights resident
            pl.BlockSpec((kp, tm), lambda i: (0, i)),
            pl.BlockSpec((oc, 1), lambda i: (0, 0)),      # bias resident
        ],
        out_specs=pl.BlockSpec((oc, tm), lambda i: (0, i)),
        compiler_params=pltpu.CompilerParams(dimension_semantics=("parallel",)),
        cost_estimate=cost,
    )(wmat, patches, bcol)
    return y[:, :m] if m_pad != m else y


def fused_tail(x, weights, biases, vmem_cap):
    """One pallas_call for the whole tail: x [Np, D0] bf16, chained matmul+bias+relu."""
    n_mats = len(weights)
    npad, d0 = x.shape
    dout = int(weights[-1].shape[1])
    w_bytes = sum(int(w.size) * 2 for w in weights)
    act_row_bytes = 4 * (d0 + sum(int(w.shape[1]) for w in weights))
    budget = max(vmem_cap // 8 - 2 * w_bytes, 64 * 1024)
    rb = max(8, min(npad, (budget // act_row_bytes) // 8 * 8))
    while npad % rb:
        rb -= 8

    in_specs = [pl.BlockSpec((rb, d0), lambda i: (i, 0))]
    for w, b in zip(weights, biases):
        in_specs.append(pl.BlockSpec(tuple(int(s) for s in w.shape), lambda i: (0, 0)))
        in_specs.append(pl.BlockSpec(tuple(int(s) for s in b.shape), lambda i: (0, 0)))

    cost = pl.CostEstimate(
        flops=int(2 * npad * sum(int(w.shape[0]) * int(w.shape[1]) for w in weights)),
        transcendentals=0,
        bytes_accessed=int(x.size * 2 + w_bytes + npad * dout * 4))

    flat_wb = [t for wb in zip(weights, biases) for t in wb]
    return pl.pallas_call(
        _make_tail_kernel(n_mats),
        out_shape=jax.ShapeDtypeStruct((npad, dout), jnp.float32),
        grid=(npad // rb,),
        in_specs=in_specs,
        out_specs=pl.BlockSpec((rb, dout), lambda i: (i, 0)),
        compiler_params=pltpu.CompilerParams(dimension_semantics=("parallel",)),
        cost_estimate=cost,
    )(x, *flat_wb)


# ----------------------------------------------------------------------------
# Glue (plain JAX under jit): channel-first im2col for the head layers
# ----------------------------------------------------------------------------
def im2col_cf(x, k, s):
    """x: [C, N, H, W] -> patches [C*k*k, N*OH*OW]; tap order (c, kh, kw) matches
    the PyTorch OIHW weight flattening, so no activation transpose is needed."""
    c, n, h, w = x.shape
    p = k // 2
    oh = (h + 2 * p - k) // s + 1
    ow = (w + 2 * p - k) // s + 1
    xp = jnp.pad(x, ((0, 0), (0, 0), (p, p), (p, p)))
    taps = []
    for kh in range(k):
        for kw in range(k):
            taps.append(xp[:, :, kh:kh + s * oh:s, kw:kw + s * ow:s])  # [C, N, OH, OW]
    patches = jnp.stack(taps, axis=1)                                  # [C, k*k, N, OH, OW]
    return patches.reshape(c * k * k, n * oh * ow), oh, ow


# ----------------------------------------------------------------------------
# Parameter construction / preparation
# ----------------------------------------------------------------------------
def init_params(key, num_filters, features_per_filter, img_h, img_w, channels, conv_config):
    """Raw (PyTorch-layout) parameters: OIHW conv weights, [P, D] linear weights."""
    params = {"conv": [], "dense": []}
    in_c, h, w = channels, img_h, img_w
    for oc, k, s in conv_config:
        key, wk = jax.random.split(key)
        fan_in = in_c * k * k
        wgt = jax.random.normal(wk, (oc, in_c, k, k), jnp.float32) / jnp.sqrt(float(fan_in))
        bias = jnp.full((oc,), 0.01, jnp.float32)      # nn.init.constant_(bias, 0.01)
        params["conv"].append((wgt, bias))
        p = k // 2
        h = (h + 2 * p - k) // s + 1
        w = (w + 2 * p - k) // s + 1
        in_c = oc
    flat = h * w
    for _ in range(num_filters):
        key, wk = jax.random.split(key)
        wgt = jax.random.normal(wk, (features_per_filter, flat), jnp.float32) / jnp.sqrt(float(flat))
        bias = jnp.full((features_per_filter,), 0.01, jnp.float32)
        params["dense"].append((wgt, bias))
    return params


def _unrolled_conv_matrix(wgt, bias, stride, hin, win):
    """Lower one conv layer to a dense matrix acting on channel-major flattened maps.

    Returns BigW [Cin*Hin*Win, Cout*Hout*Wout], BigB [1, Cout*Hout*Wout]."""
    w = np.asarray(wgt)
    oc, ic, k, _ = w.shape
    p = k // 2
    hout = (hin + 2 * p - k) // stride + 1
    wout = (win + 2 * p - k) // stride + 1
    big = np.zeros((ic * hin * win, oc * hout * wout), np.float32)
    for oh in range(hout):
        for ow_ in range(wout):
            for kh in range(k):
                h = stride * oh + kh - p
                if h < 0 or h >= hin:
                    continue
                for kw in range(k):
                    wc = stride * ow_ + kw - p
                    if wc < 0 or wc >= win:
                        continue
                    rows = np.arange(ic) * (hin * win) + h * win + wc
                    cols = np.arange(oc) * (hout * wout) + oh * wout + ow_
                    big[rows[:, None], cols[None, :]] = w[:, :, kh, kw].T
    bigb = np.repeat(np.asarray(bias), hout * wout).reshape(1, -1).astype(np.float32)
    return big, bigb


def prepare_params(raw, conv_config, num_filters, features_per_filter, img_h, img_w, channels):
    """One-time weight prep: head conv layers flattened/K-padded/bf16; the small
    tail conv layers unrolled to dense matrices and fused with the block-diagonal
    dense head into a single chained-matmul weight list."""
    nl = len(conv_config)
    sizes = []
    h, w, c = img_h, img_w, channels
    for oc, k, s in conv_config:
        p = k // 2
        ho = (h + 2 * p - k) // s + 1
        wo = (w + 2 * p - k) // s + 1
        sizes.append((h, w, c, ho, wo, oc))
        h, w, c = ho, wo, oc
    feat_h, feat_w = h, w

    # A layer joins the fused tail iff its unrolled matrix is small enough (and
    # so are all later layers).  The dense heads always live in the tail.
    tail_layer_bytes = 2 * 1024 * 1024
    tail_start = nl
    for l in range(nl - 1, -1, -1):
        hin, win, cin, ho, wo, oc = sizes[l]
        if cin * hin * win * oc * ho * wo * 2 <= tail_layer_bytes:
            tail_start = l
        else:
            break

    conv_w, conv_b = [], []
    for l in range(tail_start):
        wgt, bias = raw["conv"][l]
        oc, k, s = conv_config[l]
        kdim = wgt.shape[1] * k * k
        kp = _round_up(kdim, 128)
        wmat = jnp.pad(wgt.reshape(oc, kdim), ((0, 0), (0, kp - kdim))).astype(jnp.bfloat16)
        conv_w.append(wmat)
        conv_b.append(bias.reshape(oc, 1).astype(jnp.float32))

    tail_w, tail_b = [], []
    for l in range(tail_start, nl):
        wgt, bias = raw["conv"][l]
        _, k, s = conv_config[l]
        hin, win, cin, ho, wo, oc = sizes[l]
        bw, bb = _unrolled_conv_matrix(wgt, bias, s, hin, win)
        tail_w.append(jnp.asarray(bw, jnp.bfloat16))
        tail_b.append(jnp.asarray(bb, jnp.float32))

    # All 8 per-filter dense heads as one block-diagonal matmul (last tail step).
    d_f = feat_h * feat_w
    p_ = features_per_filter
    w_bd = np.zeros((num_filters * d_f, num_filters * p_), np.float32)
    b_bd = np.zeros((1, num_filters * p_), np.float32)
    for f, (wgt, bias) in enumerate(raw["dense"]):
        w_bd[f * d_f:(f + 1) * d_f, f * p_:(f + 1) * p_] = np.asarray(wgt).T
        b_bd[0, f * p_:(f + 1) * p_] = np.asarray(bias)
    tail_w.append(jnp.asarray(w_bd, jnp.bfloat16))
    tail_b.append(jnp.asarray(b_bd, jnp.float32))

    return {"conv_w": tuple(conv_w), "conv_b": tuple(conv_b),
            "tail_w": tuple(tail_w), "tail_b": tuple(tail_b)}


# ----------------------------------------------------------------------------
# Forward pass
# ----------------------------------------------------------------------------
def conv_head_forward(params, x, conv_config):
    """x: [batch, seq, H, W, C] (NHWC) -> [seq, batch, num_filters*features_per_filter]."""
    batch, seq, h, w, c = x.shape
    n = batch * seq
    vmem_cap = _vmem_capacity_bytes()

    # per-sample normalization over (C, H, W); bf16 out for the memory-bound path
    xf = x.reshape(n, h * w * c).astype(jnp.float32)
    xn = per_sample_normalize(xf, vmem_cap)

    # channel-first activations for the lane-dense conv chain
    xcf = xn.reshape(n, h, w, c).transpose(3, 0, 1, 2)            # [C, N, H, W] bf16

    # head conv layers: XLA im2col + lane-dense Pallas matmul
    n_head = len(params["conv_w"])
    for li in range(n_head):
        oc_l, k, s = conv_config[li]
        patches, oh, ow = im2col_cf(xcf, k, s)                    # [Kdim, N*OH*OW]
        kdim, kp = patches.shape[0], params["conv_w"][li].shape[1]
        if kp != kdim:
            patches = jnp.pad(patches, ((0, kp - kdim), (0, 0)))  # K -> multiple of 128
        y = conv_matmul_lanedense(params["conv_w"][li], patches,
                                  params["conv_b"][li], vmem_cap) # [OC, N*OH*OW] bf16
        xcf = y.reshape(oc_l, n, oh, ow)

    # fused tail: remaining conv layers (unrolled matmuls) + dense heads, ONE launch
    tail_in = xcf.transpose(1, 0, 2, 3).reshape(n, -1).astype(jnp.bfloat16)   # [N, C*H*W]
    npad = _round_up(n, 8)
    if npad != n:
        tail_in = jnp.pad(tail_in, ((0, npad - n), (0, 0)))
    feat = fused_tail(tail_in, list(params["tail_w"]), list(params["tail_b"]), vmem_cap)
    feat = feat[:n]

    out_dim = feat.shape[-1]
    return feat.reshape(batch, seq, out_dim).transpose(1, 0, 2)   # permute(1, 0, 2)


# ----------------------------------------------------------------------------
if __name__ == "__main__":
    NUM_FILTERS = 8
    FEATURES_PER_FILTER = 8
    IMG_H, IMG_W, CHANNELS = 48, 96, 3          # small spatial shapes consistent with the module
    BATCH, SEQ = 2, 2
    CONV_CONFIG = ((16, 7, 3), (24, 5, 2), (36, 5, 2), (48, 3, 2), (64, 3, 1), (NUM_FILTERS, 3, 1))

    key = jax.random.PRNGKey(0)
    pkey, xkey = jax.random.split(key)
    raw_params = init_params(pkey, NUM_FILTERS, FEATURES_PER_FILTER,
                             IMG_H, IMG_W, CHANNELS, CONV_CONFIG)
    params = prepare_params(raw_params, CONV_CONFIG, NUM_FILTERS, FEATURES_PER_FILTER,
                            IMG_H, IMG_W, CHANNELS)
    x = jax.random.normal(xkey, (BATCH, SEQ, IMG_H, IMG_W, CHANNELS), jnp.float32)

    fwd = jax.jit(conv_head_forward, static_argnums=(2,))
    out = jax.block_until_ready(fwd(params, x, CONV_CONFIG))

    assert out.shape == (SEQ, BATCH, NUM_FILTERS * FEATURES_PER_FILTER), out.shape
    assert bool(jnp.all(jnp.isfinite(out)))
    print("KERNEL_OK")
</pallas_src>

<mosaic_0001>
module attributes {stable_mosaic.version = 11 : i64} {
  func.func @_norm_kernel(%arg0: i32, %arg1: memref<8x13824xf32, #tpu.memory_space<vmem>>, %arg2: memref<8x13824xbf16, #tpu.memory_space<vmem>>) attributes {dimension_semantics = [#tpu.dimension_semantics<parallel>], iteration_bounds = array<i64: 1>, scalar_prefetch = 0 : i64, scratch_operands = 0 : i64, tpu.core_type = #tpu.core_type<tc>, window_params = [{transform_indices = @transform_0, window_bounds = array<i64: 8, 13824>}, {transform_indices = @transform_1, window_bounds = array<i64: 8, 13824>}]} {
    %c0 = arith.constant 0 : index
    %c0_0 = arith.constant 0 : index
    %0 = vector.load %arg1[%c0, %c0_0] : memref<8x13824xf32, #tpu.memory_space<vmem>>, vector<8x13824xf32>
    %cst = arith.constant dense<0.000000e+00> : vector<8xf32>
    %1 = vector.multi_reduction <add>, %0, %cst [1] : vector<8x13824xf32> to vector<8xf32>
    %2 = vector.shape_cast %1 : vector<8xf32> to vector<8x1xf32>
    %cst_1 = arith.constant 7.23379635E-5 : f32
    %3 = vector.broadcast %cst_1 : f32 to vector<8x1xf32>
    %4 = arith.mulf %2, %3 : vector<8x1xf32>
    %5 = vector.broadcast %4 : vector<8x1xf32> to vector<8x13824xf32>
    %6 = arith.subf %0, %5 : vector<8x13824xf32>
    %7 = arith.mulf %6, %6 : vector<8x13824xf32>
    %cst_2 = arith.constant dense<0.000000e+00> : vector<8xf32>
    %8 = vector.multi_reduction <add>, %7, %cst_2 [1] : vector<8x13824xf32> to vector<8xf32>
    %9 = vector.shape_cast %8 : vector<8xf32> to vector<8x1xf32>
    %cst_3 = arith.constant 7.23431949E-5 : f32
    %10 = vector.broadcast %cst_3 : f32 to vector<8x1xf32>
    %11 = arith.mulf %9, %10 : vector<8x1xf32>
    %12 = math.sqrt %11 : vector<8x1xf32>
    %cst_4 = arith.constant 9.99999974E-6 : f32
    %13 = vector.broadcast %cst_4 : f32 to vector<8x1xf32>
    %14 = arith.addf %12, %13 : vector<8x1xf32>
    %15 = vector.broadcast %14 : vector<8x1xf32> to vector<8x13824xf32>
    %16 = arith.divf %6, %15 : vector<8x13824xf32>
    %17 = arith.truncf %16 : vector<8x13824xf32> to vector<8x13824xbf16>
    %c0_5 = arith.constant 0 : index
    %c0_6 = arith.constant 0 : index
    %18 = vector.load %arg2[%c0_5, %c0_6] : memref<8x13824xbf16, #tpu.memory_space<vmem>>, vector<8x13824xbf16>
    tpu.vector_store %arg2[%c0_5, %c0_6], %17 {strides = array<i32>} : memref<8x13824xbf16, #tpu.memory_space<vmem>>, vector<8x13824xbf16>,
    return
  }
  func.func @transform_0(%arg0: i32) -> (i32, i32) {
    %c0_i32 = arith.constant 0 : i32
    %c0_i32_0 = arith.constant 0 : i32
    return %arg0, %c0_i32 : i32, i32
  }
  func.func @transform_1(%arg0: i32) -> (i32, i32) {
    %c0_i32 = arith.constant 0 : i32
    %c0_i32_0 = arith.constant 0 : i32
    return %arg0, %c0_i32 : i32, i32
  }
}

module attributes {stable_mosaic.version = 11 : i64} {
  func.func @_matmul_bias_relu_kernel(%arg0: i32, %arg1: memref<16x256xbf16, #tpu.memory_space<vmem>>, %arg2: memref<256x1024xbf16, #tpu.memory_space<vmem>>, %arg3: memref<16x1xf32, #tpu.memory_space<vmem>>, %arg4: memref<16x1024xbf16, #tpu.memory_space<vmem>>) attributes {dimension_semantics = [#tpu.dimension_semantics<parallel>], iteration_bounds = array<i64: 2>, scalar_prefetch = 0 : i64, scratch_operands = 0 : i64, tpu.core_type = #tpu.core_type<tc>, window_params = [{pipeline_mode = #tpu.pipeline_mode<synchronous>, transform_indices = @transform_0, window_bounds = array<i64: 16, 256>}, {transform_indices = @transform_1, window_bounds = array<i64: 256, 1024>}, {pipeline_mode = #tpu.pipeline_mode<synchronous>, transform_indices = @transform_2, window_bounds = array<i64: 16, 1>}, {transform_indices = @transform_3, window_bounds = array<i64: 16, 1024>}]} {
    %c0 = arith.constant 0 : index
    %c0_0 = arith.constant 0 : index
    %0 = vector.load %arg1[%c0, %c0_0] : memref<16x256xbf16, #tpu.memory_space<vmem>>, vector<16x256xbf16>
    %c0_1 = arith.constant 0 : index
    %c0_2 = arith.constant 0 : index
    %1 = vector.load %arg2[%c0_1, %c0_2] : memref<256x1024xbf16, #tpu.memory_space<vmem>>, vector<256x1024xbf16>
    %cst = arith.constant dense<0.000000e+00> : vector<16x1024xf32>
    %2 = tpu.matmul %0, %1, %cst {dimension_numbers = #tpu.dot_dimension_numbers<[1], [0], [0], [1], [0, 0, 1, 1], [], []>} : vector<16x256xbf16>, vector<256x1024xbf16>, vector<16x1024xf32> -> vector<16x1024xf32>
    %c0_3 = arith.constant 0 : index
    %c0_4 = arith.constant 0 : index
    %3 = vector.load %arg3[%c0_3, %c0_4] : memref<16x1xf32, #tpu.memory_space<vmem>>, vector<16x1xf32>
    %4 = vector.broadcast %3 : vector<16x1xf32> to vector<16x1024xf32>
    %5 = arith.addf %2, %4 : vector<16x1024xf32>
    %cst_5 = arith.constant 0.000000e+00 : f32
    %6 = vector.broadcast %cst_5 : f32 to vector<16x1024xf32>
    %7 = arith.maximumf %5, %6 : vector<16x1024xf32>
    %8 = arith.truncf %7 : vector<16x1024xf32> to vector<16x1024xbf16>
    %c0_6 = arith.constant 0 : index
    %c0_7 = arith.constant 0 : index
    %9 = vector.load %arg4[%c0_6, %c0_7] : memref<16x1024xbf16, #tpu.memory_space<vmem>>, vector<16x1024xbf16>
    tpu.vector_store %arg4[%c0_6, %c0_7], %8 {strides = array<i32>} : memref<16x1024xbf16, #tpu.memory_space<vmem>>, vector<16x1024xbf16>,
    return
  }
  func.func @transform_0(%arg0: i32) -> (i32, i32) {
    %c0_i32 = arith.constant 0 : i32
    %c0_i32_0 = arith.constant 0 : i32
    %c0_i32_1 = arith.constant 0 : i32
    return %c0_i32, %c0_i32_0 : i32, i32
  }
  func.func @transform_1(%arg0: i32) -> (i32, i32) {
    %c0_i32 = arith.constant 0 : i32
    %c0_i32_0 = arith.constant 0 : i32
    return %c0_i32, %arg0 : i32, i32
  }
  func.func @transform_2(%arg0: i32) -> (i32, i32) {
    %c0_i32 = arith.constant 0 : i32
    %c0_i32_0 = arith.constant 0 : i32
    %c0_i32_1 = arith.constant 0 : i32
    return %c0_i32, %c0_i32_0 : i32, i32
  }
  func.func @transform_3(%arg0: i32) -> (i32, i32) {
    %c0_i32 = arith.constant 0 : i32
    %c0_i32_0 = arith.constant 0 : i32
    return %c0_i32, %arg0 : i32, i32
  }
}

module attributes {stable_mosaic.version = 11 : i64} {
  func.func @_matmul_bias_relu_kernel(%arg0: i32, %arg1: memref<24x512xbf16, #tpu.memory_space<vmem>>, %arg2: memref<512x512xbf16, #tpu.memory_space<vmem>>, %arg3: memref<24x1xf32, #tpu.memory_space<vmem>>, %arg4: memref<24x512xbf16, #tpu.memory_space<vmem>>) attributes {dimension_semantics = [#tpu.dimension_semantics<parallel>], iteration_bounds = array<i64: 1>, scalar_prefetch = 0 : i64, scratch_operands = 0 : i64, tpu.core_type = #tpu.core_type<tc>, window_params = [{pipeline_mode = #tpu.pipeline_mode<synchronous>, transform_indices = @transform_0, window_bounds = array<i64: 24, 512>}, {transform_indices = @transform_1, window_bounds = array<i64: 512, 512>}, {pipeline_mode = #tpu.pipeline_mode<synchronous>, transform_indices = @transform_2, window_bounds = array<i64: 24, 1>}, {transform_indices = @transform_3, window_bounds = array<i64: 24, 512>}]} {
    %c0 = arith.constant 0 : index
    %c0_0 = arith.constant 0 : index
    %0 = vector.load %arg1[%c0, %c0_0] : memref<24x512xbf16, #tpu.memory_space<vmem>>, vector<24x512xbf16>
    %c0_1 = arith.constant 0 : index
    %c0_2 = arith.constant 0 : index
    %1 = vector.load %arg2[%c0_1, %c0_2] : memref<512x512xbf16, #tpu.memory_space<vmem>>, vector<512x512xbf16>
    %cst = arith.constant dense<0.000000e+00> : vector<24x512xf32>
    %2 = tpu.matmul %0, %1, %cst {dimension_numbers = #tpu.dot_dimension_numbers<[1], [0], [0], [1], [0, 0, 1, 1], [], []>} : vector<24x512xbf16>, vector<512x512xbf16>, vector<24x512xf32> -> vector<24x512xf32>
    %c0_3 = arith.constant 0 : index
    %c0_4 = arith.constant 0 : index
    %3 = vector.load %arg3[%c0_3, %c0_4] : memref<24x1xf32, #tpu.memory_space<vmem>>, vector<24x1xf32>
    %4 = vector.broadcast %3 : vector<24x1xf32> to vector<24x512xf32>
    %5 = arith.addf %2, %4 : vector<24x512xf32>
    %cst_5 = arith.constant 0.000000e+00 : f32
    %6 = vector.broadcast %cst_5 : f32 to vector<24x512xf32>
    %7 = arith.maximumf %5, %6 : vector<24x512xf32>
    %8 = arith.truncf %7 : vector<24x512xf32> to vector<24x512xbf16>
    %c0_6 = arith.constant 0 : index
    %c0_7 = arith.constant 0 : index
    %9 = vector.load %arg4[%c0_6, %c0_7] : memref<24x512xbf16, #tpu.memory_space<vmem>>, vector<24x512xbf16>
    tpu.vector_store %arg4[%c0_6, %c0_7], %8 {strides = array<i32>} : memref<24x512xbf16, #tpu.memory_space<vmem>>, vector<24x512xbf16>,
    return
  }
  func.func @transform_0(%arg0: i32) -> (i32, i32) {
    %c0_i32 = arith.constant 0 : i32
    %c0_i32_0 = arith.constant 0 : i32
    %c0_i32_1 = arith.constant 0 : i32
    return %c0_i32, %c0_i32_0 : i32, i32
  }
  func.func @transform_1(%arg0: i32) -> (i32, i32) {
    %c0_i32 = arith.constant 0 : i32
    %c0_i32_0 = arith.constant 0 : i32
    return %c0_i32, %arg0 : i32, i32
  }
  func.func @transform_2(%arg0: i32) -> (i32, i32) {
    %c0_i32 = arith.constant 0 : i32
    %c0_i32_0 = arith.constant 0 : i32
    %c0_i32_1 = arith.constant 0 : i32
    return %c0_i32, %c0_i32_0 : i32, i32
  }
  func.func @transform_3(%arg0: i32) -> (i32, i32) {
    %c0_i32 = arith.constant 0 : i32
    %c0_i32_0 = arith.constant 0 : i32
    return %c0_i32, %arg0 : i32, i32
  }
}

module attributes {stable_mosaic.version = 11 : i64} {
  func.func @_matmul_bias_relu_kernel(%arg0: i32, %arg1: memref<36x640xbf16, #tpu.memory_space<vmem>>, %arg2: memref<640x128xbf16, #tpu.memory_space<vmem>>, %arg3: memref<36x1xf32, #tpu.memory_space<vmem>>, %arg4: memref<36x128xbf16, #tpu.memory_space<vmem>>) attributes {dimension_semantics = [#tpu.dimension_semantics<parallel>], iteration_bounds = array<i64: 1>, scalar_prefetch = 0 : i64, scratch_operands = 0 : i64, tpu.core_type = #tpu.core_type<tc>, window_params = [{pipeline_mode = #tpu.pipeline_mode<synchronous>, transform_indices = @transform_0, window_bounds = array<i64: 36, 640>}, {transform_indices = @transform_1, window_bounds = array<i64: 640, 128>}, {pipeline_mode = #tpu.pipeline_mode<synchronous>, transform_indices = @transform_2, window_bounds = array<i64: 36, 1>}, {transform_indices = @transform_3, window_bounds = array<i64: 36, 128>}]} {
    %c0 = arith.constant 0 : index
    %c0_0 = arith.constant 0 : index
    %0 = vector.load %arg1[%c0, %c0_0] : memref<36x640xbf16, #tpu.memory_space<vmem>>, vector<36x640xbf16>
    %c0_1 = arith.constant 0 : index
    %c0_2 = arith.constant 0 : index
    %1 = vector.load %arg2[%c0_1, %c0_2] : memref<640x128xbf16, #tpu.memory_space<vmem>>, vector<640x128xbf16>
    %cst = arith.constant dense<0.000000e+00> : vector<36x128xf32>
    %2 = tpu.matmul %0, %1, %cst {dimension_numbers = #tpu.dot_dimension_numbers<[1], [0], [0], [1], [0, 0, 1, 1], [], []>} : vector<36x640xbf16>, vector<640x128xbf16>, vector<36x128xf32> -> vector<36x128xf32>
    %c0_3 = arith.constant 0 : index
    %c0_4 = arith.constant 0 : index
    %3 = vector.load %arg3[%c0_3, %c0_4] : memref<36x1xf32, #tpu.memory_space<vmem>>, vector<36x1xf32>
    %4 = vector.broadcast %3 : vector<36x1xf32> to vector<36x128xf32>
    %5 = arith.addf %2, %4 : vector<36x128xf32>
    %cst_5 = arith.constant 0.000000e+00 : f32
    %6 = vector.broadcast %cst_5 : f32 to vector<36x128xf32>
    %7 = arith.maximumf %5, %6 : vector<36x128xf32>
    %8 = arith.truncf %7 : vector<36x128xf32> to vector<36x128xbf16>
    %c0_6 = arith.constant 0 : index
    %c0_7 = arith.constant 0 : index
    %9 = vector.load %arg4[%c0_6, %c0_7] : memref<36x128xbf16, #tpu.memory_space<vmem>>, vector<36x128xbf16>
    tpu.vector_store %arg4[%c0_6, %c0_7], %8 {strides = array<i32>} : memref<36x128xbf16, #tpu.memory_space<vmem>>, vector<36x128xbf16>,
    return
  }
  func.func @transform_0(%arg0: i32) -> (i32, i32) {
    %c0_i32 = arith.constant 0 : i32
    %c0_i32_0 = arith.constant 0 : i32
    %c0_i32_1 = arith.constant 0 : i32
    return %c0_i32, %c0_i32_0 : i32, i32
  }
  func.func @transform_1(%arg0: i32) -> (i32, i32) {
    %c0_i32 = arith.constant 0 : i32
    %c0_i32_0 = arith.constant 0 : i32
    return %c0_i32, %arg0 : i32, i32
  }
  func.func @transform_2(%arg0: i32) -> (i32, i32) {
    %c0_i32 = arith.constant 0 : i32
    %c0_i32_0 = arith.constant 0 : i32
    %c0_i32_1 = arith.constant 0 : i32
    return %c0_i32, %c0_i32_0 : i32, i32
  }
  func.func @transform_3(%arg0: i32) -> (i32, i32) {
    %c0_i32 = arith.constant 0 : i32
    %c0_i32_0 = arith.constant 0 : i32
    return %c0_i32, %arg0 : i32, i32
  }
}

module attributes {stable_mosaic.version = 11 : i64} {
  func.func @kernel(%arg0: i32, %arg1: memref<8x1152xbf16, #tpu.memory_space<vmem>>, %arg2: memref<1152x384xbf16, #tpu.memory_space<vmem>>, %arg3: memref<1x384xf32, #tpu.memory_space<vmem>>, %arg4: memref<384x512xbf16, #tpu.memory_space<vmem>>, %arg5: memref<1x512xf32, #tpu.memory_space<vmem>>, %arg6: memref<512x64xbf16, #tpu.memory_space<vmem>>, %arg7: memref<1x64xf32, #tpu.memory_space<vmem>>, %arg8: memref<64x64xbf16, #tpu.memory_space<vmem>>, %arg9: memref<1x64xf32, #tpu.memory_space<vmem>>, %arg10: memref<8x64xf32, #tpu.memory_space<vmem>>) attributes {dimension_semantics = [#tpu.dimension_semantics<parallel>], iteration_bounds = array<i64: 1>, scalar_prefetch = 0 : i64, scratch_operands = 0 : i64, tpu.core_type = #tpu.core_type<tc>, window_params = [{transform_indices = @transform_0, window_bounds = array<i64: 8, 1152>}, {pipeline_mode = #tpu.pipeline_mode<synchronous>, transform_indices = @transform_1, window_bounds = array<i64: 1152, 384>}, {pipeline_mode = #tpu.pipeline_mode<synchronous>, transform_indices = @transform_2, window_bounds = array<i64: 1, 384>}, {pipeline_mode = #tpu.pipeline_mode<synchronous>, transform_indices = @transform_3, window_bounds = array<i64: 384, 512>}, {pipeline_mode = #tpu.pipeline_mode<synchronous>, transform_indices = @transform_4, window_bounds = array<i64: 1, 512>}, {pipeline_mode = #tpu.pipeline_mode<synchronous>, transform_indices = @transform_5, window_bounds = array<i64: 512, 64>}, {pipeline_mode = #tpu.pipeline_mode<synchronous>, transform_indices = @transform_6, window_bounds = array<i64: 1, 64>}, {pipeline_mode = #tpu.pipeline_mode<synchronous>, transform_indices = @transform_7, window_bounds = array<i64: 64, 64>}, {pipeline_mode = #tpu.pipeline_mode<synchronous>, transform_indices = @transform_8, window_bounds = array<i64: 1, 64>}, {transform_indices = @transform_9, window_bounds = array<i64: 8, 64>}]} {
    %c0 = arith.constant 0 : index
    %c0_0 = arith.constant 0 : index
    %0 = vector.load %arg1[%c0, %c0_0] : memref<8x1152xbf16, #tpu.memory_space<vmem>>, vector<8x1152xbf16>
    %c0_1 = arith.constant 0 : index
    %c0_2 = arith.constant 0 : index
    %1 = vector.load %arg2[%c0_1, %c0_2] : memref<1152x384xbf16, #tpu.memory_space<vmem>>, vector<1152x384xbf16>
    %c0_3 = arith.constant 0 : index
    %c0_4 = arith.constant 0 : index
    %2 = vector.load %arg3[%c0_3, %c0_4] : memref<1x384xf32, #tpu.memory_space<vmem>>, vector<1x384xf32>
    %cst = arith.constant dense<0.000000e+00> : vector<8x384xf32>
    %3 = tpu.matmul %0, %1, %cst {dimension_numbers = #tpu.dot_dimension_numbers<[1], [0], [0], [1], [0, 0, 1, 1], [], []>} : vector<8x1152xbf16>, vector<1152x384xbf16>, vector<8x384xf32> -> vector<8x384xf32>
    %4 = vector.broadcast %2 : vector<1x384xf32> to vector<8x384xf32>
    %5 = arith.addf %3, %4 : vector<8x384xf32>
    %cst_5 = arith.constant 0.000000e+00 : f32
    %6 = vector.broadcast %cst_5 : f32 to vector<8x384xf32>
    %7 = arith.maximumf %5, %6 : vector<8x384xf32>
    %8 = arith.truncf %7 : vector<8x384xf32> to vector<8x384xbf16>
    %c0_6 = arith.constant 0 : index
    %c0_7 = arith.constant 0 : index
    %9 = vector.load %arg4[%c0_6, %c0_7] : memref<384x512xbf16, #tpu.memory_space<vmem>>, vector<384x512xbf16>
    %c0_8 = arith.constant 0 : index
    %c0_9 = arith.constant 0 : index
    %10 = vector.load %arg5[%c0_8, %c0_9] : memref<1x512xf32, #tpu.memory_space<vmem>>, vector<1x512xf32>
    %cst_10 = arith.constant dense<0.000000e+00> : vector<8x512xf32>
    %11 = tpu.matmul %8, %9, %cst_10 {dimension_numbers = #tpu.dot_dimension_numbers<[1], [0], [0], [1], [0, 0, 1, 1], [], []>} : vector<8x384xbf16>, vector<384x512xbf16>, vector<8x512xf32> -> vector<8x512xf32>
    %12 = vector.broadcast %10 : vector<1x512xf32> to vector<8x512xf32>
    %13 = arith.addf %11, %12 : vector<8x512xf32>
    %cst_11 = arith.constant 0.000000e+00 : f32
    %14 = vector.broadcast %cst_11 : f32 to vector<8x512xf32>
    %15 = arith.maximumf %13, %14 : vector<8x512xf32>
    %16 = arith.truncf %15 : vector<8x512xf32> to vector<8x512xbf16>
    %c0_12 = arith.constant 0 : index
    %c0_13 = arith.constant 0 : index
    %17 = vector.load %arg6[%c0_12, %c0_13] : memref<512x64xbf16, #tpu.memory_space<vmem>>, vector<512x64xbf16>
    %c0_14 = arith.constant 0 : index
    %c0_15 = arith.constant 0 : index
    %18 = vector.load %arg7[%c0_14, %c0_15] : memref<1x64xf32, #tpu.memory_space<vmem>>, vector<1x64xf32>
    %cst_16 = arith.constant dense<0.000000e+00> : vector<8x64xf32>
    %19 = tpu.matmul %16, %17, %cst_16 {dimension_numbers = #tpu.dot_dimension_numbers<[1], [0], [0], [1], [0, 0, 1, 1], [], []>} : vector<8x512xbf16>, vector<512x64xbf16>, vector<8x64xf32> -> vector<8x64xf32>
    %20 = vector.broadcast %18 : vector<1x64xf32> to vector<8x64xf32>
    %21 = arith.addf %19, %20 : vector<8x64xf32>
    %cst_17 = arith.constant 0.000000e+00 : f32
    %22 = vector.broadcast %cst_17 : f32 to vector<8x64xf32>
    %23 = arith.maximumf %21, %22 : vector<8x64xf32>
    %24 = arith.truncf %23 : vector<8x64xf32> to vector<8x64xbf16>
    %c0_18 = arith.constant 0 : index
    %c0_19 = arith.constant 0 : index
    %25 = vector.load %arg8[%c0_18, %c0_19] : memref<64x64xbf16, #tpu.memory_space<vmem>>, vector<64x64xbf16>
    %c0_20 = arith.constant 0 : index
    %c0_21 = arith.constant 0 : index
    %26 = vector.load %arg9[%c0_20, %c0_21] : memref<1x64xf32, #tpu.memory_space<vmem>>, vector<1x64xf32>
    %cst_22 = arith.constant dense<0.000000e+00> : vector<8x64xf32>
    %27 = tpu.matmul %24, %25, %cst_22 {dimension_numbers = #tpu.dot_dimension_numbers<[1], [0], [0], [1], [0, 0, 1, 1], [], []>} : vector<8x64xbf16>, vector<64x64xbf16>, vector<8x64xf32> -> vector<8x64xf32>
    %28 = vector.broadcast %26 : vector<1x64xf32> to vector<8x64xf32>
    %29 = arith.addf %27, %28 : vector<8x64xf32>
    %cst_23 = arith.constant 0.000000e+00 : f32
    %30 = vector.broadcast %cst_23 : f32 to vector<8x64xf32>
    %31 = arith.maximumf %29, %30 : vector<8x64xf32>
    %c0_24 = arith.constant 0 : index
    %c0_25 = arith.constant 0 : index
    %32 = vector.load %arg10[%c0_24, %c0_25] : memref<8x64xf32, #tpu.memory_space<vmem>>, vector<8x64xf32>
    tpu.vector_store %arg10[%c0_24, %c0_25], %31 {strides = array<i32>} : memref<8x64xf32, #tpu.memory_space<vmem>>, vector<8x64xf32>,
    return
  }
  func.func @transform_0(%arg0: i32) -> (i32, i32) {
    %c0_i32 = arith.constant 0 : i32
    %c0_i32_0 = arith.constant 0 : i32
    return %arg0, %c0_i32 : i32, i32
  }
  func.func @transform_1(%arg0: i32) -> (i32, i32) {
    %c0_i32 = arith.constant 0 : i32
    %c0_i32_0 = arith.constant 0 : i32
    %c0_i32_1 = arith.constant 0 : i32
    return %c0_i32, %c0_i32_0 : i32, i32
  }
  func.func @transform_2(%arg0: i32) -> (i32, i32) {
    %c0_i32 = arith.constant 0 : i32
    %c0_i32_0 = arith.constant 0 : i32
    %c0_i32_1 = arith.constant 0 : i32
    return %c0_i32, %c0_i32_0 : i32, i32
  }
  func.func @transform_3(%arg0: i32) -> (i32, i32) {
    %c0_i32 = arith.constant 0 : i32
    %c0_i32_0 = arith.constant 0 : i32
    %c0_i32_1 = arith.constant 0 : i32
    return %c0_i32, %c0_i32_0 : i32, i32
  }
  func.func @transform_4(%arg0: i32) -> (i32, i32) {
    %c0_i32 = arith.constant 0 : i32
    %c0_i32_0 = arith.constant 0 : i32
    %c0_i32_1 = arith.constant 0 : i32
    return %c0_i32, %c0_i32_0 : i32, i32
  }
  func.func @transform_5(%arg0: i32) -> (i32, i32) {
    %c0_i32 = arith.constant 0 : i32
    %c0_i32_0 = arith.constant 0 : i32
    %c0_i32_1 = arith.constant 0 : i32
    return %c0_i32, %c0_i32_0 : i32, i32
  }
  func.func @transform_6(%arg0: i32) -> (i32, i32) {
    %c0_i32 = arith.constant 0 : i32
    %c0_i32_0 = arith.constant 0 : i32
    %c0_i32_1 = arith.constant 0 : i32
    return %c0_i32, %c0_i32_0 : i32, i32
  }
  func.func @transform_7(%arg0: i32) -> (i32, i32) {
    %c0_i32 = arith.constant 0 : i32
    %c0_i32_0 = arith.constant 0 : i32
    %c0_i32_1 = arith.constant 0 : i32
    return %c0_i32, %c0_i32_0 : i32, i32
  }
  func.func @transform_8(%arg0: i32) -> (i32, i32) {
    %c0_i32 = arith.constant 0 : i32
    %c0_i32_0 = arith.constant 0 : i32
    %c0_i32_1 = arith.constant 0 : i32
    return %c0_i32, %c0_i32_0 : i32, i32
  }
  func.func @transform_9(%arg0: i32) -> (i32, i32) {
    %c0_i32 = arith.constant 0 : i32
    %c0_i32_0 = arith.constant 0 : i32
    return %arg0, %c0_i32 : i32, i32
  }
}

</mosaic_0001>

<bundles_post_ra>
// kernel: conv_head_forward.5
= control target key start
LH: loop header
LB: loop body
LE: loop exit
PB: predicated region body
PF: predicated region fallthrough
CT: control target
= control target key end

     0   :  { %s3283_s0 = inlined_call_operand.vmem [shape: f32[8,13824], index: 0, kind: input, shape index: {}]   ;;  %s3284_s1 = inlined_call_operand.vmem [shape: bf16[8,13824], index: 1, kind: output, shape index: {}]  }
   0x1   :  { %v1284_v0 = vld [vmem:[%s3283_s0] sm:$0xff]  ;;  %v1289_v1 = vld [vmem:[%s3283_s0 + $0x8] sm:$0xff]  ;;  %v1294_v2 = vld [vmem:[%s3283_s0 + $0x10] sm:$0xff] }
   0x2   :  { %v116_v3 = vadd.f32 %v1289_v1, %v1284_v0  ;;  %v1301_v4 = vld [vmem:[%s3283_s0 + $0x18] sm:$0xff]  ;;  %v1307_v6 = vld [vmem:[%s3283_s0 + $0x20] sm:$0xff]  ;;  %v1313_v8 = vld [vmem:[%s3283_s0 + $0x28] sm:$0xff] }
   0x3   :  { %v1319_v10 = vld [vmem:[%s3283_s0 + $0x30] sm:$0xff]  ;;  %v1325_v12 = vld [vmem:[%s3283_s0 + $0x38] sm:$0xff]  ;;  %v1331_v14 = vld [vmem:[%s3283_s0 + $0x40] sm:$0xff] }
   0x4   :  { %v117_v5 = vadd.f32 %v116_v3, %v1294_v2  ;;  %v1337_v16 = vld [vmem:[%s3283_s0 + $0x48] sm:$0xff]  ;;  %v1343_v18 = vld [vmem:[%s3283_s0 + $0x50] sm:$0xff]  ;;  %v1349_v20 = vld [vmem:[%s3283_s0 + $0x58] sm:$0xff] }
   0x5   :  { %v1355_v22 = vld [vmem:[%s3283_s0 + $0x60] sm:$0xff]  ;;  %v1361_v24 = vld [vmem:[%s3283_s0 + $0x68] sm:$0xff]  ;;  %v1367_v26 = vld [vmem:[%s3283_s0 + $0x70] sm:$0xff] }
   0x6   :  { %v118_v7 = vadd.f32 %v117_v5, %v1301_v4  ;;  %v1373_v28 = vld [vmem:[%s3283_s0 + $0x78] sm:$0xff]  ;;  %v1379_v30 = vld [vmem:[%s3283_s0 + $0x80] sm:$0xff]  ;;  %v1385_v32 = vld [vmem:[%s3283_s0 + $0x88] sm:$0xff] }
   0x7   :  { %v1391_v34 = vld [vmem:[%s3283_s0 + $0x90] sm:$0xff]  ;;  %v1397_v36 = vld [vmem:[%s3283_s0 + $0x98] sm:$0xff]  ;;  %v1403_v38 = vld [vmem:[%s3283_s0 + $0xa0] sm:$0xff] }
   0x8   :  { %v119_v9 = vadd.f32 %v118_v7, %v1307_v6  ;;  %v1409_v40 = vld [vmem:[%s3283_s0 + $0xa8] sm:$0xff]  ;;  %v1415_v42 = vld [vmem:[%s3283_s0 + $0xb0] sm:$0xff]  ;;  %v1421_v44 = vld [vmem:[%s3283_s0 + $0xb8] sm:$0xff] }
   0x9   :  { %v1427_v46 = vld [vmem:[%s3283_s0 + $0xc0] sm:$0xff]  ;;  %v1433_v48 = vld [vmem:[%s3283_s0 + $0xc8] sm:$0xff]  ;;  %v1439_v50 = vld [vmem:[%s3283_s0 + $0xd0] sm:$0xff] }
   0xa   :  { %v120_v11 = vadd.f32 %v119_v9, %v1313_v8  ;;  %v1445_v52 = vld [vmem:[%s3283_s0 + $0xd8] sm:$0xff]  ;;  %v1451_v54 = vld [vmem:[%s3283_s0 + $0xe0] sm:$0xff]  ;;  %v1457_v56 = vld [vmem:[%s3283_s0 + $0xe8] sm:$0xff] }
   0xb   :  { %v1463_v58 = vld [vmem:[%s3283_s0 + $0xf0] sm:$0xff]  ;;  %v1469_v60 = vld [vmem:[%s3283_s0 + $0xf8] sm:$0xff]  ;;  %v1475_v62 = vld [vmem:[%s3283_s0 + $0x100] sm:$0xff] }
   0xc   :  { %v121_v13 = vadd.f32 %v120_v11, %v1319_v10  ;;  %v1481_v3 = vld [vmem:[%s3283_s0 + $0x108] sm:$0xff]  ;;  %v1487_v7 = vld [vmem:[%s3283_s0 + $0x110] sm:$0xff]  ;;  %v1493_v11 = vld [vmem:[%s3283_s0 + $0x118] sm:$0xff] }
   0xe   :  { %v122_v15 = vadd.f32 %v121_v13, %v1325_v12 }
  0x10   :  { %v123_v17 = vadd.f32 %v122_v15, %v1331_v14  ;;  %v1499_v15 = vld [vmem:[%s3283_s0 + $0x120] sm:$0xff] }
  0x12   :  { %v124_v19 = vadd.f32 %v123_v17, %v1337_v16 }
  0x14   :  { %v125_v21 = vadd.f32 %v124_v19, %v1343_v18  ;;  %v1505_v19 = vld [vmem:[%s3283_s0 + $0x128] sm:$0xff] }
  0x16   :  { %v126_v23 = vadd.f32 %v125_v21, %v1349_v20 }
  0x18   :  { %v127_v25 = vadd.f32 %v126_v23, %v1355_v22  ;;  %v1511_v23 = vld [vmem:[%s3283_s0 + $0x130] sm:$0xff] }
  0x1a   :  { %v128_v27 = vadd.f32 %v127_v25, %v1361_v24 }
  0x1c   :  { %v129_v29 = vadd.f32 %v128_v27, %v1367_v26  ;;  %v1517_v27 = vld [vmem:[%s3283_s0 + $0x138] sm:$0xff] }
  0x1e   :  { %v130_v31 = vadd.f32 %v129_v29, %v1373_v28 }
  0x20   :  { %v131_v33 = vadd.f32 %v130_v31, %v1379_v30  ;;  %v1523_v31 = vld [vmem:[%s3283_s0 + $0x140] sm:$0xff] }
  0x22   :  { %v132_v35 = vadd.f32 %v131_v33, %v1385_v32 }
  0x24   :  { %v133_v37 = vadd.f32 %v132_v35, %v1391_v34  ;;  %v1529_v35 = vld [vmem:[%s3283_s0 + $0x148] sm:$0xff] }
  0x26   :  { %v134_v39 = vadd.f32 %v133_v37, %v1397_v36 }
  0x28   :  { %v135_v41 = vadd.f32 %v134_v39, %v1403_v38  ;;  %v1535_v39 = vld [vmem:[%s3283_s0 + $0x150] sm:$0xff] }
  0x2a   :  { %v136_v43 = vadd.f32 %v135_v41, %v1409_v40 }
  0x2c   :  { %v137_v45 = vadd.f32 %v136_v43, %v1415_v42  ;;  %v1541_v43 = vld [vmem:[%s3283_s0 + $0x158] sm:$0xff] }
  0x2e   :  { %v138_v47 = vadd.f32 %v137_v45, %v1421_v44 }
  0x30   :  { %v139_v49 = vadd.f32 %v138_v47, %v1427_v46  ;;  %v1547_v47 = vld [vmem:[%s3283_s0 + $0x160] sm:$0xff] }
  0x32   :  { %v140_v51 = vadd.f32 %v139_v49, %v1433_v48 }
  0x34   :  { %v141_v53 = vadd.f32 %v140_v51, %v1439_v50  ;;  %v1553_v51 = vld [vmem:[%s3283_s0 + $0x168] sm:$0xff] }
  0x36   :  { %v142_v55 = vadd.f32 %v141_v53, %v1445_v52 }
  0x38   :  { %v143_v57 = vadd.f32 %v142_v55, %v1451_v54  ;;  %v1559_v55 = vld [vmem:[%s3283_s0 + $0x170] sm:$0xff] }
  0x3a   :  { %v144_v59 = vadd.f32 %v143_v57, %v1457_v56 }
  0x3c   :  { %v145_v61 = vadd.f32 %v144_v59, %v1463_v58  ;;  %v1565_v59 = vld [vmem:[%s3283_s0 + $0x178] sm:$0xff] }
  0x3e   :  { %v146_v63 = vadd.f32 %v145_v61, %v1469_v60 }
  0x40   :  { %v147_v5 = vadd.f32 %v146_v63, %v1475_v62  ;;  %v1571_v63 = vld [vmem:[%s3283_s0 + $0x180] sm:$0xff] }
  0x42   :  { %v148_v9 = vadd.f32 %v147_v5, %v1481_v3 }
  0x44   :  { %v149_v13 = vadd.f32 %v148_v9, %v1487_v7  ;;  %v1577_v9 = vld [vmem:[%s3283_s0 + $0x188] sm:$0xff] }
  0x46   :  { %v150_v17 = vadd.f32 %v149_v13, %v1493_v11 }
  0x48   :  { %v151_v21 = vadd.f32 %v150_v17, %v1499_v15  ;;  %v1583_v17 = vld [vmem:[%s3283_s0 + $0x190] sm:$0xff] }
  0x4a   :  { %v152_v25 = vadd.f32 %v151_v21, %v1505_v19 }
  0x4c   :  { %v153_v29 = vadd.f32 %v152_v25, %v1511_v23  ;;  %v1589_v25 = vld [vmem:[%s3283_s0 + $0x198] sm:$0xff] }
  0x4e   :  { %v154_v33 = vadd.f32 %v153_v29, %v1517_v27 }
  0x50   :  { %v155_v37 = vadd.f32 %v154_v33, %v1523_v31  ;;  %v1595_v33 = vld [vmem:[%s3283_s0 + $0x1a0] sm:$0xff] }
  0x52   :  { %v156_v41 = vadd.f32 %v155_v37, %v1529_v35 }
  0x54   :  { %v157_v45 = vadd.f32 %v156_v41, %v1535_v39  ;;  %v1601_v41 = vld [vmem:[%s3283_s0 + $0x1a8] sm:$0xff] }
  0x55   :  { %3398 = vst [vmem:[#allocation2_spill] sm:$0xff] %v1601_v41 }
  0x56   :  { %v158_v49 = vadd.f32 %v157_v45, %v1541_v43 }
  0x58   :  { %v159_v53 = vadd.f32 %v158_v49, %v1547_v47  ;;  %v1607_v49 = vld [vmem:[%s3283_s0 + $0x1b0] sm:$0xff] }
  0x59   :  { %3399 = vst [vmem:[#allocation3_spill] sm:$0xff] %v1607_v49 }
  0x5a   :  { %v160_v57 = vadd.f32 %v159_v53, %v1553_v51 }
  0x5c   :  { %v161_v61 = vadd.f32 %v160_v57, %v1559_v55  ;;  %v1613_v57 = vld [vmem:[%s3283_s0 + $0x1b8] sm:$0xff] }
  0x5d   :  { %3400 = vst [vmem:[#allocation4_spill] sm:$0xff] %v1613_v57 }
  0x5e   :  { %v162_v5 = vadd.f32 %v161_v61, %v1565_v59 }
  0x60   :  { %v163_v13 = vadd.f32 %v162_v5, %v1571_v63  ;;  %v1619_v5 = vld [vmem:[%s3283_s0 + $0x1c0] sm:$0xff] }
  0x61   :  { %3401 = vst [vmem:[#allocation5_spill] sm:$0xff] %v1619_v5 }
  0x62   :  { %v164_v21 = vadd.f32 %v163_v13, %v1577_v9 }
  0x64   :  { %v165_v29 = vadd.f32 %v164_v21, %v1583_v17  ;;  %v1625_v21 = vld [vmem:[%s3283_s0 + $0x1c8] sm:$0xff] }
  0x65   :  { %3402 = vst [vmem:[#allocation6_spill] sm:$0xff] %v1625_v21 }
  0x66   :  { %v166_v37 = vadd.f32 %v165_v29, %v1589_v25 }
  0x68   :  { %v167_v45 = vadd.f32 %v166_v37, %v1595_v33  ;;  %v1631_v37 = vld [vmem:[%s3283_s0 + $0x1d0] sm:$0xff] }
  0x69   :  { %3403 = vst [vmem:[#allocation7_spill] sm:$0xff] %v1631_v37 }
  0x6a   :  { %v168_v53 = vadd.f32 %v167_v45, %v1601_v41 }
  0x6c   :  { %v169_v61 = vadd.f32 %v168_v53, %v1607_v49  ;;  %v1637_v53 = vld [vmem:[%s3283_s0 + $0x1d8] sm:$0xff] }
  0x6d   :  { %3404 = vst [vmem:[#allocation8_spill] sm:$0xff] %v1637_v53 }
  0x6e   :  { %v170_v13 = vadd.f32 %v169_v61, %v1613_v57  ;;  %v1643_v57 = vld [vmem:[%s3283_s0 + $0x1e0] sm:$0xff] }
  0x6f   :  { %3405 = vst [vmem:[#allocation9_spill] sm:$0xff] %v1643_v57 }
  0x70   :  { %v171_v29 = vadd.f32 %v170_v13, %v1619_v5  ;;  %v1649_v5 = vld [vmem:[%s3283_s0 + $0x1e8] sm:$0xff] }
  0x71   :  { %3406 = vst [vmem:[#allocation10_spill] sm:$0xff] %v1649_v5 }
  0x72   :  { %v172_v45 = vadd.f32 %v171_v29, %v1625_v21  ;;  %v1655_v21 = vld [vmem:[%s3283_s0 + $0x1f0] sm:$0xff] }
  0x73   :  { %3407 = vst [vmem:[#allocation11_spill] sm:$0xff] %v1655_v21 }
  0x74   :  { %v173_v61 = vadd.f32 %v172_v45, %v1631_v37  ;;  %v1661_v37 = vld [vmem:[%s3283_s0 + $0x1f8] sm:$0xff] }
  0x75   :  { %3408 = vst [vmem:[#allocation12_spill] sm:$0xff] %v1661_v37 }
  0x76   :  { %v174_v13 = vadd.f32 %v173_v61, %v1637_v53  ;;  %v1667_v53 = vld [vmem:[%s3283_s0 + $0x200] sm:$0xff] }
  0x77   :  { %3409 = vst [vmem:[#allocation13_spill] sm:$0xff] %v1667_v53 }
  0x78   :  { %v175_v29 = vadd.f32 %v174_v13, %v1643_v57  ;;  %v1673_v57 = vld [vmem:[%s3283_s0 + $0x208] sm:$0xff] }
  0x79   :  { %3410 = vst [vmem:[#allocation14_spill] sm:$0xff] %v1673_v57 }
  0x7a   :  { %v176_v45 = vadd.f32 %v175_v29, %v1649_v5  ;;  %v1679_v5 = vld [vmem:[%s3283_s0 + $0x210] sm:$0xff] }
  0x7b   :  { %3411 = vst [vmem:[#allocation15_spill] sm:$0xff] %v1679_v5 }
  0x7c   :  { %v177_v61 = vadd.f32 %v176_v45, %v1655_v21  ;;  %v1685_v21 = vld [vmem:[%s3283_s0 + $0x218] sm:$0xff] }
  0x7d   :  { %3412 = vst [vmem:[#allocation16_spill] sm:$0xff] %v1685_v21 }
  0x7e   :  { %v178_v13 = vadd.f32 %v177_v61, %v1661_v37  ;;  %v1691_v37 = vld [vmem:[%s3283_s0 + $0x220] sm:$0xff] }
  0x7f   :  { %3413 = vst [vmem:[#allocation17_spill] sm:$0xff] %v1691_v37 }
  0x80   :  { %v179_v29 = vadd.f32 %v178_v13, %v1667_v53  ;;  %v1697_v53 = vld [vmem:[%s3283_s0 + $0x228] sm:$0xff] }
  0x81   :  { %3414 = vst [vmem:[#allocation18_spill] sm:$0xff] %v1697_v53 }
  0x82   :  { %v180_v45 = vadd.f32 %v179_v29, %v1673_v57  ;;  %v1703_v57 = vld [vmem:[%s3283_s0 + $0x230] sm:$0xff] }
  0x83   :  { %3415 = vst [vmem:[#allocation19_spill] sm:$0xff] %v1703_v57 }
  0x84   :  { %v181_v61 = vadd.f32 %v180_v45, %v1679_v5  ;;  %v1709_v5 = vld [vmem:[%s3283_s0 + $0x238] sm:$0xff] }
  0x85   :  { %3416 = vst [vmem:[#allocation20_spill] sm:$0xff] %v1709_v5 }
  0x86   :  { %v182_v13 = vadd.f32 %v181_v61, %v1685_v21  ;;  %v1715_v21 = vld [vmem:[%s3283_s0 + $0x240] sm:$0xff] }
  0x87   :  { %3417 = vst [vmem:[#allocation21_spill] sm:$0xff] %v1715_v21 }
  0x88   :  { %v183_v29 = vadd.f32 %v182_v13, %v1691_v37  ;;  %v1721_v37 = vld [vmem:[%s3283_s0 + $0x248] sm:$0xff] }
  0x89   :  { %3418 = vst [vmem:[#allocation22_spill] sm:$0xff] %v1721_v37 }
  0x8a   :  { %v184_v45 = vadd.f32 %v183_v29, %v1697_v53  ;;  %v1727_v53 = vld [vmem:[%s3283_s0 + $0x250] sm:$0xff] }
  0x8b   :  { %3419 = vst [vmem:[#allocation23_spill] sm:$0xff] %v1727_v53 }
  0x8c   :  { %v185_v61 = vadd.f32 %v184_v45, %v1703_v57  ;;  %v1733_v57 = vld [vmem:[%s3283_s0 + $0x258] sm:$0xff] }
  0x8d   :  { %3420 = vst [vmem:[#allocation24_spill] sm:$0xff] %v1733_v57 }
  0x8e   :  { %v186_v13 = vadd.f32 %v185_v61, %v1709_v5  ;;  %v1739_v5 = vld [vmem:[%s3283_s0 + $0x260] sm:$0xff] }
  0x8f   :  { %3421 = vst [vmem:[#allocation25_spill] sm:$0xff] %v1739_v5 }
  0x90   :  { %v187_v29 = vadd.f32 %v186_v13, %v1715_v21  ;;  %v1745_v21 = vld [vmem:[%s3283_s0 + $0x268] sm:$0xff] }
  0x91   :  { %3422 = vst [vmem:[#allocation26_spill] sm:$0xff] %v1745_v21 }
  0x92   :  { %v188_v45 = vadd.f32 %v187_v29, %v1721_v37  ;;  %v1751_v37 = vld [vmem:[%s3283_s0 + $0x270] sm:$0xff] }
  0x93   :  { %3423 = vst [vmem:[#allocation27_spill] sm:$0xff] %v1751_v37 }
  0x94   :  { %v189_v61 = vadd.f32 %v188_v45, %v1727_v53  ;;  %v1757_v53 = vld [vmem:[%s3283_s0 + $0x278] sm:$0xff] }
  0x95   :  { %3424 = vst [vmem:[#allocation28_spill] sm:$0xff] %v1757_v53 }
  0x96   :  { %v190_v13 = vadd.f32 %v189_v61, %v1733_v57  ;;  %v1763_v57 = vld [vmem:[%s3283_s0 + $0x280] sm:$0xff] }
  0x97   :  { %3425 = vst [vmem:[#allocation29_spill] sm:$0xff] %v1763_v57 }
  0x98   :  { %v191_v29 = vadd.f32 %v190_v13, %v1739_v5  ;;  %v1769_v5 = vld [vmem:[%s3283_s0 + $0x288] sm:$0xff] }
  0x99   :  { %3426 = vst [vmem:[#allocation30_spill] sm:$0xff] %v1769_v5 }
  0x9a   :  { %v192_v45 = vadd.f32 %v191_v29, %v1745_v21  ;;  %v1775_v21 = vld [vmem:[%s3283_s0 + $0x290] sm:$0xff] }
  0x9b   :  { %3427 = vst [vmem:[#allocation31_spill] sm:$0xff] %v1775_v21 }
  0x9c   :  { %v193_v61 = vadd.f32 %v192_v45, %v1751_v37  ;;  %v1781_v37 = vld [vmem:[%s3283_s0 + $0x298] sm:$0xff] }
  0x9d   :  { %3428 = vst [vmem:[#allocation32_spill] sm:$0xff] %v1781_v37 }
  0x9e   :  { %v194_v13 = vadd.f32 %v193_v61, %v1757_v53  ;;  %v1787_v53 = vld [vmem:[%s3283_s0 + $0x2a0] sm:$0xff] }
  0x9f   :  { %3429 = vst [vmem:[#allocation33_spill] sm:$0xff] %v1787_v53 }
  0xa0   :  { %v195_v29 = vadd.f32 %v194_v13, %v1763_v57  ;;  %v1793_v57 = vld [vmem:[%s3283_s0 + $0x2a8] sm:$0xff] }
  0xa1   :  { %3430 = vst [vmem:[#allocation34_spill] sm:$0xff] %v1793_v57 }
  0xa2   :  { %v196_v45 = vadd.f32 %v195_v29, %v1769_v5  ;;  %v1799_v5 = vld [vmem:[%s3283_s0 + $0x2b0] sm:$0xff] }
  0xa3   :  { %3431 = vst [vmem:[#allocation35_spill] sm:$0xff] %v1799_v5 }
  0xa4   :  { %v197_v61 = vadd.f32 %v196_v45, %v1775_v21  ;;  %v1805_v21 = vld [vmem:[%s3283_s0 + $0x2b8] sm:$0xff] }
  0xa5   :  { %3432 = vst [vmem:[#allocation36_spill] sm:$0xff] %v1805_v21 }
  0xa6   :  { %v198_v13 = vadd.f32 %v197_v61, %v1781_v37  ;;  %v1811_v37 = vld [vmem:[%s3283_s0 + $0x2c0] sm:$0xff] }
  0xa7   :  { %3433 = vst [vmem:[#allocation37_spill] sm:$0xff] %v1811_v37 }
  0xa8   :  { %v199_v29 = vadd.f32 %v198_v13, %v1787_v53  ;;  %v1817_v53 = vld [vmem:[%s3283_s0 + $0x2c8] sm:$0xff] }
  0xa9   :  { %3434 = vst [vmem:[#allocation38_spill] sm:$0xff] %v1817_v53 }
  0xaa   :  { %v200_v45 = vadd.f32 %v199_v29, %v1793_v57  ;;  %v1823_v57 = vld [vmem:[%s3283_s0 + $0x2d0] sm:$0xff] }
  0xab   :  { %3435 = vst [vmem:[#allocation39_spill] sm:$0xff] %v1823_v57 }
  0xac   :  { %v201_v61 = vadd.f32 %v200_v45, %v1799_v5  ;;  %v1829_v5 = vld [vmem:[%s3283_s0 + $0x2d8] sm:$0xff] }
  0xad   :  { %3436 = vst [vmem:[#allocation40_spill] sm:$0xff] %v1829_v5 }
  0xae   :  { %v202_v13 = vadd.f32 %v201_v61, %v1805_v21  ;;  %v1835_v21 = vld [vmem:[%s3283_s0 + $0x2e0] sm:$0xff] }
  0xaf   :  { %3437 = vst [vmem:[#allocation41_spill] sm:$0xff] %v1835_v21 }
  0xb0   :  { %v203_v29 = vadd.f32 %v202_v13, %v1811_v37  ;;  %v1841_v37 = vld [vmem:[%s3283_s0 + $0x2e8] sm:$0xff] }
  0xb1   :  { %3438 = vst [vmem:[#allocation42_spill] sm:$0xff] %v1841_v37 }
  0xb2   :  { %v204_v45 = vadd.f32 %v203_v29, %v1817_v53  ;;  %v1847_v53 = vld [vmem:[%s3283_s0 + $0x2f0] sm:$0xff] }
  0xb3   :  { %3439 = vst [vmem:[#allocation43_spill] sm:$0xff] %v1847_v53 }
  0xb4   :  { %v205_v61 = vadd.f32 %v204_v45, %v1823_v57  ;;  %v1853_v57 = vld [vmem:[%s3283_s0 + $0x2f8] sm:$0xff] }
  0xb5   :  { %3440 = vst [vmem:[#allocation44_spill] sm:$0xff] %v1853_v57 }
  0xb6   :  { %v206_v13 = vadd.f32 %v205_v61, %v1829_v5  ;;  %v1859_v5 = vld [vmem:[%s3283_s0 + $0x300] sm:$0xff] }
  0xb7   :  { %3441 = vst [vmem:[#allocation45_spill] sm:$0xff] %v1859_v5 }
  0xb8   :  { %v207_v29 = vadd.f32 %v206_v13, %v1835_v21  ;;  %v1865_v21 = vld [vmem:[%s3283_s0 + $0x308] sm:$0xff] }
  0xb9   :  { %3442 = vst [vmem:[#allocation46_spill] sm:$0xff] %v1865_v21 }
  0xba   :  { %v208_v45 = vadd.f32 %v207_v29, %v1841_v37  ;;  %v1871_v37 = vld [vmem:[%s3283_s0 + $0x310] sm:$0xff] }
  0xbb   :  { %3443 = vst [vmem:[#allocation47_spill] sm:$0xff] %v1871_v37 }
  0xbc   :  { %v209_v61 = vadd.f32 %v208_v45, %v1847_v53  ;;  %v1877_v53 = vld [vmem:[%s3283_s0 + $0x318] sm:$0xff] }
  0xbd   :  { %3444 = vst [vmem:[#allocation48_spill] sm:$0xff] %v1877_v53 }
  0xbe   :  { %v210_v13 = vadd.f32 %v209_v61, %v1853_v57  ;;  %v1883_v57 = vld [vmem:[%s3283_s0 + $0x320] sm:$0xff] }
  0xbf   :  { %3445 = vst [vmem:[#allocation49_spill] sm:$0xff] %v1883_v57 }
  0xc0   :  { %v211_v29 = vadd.f32 %v210_v13, %v1859_v5  ;;  %v1889_v5 = vld [vmem:[%s3283_s0 + $0x328] sm:$0xff] }
  0xc1   :  { %3446 = vst [vmem:[#allocation50_spill] sm:$0xff] %v1889_v5 }
  0xc2   :  { %v212_v45 = vadd.f32 %v211_v29, %v1865_v21  ;;  %v1895_v21 = vld [vmem:[%s3283_s0 + $0x330] sm:$0xff] }
  0xc3   :  { %3447 = vst [vmem:[#allocation51_spill] sm:$0xff] %v1895_v21 }
  0xc4   :  { %v213_v61 = vadd.f32 %v212_v45, %v1871_v37  ;;  %v1901_v37 = vld [vmem:[%s3283_s0 + $0x338] sm:$0xff] }
  0xc5   :  { %3448 = vst [vmem:[#allocation52_spill] sm:$0xff] %v1901_v37 }
  0xc6   :  { %v214_v13 = vadd.f32 %v213_v61, %v1877_v53  ;;  %v1907_v53 = vld [vmem:[%s3283_s0 + $0x340] sm:$0xff] }
  0xc8   :  { %v215_v29 = vadd.f32 %v214_v13, %v1883_v57  ;;  %v1913_v57 = vld [vmem:[%s3283_s0 + $0x348] sm:$0xff] }
  0xc9   :  { %3449 = vst [vmem:[#allocation53_spill] sm:$0xff] %v1913_v57 }
  0xca   :  { %v216_v45 = vadd.f32 %v215_v29, %v1889_v5  ;;  %v1919_v5 = vld [vmem:[%s3283_s0 + $0x350] sm:$0xff] }
  0xcc   :  { %v217_v61 = vadd.f32 %v216_v45, %v1895_v21  ;;  %v1925_v21 = vld [vmem:[%s3283_s0 + $0x358] sm:$0xff] }
  0xcd   :  { %3450 = vst [vmem:[#allocation54_spill] sm:$0xff] %v1925_v21 }
  0xce   :  { %v218_v13 = vadd.f32 %v217_v61, %v1901_v37 }
  0xd0   :  { %v219_v29 = vadd.f32 %v218_v13, %v1907_v53 }
  0xd2   :  { %v220_v45 = vadd.f32 %v219_v29, %v1913_v57 }
  0xd4   :  { %v221_v61 = vadd.f32 %v220_v45, %v1919_v5 }
  0xd6   :  { %v222_v37 = vadd.f32 %v221_v61, %v1925_v21 }
  0xd8   :  { %223 = vadd.xlane.f32.xlu0 %v222_v37 }
 0x165   :  { %v224_v49 = vpop.xlane.xlu0 %223 }
 0x166   :  { %v1929_v41 = vmul.f32 7.233796e-05, %v224_v49 }
 0x168   :  { %v1933_v13 = vsub.f32 %v1284_v0, %v1929_v41  ;;  %v1937_v29 = vsub.f32 %v1289_v1, %v1929_v41  ;;  %v1941_v57 = vsub.f32 %v1294_v2, %v1929_v41  ;;  %v1949_v49 = vsub.f32 %v1301_v4, %v1929_v41 }
 0x169   :  { %v1953_v0 = vsub.f32 %v1307_v6, %v1929_v41  ;;  %v1959_v2 = vsub.f32 %v1313_v8, %v1929_v41  ;;  %v1965_v4 = vsub.f32 %v1319_v10, %v1929_v41 }
 0x16a   :  { %3451 = vst [vmem:[#allocation55_spill] sm:$0xff] %v1933_v13  ;;  %3452 = vst [vmem:[#allocation56_spill] sm:$0xff] %v1937_v29  ;;  %v334_v45 = vmul.f32 %v1933_v13, %v1933_v13  ;;  %v335_v37 = vmul.f32 %v1937_v29, %v1937_v29  ;;  %v336_v1 = vmul.f32 %v1941_v57, %v1941_v57 }
 0x16b   :  { %3453 = vst [vmem:[#allocation57_spill] sm:$0xff] %v1941_v57  ;;  %v337_v13 = vmul.f32 %v1949_v49, %v1949_v49  ;;  %v338_v6 = vmul.f32 %v1953_v0, %v1953_v0  ;;  %v1971_v57 = vsub.f32 %v1325_v12, %v1929_v41  ;;  %v339_v8 = vmul.f32 %v1959_v2, %v1959_v2 }
 0x16c   :  { %v442_v61 = vadd.f32 %v335_v37, %v334_v45  ;;  %v1977_v37 = vsub.f32 %v1331_v14, %v1929_v41  ;;  %v340_v10 = vmul.f32 %v1965_v4, %v1965_v4 }
 0x16d   :  { %v341_v12 = vmul.f32 %v1971_v57, %v1971_v57 }
 0x16e   :  { %v443_v29 = vadd.f32 %v442_v61, %v336_v1  ;;  %v1983_v61 = vsub.f32 %v1337_v16, %v1929_v41  ;;  %v342_v14 = vmul.f32 %v1977_v37, %v1977_v37 }
 0x170   :  { %v444_v21 = vadd.f32 %v443_v29, %v337_v13  ;;  %v1989_v29 = vsub.f32 %v1343_v18, %v1929_v41  ;;  %v343_v16 = vmul.f32 %v1983_v61, %v1983_v61 }
 0x172   :  { %v445_v45 = vadd.f32 %v444_v21, %v338_v6  ;;  %v1995_v6 = vsub.f32 %v1349_v20, %v1929_v41  ;;  %v344_v18 = vmul.f32 %v1989_v29, %v1989_v29 }
 0x174   :  { %v446_v1 = vadd.f32 %v445_v45, %v339_v8  ;;  %v2001_v45 = vsub.f32 %v1355_v22, %v1929_v41  ;;  %v345_v20 = vmul.f32 %v1995_v6, %v1995_v6 }
 0x176   :  { %v447_v13 = vadd.f32 %v446_v1, %v340_v10  ;;  %v2007_v1 = vsub.f32 %v1361_v24, %v1929_v41  ;;  %v346_v22 = vmul.f32 %v2001_v45, %v2001_v45 }
 0x178   :  { %v448_v21 = vadd.f32 %v447_v13, %v341_v12  ;;  %v2013_v13 = vsub.f32 %v1367_v26, %v1929_v41  ;;  %v347_v24 = vmul.f32 %v2007_v1, %v2007_v1 }
 0x17a   :  { %v449_v8 = vadd.f32 %v448_v21, %v342_v14  ;;  %v2019_v21 = vsub.f32 %v1373_v28, %v1929_v41  ;;  %v348_v26 = vmul.f32 %v2013_v13, %v2013_v13 }
 0x17c   :  { %v450_v10 = vadd.f32 %v449_v8, %v343_v16  ;;  %v2025_v8 = vsub.f32 %v1379_v30, %v1929_v41  ;;  %v349_v28 = vmul.f32 %v2019_v21, %v2019_v21 }
 0x17e   :  { %v451_v12 = vadd.f32 %v450_v10, %v344_v18  ;;  %v2031_v10 = vsub.f32 %v1385_v32, %v1929_v41  ;;  %v350_v30 = vmul.f32 %v2025_v8, %v2025_v8 }
 0x180   :  { %v452_v14 = vadd.f32 %v451_v12, %v345_v20  ;;  %v2037_v12 = vsub.f32 %v1391_v34, %v1929_v41  ;;  %v351_v32 = vmul.f32 %v2031_v10, %v2031_v10 }
 0x182   :  { %v453_v16 = vadd.f32 %v452_v14, %v346_v22  ;;  %v2043_v14 = vsub.f32 %v1397_v36, %v1929_v41  ;;  %v352_v34 = vmul.f32 %v2037_v12, %v2037_v12 }
 0x184   :  { %v454_v18 = vadd.f32 %v453_v16, %v347_v24  ;;  %v2049_v16 = vsub.f32 %v1403_v38, %v1929_v41  ;;  %v353_v36 = vmul.f32 %v2043_v14, %v2043_v14 }
 0x186   :  { %v455_v20 = vadd.f32 %v454_v18, %v348_v26  ;;  %v2055_v18 = vsub.f32 %v1409_v40, %v1929_v41  ;;  %v354_v38 = vmul.f32 %v2049_v16, %v2049_v16 }
 0x188   :  { %v456_v22 = vadd.f32 %v455_v20, %v349_v28  ;;  %v2061_v20 = vsub.f32 %v1415_v42, %v1929_v41  ;;  %v355_v40 = vmul.f32 %v2055_v18, %v2055_v18 }
 0x18a   :  { %v457_v24 = vadd.f32 %v456_v22, %v350_v30  ;;  %v2067_v22 = vsub.f32 %v1421_v44, %v1929_v41  ;;  %v356_v42 = vmul.f32 %v2061_v20, %v2061_v20 }
 0x18c   :  { %v458_v26 = vadd.f32 %v457_v24, %v351_v32  ;;  %v2073_v24 = vsub.f32 %v1427_v46, %v1929_v41  ;;  %v357_v44 = vmul.f32 %v2067_v22, %v2067_v22 }
 0x18e   :  { %v459_v28 = vadd.f32 %v458_v26, %v352_v34  ;;  %v2079_v26 = vsub.f32 %v1433_v48, %v1929_v41  ;;  %v358_v46 = vmul.f32 %v2073_v24, %v2073_v24 }
 0x190   :  { %v460_v30 = vadd.f32 %v459_v28, %v353_v36  ;;  %v2085_v28 = vsub.f32 %v1439_v50, %v1929_v41  ;;  %v359_v48 = vmul.f32 %v2079_v26, %v2079_v26 }
 0x192   :  { %v461_v32 = vadd.f32 %v460_v30, %v354_v38  ;;  %v2091_v30 = vsub.f32 %v1445_v52, %v1929_v41  ;;  %v360_v50 = vmul.f32 %v2085_v28, %v2085_v28 }
 0x194   :  { %v462_v34 = vadd.f32 %v461_v32, %v355_v40  ;;  %v2097_v32 = vsub.f32 %v1451_v54, %v1929_v41  ;;  %v361_v52 = vmul.f32 %v2091_v30, %v2091_v30 }
 0x196   :  { %v463_v36 = vadd.f32 %v462_v34, %v356_v42  ;;  %v2103_v34 = vsub.f32 %v1457_v56, %v1929_v41  ;;  %v362_v54 = vmul.f32 %v2097_v32, %v2097_v32 }
 0x198   :  { %v464_v38 = vadd.f32 %v463_v36, %v357_v44  ;;  %v2109_v36 = vsub.f32 %v1463_v58, %v1929_v41  ;;  %v363_v56 = vmul.f32 %v2103_v34, %v2103_v34 }
 0x19a   :  { %v465_v40 = vadd.f32 %v464_v38, %v358_v46  ;;  %v2115_v38 = vsub.f32 %v1469_v60, %v1929_v41  ;;  %v364_v58 = vmul.f32 %v2109_v36, %v2109_v36 }
 0x19c   :  { %v466_v42 = vadd.f32 %v465_v40, %v359_v48  ;;  %v2121_v40 = vsub.f32 %v1475_v62, %v1929_v41  ;;  %v365_v60 = vmul.f32 %v2115_v38, %v2115_v38 }
 0x19e   :  { %v467_v44 = vadd.f32 %v466_v42, %v360_v50  ;;  %v2127_v42 = vsub.f32 %v1481_v3, %v1929_v41  ;;  %v366_v62 = vmul.f32 %v2121_v40, %v2121_v40 }
 0x1a0   :  { %v468_v46 = vadd.f32 %v467_v44, %v361_v52  ;;  %v2133_v44 = vsub.f32 %v1487_v7, %v1929_v41  ;;  %v367_v3 = vmul.f32 %v2127_v42, %v2127_v42 }
 0x1a2   :  { %v469_v48 = vadd.f32 %v468_v46, %v362_v54  ;;  %v2139_v46 = vsub.f32 %v1493_v11, %v1929_v41  ;;  %v368_v7 = vmul.f32 %v2133_v44, %v2133_v44 }
 0x1a4   :  { %v470_v50 = vadd.f32 %v469_v48, %v363_v56  ;;  %v2145_v48 = vsub.f32 %v1499_v15, %v1929_v41  ;;  %v369_v11 = vmul.f32 %v2139_v46, %v2139_v46 }
 0x1a6   :  { %v471_v52 = vadd.f32 %v470_v50, %v364_v58  ;;  %v2151_v50 = vsub.f32 %v1505_v19, %v1929_v41  ;;  %v370_v15 = vmul.f32 %v2145_v48, %v2145_v48 }
 0x1a8   :  { %v472_v54 = vadd.f32 %v471_v52, %v365_v60  ;;  %v2157_v52 = vsub.f32 %v1511_v23, %v1929_v41  ;;  %v371_v19 = vmul.f32 %v2151_v50, %v2151_v50 }
 0x1aa   :  { %v473_v56 = vadd.f32 %v472_v54, %v366_v62  ;;  %v2163_v54 = vsub.f32 %v1517_v27, %v1929_v41  ;;  %v372_v23 = vmul.f32 %v2157_v52, %v2157_v52 }
 0x1ac   :  { %v474_v58 = vadd.f32 %v473_v56, %v367_v3  ;;  %v2169_v56 = vsub.f32 %v1523_v31, %v1929_v41  ;;  %v373_v27 = vmul.f32 %v2163_v54, %v2163_v54 }
 0x1ae   :  { %v475_v60 = vadd.f32 %v474_v58, %v368_v7  ;;  %v2175_v58 = vsub.f32 %v1529_v35, %v1929_v41  ;;  %v374_v31 = vmul.f32 %v2169_v56, %v2169_v56 }
 0x1b0   :  { %v476_v62 = vadd.f32 %v475_v60, %v369_v11  ;;  %v2181_v60 = vsub.f32 %v1535_v39, %v1929_v41  ;;  %v375_v35 = vmul.f32 %v2175_v58, %v2175_v58 }
 0x1b2   :  { %v477_v3 = vadd.f32 %v476_v62, %v370_v15  ;;  %v2187_v62 = vsub.f32 %v1541_v43, %v1929_v41  ;;  %v376_v39 = vmul.f32 %v2181_v60, %v2181_v60 }
 0x1b4   :  { %v478_v7 = vadd.f32 %v477_v3, %v371_v19  ;;  %v2193_v3 = vsub.f32 %v1547_v47, %v1929_v41  ;;  %v377_v43 = vmul.f32 %v2187_v62, %v2187_v62 }
 0x1b6   :  { %v479_v11 = vadd.f32 %v478_v7, %v372_v23  ;;  %v2199_v7 = vsub.f32 %v1553_v51, %v1929_v41  ;;  %v378_v47 = vmul.f32 %v2193_v3, %v2193_v3 }
 0x1b8   :  { %v480_v15 = vadd.f32 %v479_v11, %v373_v27  ;;  %v2205_v11 = vsub.f32 %v1559_v55, %v1929_v41  ;;  %v379_v51 = vmul.f32 %v2199_v7, %v2199_v7 }
 0x1ba   :  { %v481_v19 = vadd.f32 %v480_v15, %v374_v31  ;;  %v2211_v15 = vsub.f32 %v1565_v59, %v1929_v41  ;;  %v380_v55 = vmul.f32 %v2205_v11, %v2205_v11 }
 0x1bc   :  { %v482_v23 = vadd.f32 %v481_v19, %v375_v35  ;;  %v2217_v19 = vsub.f32 %v1571_v63, %v1929_v41  ;;  %v381_v59 = vmul.f32 %v2211_v15, %v2211_v15 }
 0x1be   :  { %v483_v27 = vadd.f32 %v482_v23, %v376_v39  ;;  %3454 = vst [vmem:[#allocation58_spill] sm:$0xff] %v2217_v19  ;;  %v2223_v23 = vsub.f32 %v1577_v9, %v1929_v41  ;;  %v382_v63 = vmul.f32 %v2217_v19, %v2217_v19 }
 0x1c0   :  { %v484_v31 = vadd.f32 %v483_v27, %v377_v43  ;;  %3455 = vst [vmem:[#allocation59_spill] sm:$0xff] %v2223_v23  ;;  %v2229_v27 = vsub.f32 %v1583_v17, %v1929_v41  ;;  %v383_v9 = vmul.f32 %v2223_v23, %v2223_v23 }
 0x1c2   :  { %v485_v35 = vadd.f32 %v484_v31, %v378_v47  ;;  %3456 = vst [vmem:[#allocation60_spill] sm:$0xff] %v2229_v27  ;;  %v2235_v31 = vsub.f32 %v1589_v25, %v1929_v41  ;;  %v384_v17 = vmul.f32 %v2229_v27, %v2229_v27 }
 0x1c4   :  { %v486_v39 = vadd.f32 %v485_v35, %v379_v51  ;;  %3457 = vst [vmem:[#allocation61_spill] sm:$0xff] %v2235_v31  ;;  %v2241_v35 = vsub.f32 %v1595_v33, %v1929_v41  ;;  %v385_v25 = vmul.f32 %v2235_v31, %v2235_v31 }
 0x1c6   :  { %v487_v43 = vadd.f32 %v486_v39, %v380_v55  ;;  %3458 = vst [vmem:[#allocation62_spill] sm:$0xff] %v2241_v35  ;;  %v3459_v39 = vld [vmem:[#allocation2_spill] sm:$0xff]  ;;  %v386_v33 = vmul.f32 %v2241_v35, %v2241_v35 }
 0x1c7   :  { %v2247_v19 = vsub.f32 %v3459_v39, %v1929_v41  ;;  %v3465_v39 = vld [vmem:[#allocation5_spill] sm:$0xff] }
 0x1c8   :  { %v488_v47 = vadd.f32 %v487_v43, %v381_v59  ;;  %v3461_v43 = vld [vmem:[#allocation3_spill] sm:$0xff]  ;;  %v2265_v31 = vsub.f32 %v3465_v39, %v1929_v41  ;;  %v3471_v39 = vld [vmem:[#allocation8_spill] sm:$0xff] }
 0x1c9   :  { %3460 = vst [vmem:[#allocation2_spill] sm:$0xff] %v2247_v19  ;;  %v2253_v23 = vsub.f32 %v3461_v43, %v1929_v41  ;;  %v3467_v43 = vld [vmem:[#allocation6_spill] sm:$0xff] }
 0x1ca   :  { %v489_v51 = vadd.f32 %v488_v47, %v382_v63  ;;  %v3463_v47 = vld [vmem:[#allocation4_spill] sm:$0xff]  ;;  %3466 = vst [vmem:[#allocation5_spill] sm:$0xff] %v2265_v31  ;;  %v2271_v35 = vsub.f32 %v3467_v43, %v1929_v41  ;;  %v3473_v43 = vld [vmem:[#allocation9_spill] sm:$0xff] }
 0x1cb   :  { %3462 = vst [vmem:[#allocation3_spill] sm:$0xff] %v2253_v23  ;;  %v2259_v27 = vsub.f32 %v3463_v47, %v1929_v41  ;;  %v3469_v47 = vld [vmem:[#allocation7_spill] sm:$0xff] }
 0x1cc   :  { %v490_v55 = vadd.f32 %v489_v51, %v383_v9  ;;  %v387_v9 = vmul.f32 %v2247_v19, %v2247_v19  ;;  %3468 = vst [vmem:[#allocation6_spill] sm:$0xff] %v2271_v35  ;;  %v2277_v19 = vsub.f32 %v3469_v47, %v1929_v41  ;;  %v3475_v47 = vld [vmem:[#allocation10_spill] sm:$0xff] }
 0x1cd   :  { %3464 = vst [vmem:[#allocation4_spill] sm:$0xff] %v2259_v27 }
 0x1ce   :  { %v491_v59 = vadd.f32 %v490_v55, %v384_v17  ;;  %v388_v17 = vmul.f32 %v2253_v23, %v2253_v23  ;;  %3470 = vst [vmem:[#allocation7_spill] sm:$0xff] %v2277_v19  ;;  %v2283_v23 = vsub.f32 %v3471_v39, %v1929_v41  ;;  %v3477_v39 = vld [vmem:[#allocation11_spill] sm:$0xff] }
 0x1d0   :  { %v492_v63 = vadd.f32 %v491_v59, %v385_v25  ;;  %v389_v25 = vmul.f32 %v2259_v27, %v2259_v27  ;;  %3472 = vst [vmem:[#allocation8_spill] sm:$0xff] %v2283_v23  ;;  %v2289_v27 = vsub.f32 %v3473_v43, %v1929_v41  ;;  %v3479_v43 = vld [vmem:[#allocation12_spill] sm:$0xff] }
 0x1d2   :  { %v493_v51 = vadd.f32 %v492_v63, %v386_v33  ;;  %v390_v33 = vmul.f32 %v2265_v31, %v2265_v31  ;;  %3474 = vst [vmem:[#allocation9_spill] sm:$0xff] %v2289_v27  ;;  %v2295_v31 = vsub.f32 %v3475_v47, %v1929_v41  ;;  %v3481_v47 = vld [vmem:[#allocation13_spill] sm:$0xff] }
 0x1d4   :  { %v494_v55 = vadd.f32 %v493_v51, %v387_v9  ;;  %v391_v9 = vmul.f32 %v2271_v35, %v2271_v35  ;;  %3476 = vst [vmem:[#allocation10_spill] sm:$0xff] %v2295_v31  ;;  %v2301_v35 = vsub.f32 %v3477_v39, %v1929_v41  ;;  %v3483_v39 = vld [vmem:[#allocation14_spill] sm:$0xff] }
 0x1d6   :  { %v495_v59 = vadd.f32 %v494_v55, %v388_v17  ;;  %v392_v17 = vmul.f32 %v2277_v19, %v2277_v19  ;;  %3478 = vst [vmem:[#allocation11_spill] sm:$0xff] %v2301_v35  ;;  %v2307_v19 = vsub.f32 %v3479_v43, %v1929_v41  ;;  %v3485_v43 = vld [vmem:[#allocation15_spill] sm:$0xff] }
 0x1d8   :  { %v496_v63 = vadd.f32 %v495_v59, %v389_v25  ;;  %v393_v25 = vmul.f32 %v2283_v23, %v2283_v23  ;;  %3480 = vst [vmem:[#allocation12_spill] sm:$0xff] %v2307_v19  ;;  %v2313_v23 = vsub.f32 %v3481_v47, %v1929_v41  ;;  %v3487_v47 = vld [vmem:[#allocation16_spill] sm:$0xff] }
 0x1da   :  { %v497_v51 = vadd.f32 %v496_v63, %v390_v33  ;;  %v394_v33 = vmul.f32 %v2289_v27, %v2289_v27  ;;  %3482 = vst [vmem:[#allocation13_spill] sm:$0xff] %v2313_v23  ;;  %v2319_v27 = vsub.f32 %v3483_v39, %v1929_v41  ;;  %v3489_v39 = vld [vmem:[#allocation17_spill] sm:$0xff] }
 0x1dc   :  { %v498_v55 = vadd.f32 %v497_v51, %v391_v9  ;;  %v395_v9 = vmul.f32 %v2295_v31, %v2295_v31  ;;  %3484 = vst [vmem:[#allocation14_spill] sm:$0xff] %v2319_v27  ;;  %v2325_v31 = vsub.f32 %v3485_v43, %v1929_v41  ;;  %v3491_v43 = vld [vmem:[#allocation18_spill] sm:$0xff] }
 0x1de   :  { %v499_v59 = vadd.f32 %v498_v55, %v392_v17  ;;  %v396_v17 = vmul.f32 %v2301_v35, %v2301_v35  ;;  %3486 = vst [vmem:[#allocation15_spill] sm:$0xff] %v2325_v31  ;;  %v2331_v35 = vsub.f32 %v3487_v47, %v1929_v41  ;;  %v3493_v47 = vld [vmem:[#allocation19_spill] sm:$0xff] }
 0x1e0   :  { %v500_v63 = vadd.f32 %v499_v59, %v393_v25  ;;  %v397_v25 = vmul.f32 %v2307_v19, %v2307_v19  ;;  %3488 = vst [vmem:[#allocation16_spill] sm:$0xff] %v2331_v35  ;;  %v2337_v19 = vsub.f32 %v3489_v39, %v1929_v41  ;;  %v3495_v39 = vld [vmem:[#allocation20_spill] sm:$0xff] }
 0x1e2   :  { %v501_v51 = vadd.f32 %v500_v63, %v394_v33  ;;  %v398_v33 = vmul.f32 %v2313_v23, %v2313_v23  ;;  %3490 = vst [vmem:[#allocation17_spill] sm:$0xff] %v2337_v19  ;;  %v2343_v23 = vsub.f32 %v3491_v43, %v1929_v41  ;;  %v3497_v43 = vld [vmem:[#allocation21_spill] sm:$0xff] }
 0x1e4   :  { %v502_v55 = vadd.f32 %v501_v51, %v395_v9  ;;  %v399_v9 = vmul.f32 %v2319_v27, %v2319_v27  ;;  %3492 = vst [vmem:[#allocation18_spill] sm:$0xff] %v2343_v23  ;;  %v2349_v27 = vsub.f32 %v3493_v47, %v1929_v41  ;;  %v3499_v47 = vld [vmem:[#allocation22_spill] sm:$0xff] }
 0x1e6   :  { %v503_v59 = vadd.f32 %v502_v55, %v396_v17  ;;  %v400_v17 = vmul.f32 %v2325_v31, %v2325_v31  ;;  %3494 = vst [vmem:[#allocation19_spill] sm:$0xff] %v2349_v27  ;;  %v2355_v31 = vsub.f32 %v3495_v39, %v1929_v41  ;;  %v3501_v39 = vld [vmem:[#allocation23_spill] sm:$0xff] }
 0x1e8   :  { %v504_v63 = vadd.f32 %v503_v59, %v397_v25  ;;  %v401_v25 = vmul.f32 %v2331_v35, %v2331_v35  ;;  %3496 = vst [vmem:[#allocation20_spill] sm:$0xff] %v2355_v31  ;;  %v2361_v35 = vsub.f32 %v3497_v43, %v1929_v41  ;;  %v3503_v43 = vld [vmem:[#allocation24_spill] sm:$0xff] }
 0x1ea   :  { %v505_v51 = vadd.f32 %v504_v63, %v398_v33  ;;  %v402_v33 = vmul.f32 %v2337_v19, %v2337_v19  ;;  %3498 = vst [vmem:[#allocation21_spill] sm:$0xff] %v2361_v35  ;;  %v2367_v19 = vsub.f32 %v3499_v47, %v1929_v41  ;;  %v3505_v47 = vld [vmem:[#allocation25_spill] sm:$0xff] }
 0x1ec   :  { %v506_v55 = vadd.f32 %v505_v51, %v399_v9  ;;  %v403_v9 = vmul.f32 %v2343_v23, %v2343_v23  ;;  %3500 = vst [vmem:[#allocation22_spill] sm:$0xff] %v2367_v19  ;;  %v2373_v23 = vsub.f32 %v3501_v39, %v1929_v41  ;;  %v3507_v39 = vld [vmem:[#allocation26_spill] sm:$0xff] }
 0x1ee   :  { %v507_v59 = vadd.f32 %v506_v55, %v400_v17  ;;  %v404_v17 = vmul.f32 %v2349_v27, %v2349_v27  ;;  %3502 = vst [vmem:[#allocation23_spill] sm:$0xff] %v2373_v23  ;;  %v2379_v27 = vsub.f32 %v3503_v43, %v1929_v41  ;;  %v3509_v43 = vld [vmem:[#allocation27_spill] sm:$0xff] }
 0x1f0   :  { %v508_v63 = vadd.f32 %v507_v59, %v401_v25  ;;  %v405_v25 = vmul.f32 %v2355_v31, %v2355_v31  ;;  %3504 = vst [vmem:[#allocation24_spill] sm:$0xff] %v2379_v27  ;;  %v2385_v31 = vsub.f32 %v3505_v47, %v1929_v41  ;;  %v3511_v47 = vld [vmem:[#allocation28_spill] sm:$0xff] }
 0x1f2   :  { %v509_v51 = vadd.f32 %v508_v63, %v402_v33  ;;  %v406_v33 = vmul.f32 %v2361_v35, %v2361_v35  ;;  %3506 = vst [vmem:[#allocation25_spill] sm:$0xff] %v2385_v31  ;;  %v2391_v35 = vsub.f32 %v3507_v39, %v1929_v41  ;;  %v3513_v39 = vld [vmem:[#allocation29_spill] sm:$0xff] }
 0x1f4   :  { %v510_v55 = vadd.f32 %v509_v51, %v403_v9  ;;  %v407_v9 = vmul.f32 %v2367_v19, %v2367_v19  ;;  %3508 = vst [vmem:[#allocation26_spill] sm:$0xff] %v2391_v35  ;;  %v2397_v19 = vsub.f32 %v3509_v43, %v1929_v41  ;;  %v3515_v43 = vld [vmem:[#allocation30_spill] sm:$0xff] }
 0x1f6   :  { %v511_v59 = vadd.f32 %v510_v55, %v404_v17  ;;  %v408_v17 = vmul.f32 %v2373_v23, %v2373_v23  ;;  %3510 = vst [vmem:[#allocation27_spill] sm:$0xff] %v2397_v19  ;;  %v2403_v23 = vsub.f32 %v3511_v47, %v1929_v41  ;;  %v3517_v47 = vld [vmem:[#allocation31_spill] sm:$0xff] }
 0x1f8   :  { %v512_v63 = vadd.f32 %v511_v59, %v405_v25  ;;  %v409_v25 = vmul.f32 %v2379_v27, %v2379_v27  ;;  %3512 = vst [vmem:[#allocation28_spill] sm:$0xff] %v2403_v23  ;;  %v2409_v27 = vsub.f32 %v3513_v39, %v1929_v41  ;;  %v3519_v39 = vld [vmem:[#allocation32_spill] sm:$0xff] }
 0x1fa   :  { %v513_v51 = vadd.f32 %v512_v63, %v406_v33  ;;  %v410_v33 = vmul.f32 %v2385_v31, %v2385_v31  ;;  %3514 = vst [vmem:[#allocation29_spill] sm:$0xff] %v2409_v27  ;;  %v2415_v31 = vsub.f32 %v3515_v43, %v1929_v41  ;;  %v3521_v43 = vld [vmem:[#allocation33_spill] sm:$0xff] }
 0x1fc   :  { %v514_v55 = vadd.f32 %v513_v51, %v407_v9  ;;  %v411_v9 = vmul.f32 %v2391_v35, %v2391_v35  ;;  %3516 = vst [vmem:[#allocation30_spill] sm:$0xff] %v2415_v31  ;;  %v2421_v35 = vsub.f32 %v3517_v47, %v1929_v41  ;;  %v3523_v47 = vld [vmem:[#allocation34_spill] sm:$0xff] }
 0x1fe   :  { %v515_v59 = vadd.f32 %v514_v55, %v408_v17  ;;  %v412_v17 = vmul.f32 %v2397_v19, %v2397_v19  ;;  %3518 = vst [vmem:[#allocation31_spill] sm:$0xff] %v2421_v35  ;;  %v2427_v19 = vsub.f32 %v3519_v39, %v1929_v41  ;;  %v3525_v39 = vld [vmem:[#allocation35_spill] sm:$0xff] }
 0x200   :  { %v516_v63 = vadd.f32 %v515_v59, %v409_v25  ;;  %v413_v25 = vmul.f32 %v2403_v23, %v2403_v23  ;;  %3520 = vst [vmem:[#allocation32_spill] sm:$0xff] %v2427_v19  ;;  %v2433_v23 = vsub.f32 %v3521_v43, %v1929_v41  ;;  %v3527_v43 = vld [vmem:[#allocation36_spill] sm:$0xff] }
 0x202   :  { %v517_v51 = vadd.f32 %v516_v63, %v410_v33  ;;  %v414_v33 = vmul.f32 %v2409_v27, %v2409_v27  ;;  %3522 = vst [vmem:[#allocation33_spill] sm:$0xff] %v2433_v23  ;;  %v2439_v27 = vsub.f32 %v3523_v47, %v1929_v41  ;;  %v3529_v47 = vld [vmem:[#allocation37_spill] sm:$0xff] }
 0x204   :  { %v518_v55 = vadd.f32 %v517_v51, %v411_v9  ;;  %v415_v9 = vmul.f32 %v2415_v31, %v2415_v31  ;;  %3524 = vst [vmem:[#allocation34_spill] sm:$0xff] %v2439_v27  ;;  %v2445_v31 = vsub.f32 %v3525_v39, %v1929_v41  ;;  %v3531_v39 = vld [vmem:[#allocation38_spill] sm:$0xff] }
 0x206   :  { %v519_v59 = vadd.f32 %v518_v55, %v412_v17  ;;  %v416_v17 = vmul.f32 %v2421_v35, %v2421_v35  ;;  %3526 = vst [vmem:[#allocation35_spill] sm:$0xff] %v2445_v31  ;;  %v2451_v35 = vsub.f32 %v3527_v43, %v1929_v41  ;;  %v3533_v43 = vld [vmem:[#allocation39_spill] sm:$0xff] }
 0x208   :  { %v520_v63 = vadd.f32 %v519_v59, %v413_v25  ;;  %v417_v25 = vmul.f32 %v2427_v19, %v2427_v19  ;;  %3528 = vst [vmem:[#allocation36_spill] sm:$0xff] %v2451_v35  ;;  %v2457_v19 = vsub.f32 %v3529_v47, %v1929_v41  ;;  %v3535_v47 = vld [vmem:[#allocation40_spill] sm:$0xff] }
 0x20a   :  { %v521_v51 = vadd.f32 %v520_v63, %v414_v33  ;;  %v418_v33 = vmul.f32 %v2433_v23, %v2433_v23  ;;  %3530 = vst [vmem:[#allocation37_spill] sm:$0xff] %v2457_v19  ;;  %v2463_v23 = vsub.f32 %v3531_v39, %v1929_v41  ;;  %v3537_v39 = vld [vmem:[#allocation41_spill] sm:$0xff] }
 0x20c   :  { %v522_v55 = vadd.f32 %v521_v51, %v415_v9  ;;  %v419_v9 = vmul.f32 %v2439_v27, %v2439_v27  ;;  %3532 = vst [vmem:[#allocation38_spill] sm:$0xff] %v2463_v23  ;;  %v2469_v27 = vsub.f32 %v3533_v43, %v1929_v41  ;;  %v3539_v43 = vld [vmem:[#allocation42_spill] sm:$0xff] }
 0x20e   :  { %v523_v59 = vadd.f32 %v522_v55, %v416_v17  ;;  %v420_v17 = vmul.f32 %v2445_v31, %v2445_v31  ;;  %3534 = vst [vmem:[#allocation39_spill] sm:$0xff] %v2469_v27  ;;  %v2475_v31 = vsub.f32 %v3535_v47, %v1929_v41  ;;  %v3541_v47 = vld [vmem:[#allocation43_spill] sm:$0xff] }
 0x210   :  { %v524_v63 = vadd.f32 %v523_v59, %v417_v25  ;;  %v421_v25 = vmul.f32 %v2451_v35, %v2451_v35  ;;  %3536 = vst [vmem:[#allocation40_spill] sm:$0xff] %v2475_v31  ;;  %v2481_v35 = vsub.f32 %v3537_v39, %v1929_v41  ;;  %v3543_v39 = vld [vmem:[#allocation44_spill] sm:$0xff] }
 0x212   :  { %v525_v51 = vadd.f32 %v524_v63, %v418_v33  ;;  %v422_v33 = vmul.f32 %v2457_v19, %v2457_v19  ;;  %3538 = vst [vmem:[#allocation41_spill] sm:$0xff] %v2481_v35  ;;  %v2487_v19 = vsub.f32 %v3539_v43, %v1929_v41  ;;  %v3545_v43 = vld [vmem:[#allocation45_spill] sm:$0xff] }
 0x214   :  { %v526_v55 = vadd.f32 %v525_v51, %v419_v9  ;;  %v423_v9 = vmul.f32 %v2463_v23, %v2463_v23  ;;  %3540 = vst [vmem:[#allocation42_spill] sm:$0xff] %v2487_v19  ;;  %v2493_v23 = vsub.f32 %v3541_v47, %v1929_v41  ;;  %v3547_v47 = vld [vmem:[#allocation46_spill] sm:$0xff] }
 0x216   :  { %v527_v59 = vadd.f32 %v526_v55, %v420_v17  ;;  %v424_v17 = vmul.f32 %v2469_v27, %v2469_v27  ;;  %3542 = vst [vmem:[#allocation43_spill] sm:$0xff] %v2493_v23  ;;  %v2499_v27 = vsub.f32 %v3543_v39, %v1929_v41  ;;  %v3549_v39 = vld [vmem:[#allocation47_spill] sm:$0xff] }
 0x218   :  { %v528_v63 = vadd.f32 %v527_v59, %v421_v25  ;;  %v425_v25 = vmul.f32 %v2475_v31, %v2475_v31  ;;  %3544 = vst [vmem:[#allocation44_spill] sm:$0xff] %v2499_v27  ;;  %v2505_v31 = vsub.f32 %v3545_v43, %v1929_v41  ;;  %v3551_v43 = vld [vmem:[#allocation48_spill] sm:$0xff] }
 0x21a   :  { %v529_v51 = vadd.f32 %v528_v63, %v422_v33  ;;  %v426_v33 = vmul.f32 %v2481_v35, %v2481_v35  ;;  %3546 = vst [vmem:[#allocation45_spill] sm:$0xff] %v2505_v31  ;;  %v2511_v35 = vsub.f32 %v3547_v47, %v1929_v41  ;;  %v3552_v47 = vld [vmem:[#allocation49_spill] sm:$0xff] }
 0x21c   :  { %v530_v55 = vadd.f32 %v529_v51, %v423_v9  ;;  %v427_v9 = vmul.f32 %v2487_v19, %v2487_v19  ;;  %3548 = vst [vmem:[#allocation46_spill] sm:$0xff] %v2511_v35  ;;  %v2517_v19 = vsub.f32 %v3549_v39, %v1929_v41  ;;  %v3554_v39 = vld [vmem:[#allocation50_spill] sm:$0xff] }
 0x21e   :  { %v531_v59 = vadd.f32 %v530_v55, %v424_v17  ;;  %v428_v17 = vmul.f32 %v2493_v23, %v2493_v23  ;;  %3550 = vst [vmem:[#allocation47_spill] sm:$0xff] %v2517_v19  ;;  %v2523_v23 = vsub.f32 %v3551_v43, %v1929_v41  ;;  %v3556_v43 = vld [vmem:[#allocation51_spill] sm:$0xff] }
 0x220   :  { %v532_v63 = vadd.f32 %v531_v59, %v425_v25  ;;  %v429_v25 = vmul.f32 %v2499_v27, %v2499_v27  ;;  %v2529_v27 = vsub.f32 %v3552_v47, %v1929_v41  ;;  %v3558_v47 = vld [vmem:[#allocation52_spill] sm:$0xff] }
 0x222   :  { %v533_v51 = vadd.f32 %v532_v63, %v426_v33  ;;  %v430_v33 = vmul.f32 %v2505_v31, %v2505_v31  ;;  %3553 = vst [vmem:[#allocation48_spill] sm:$0xff] %v2529_v27  ;;  %v2535_v31 = vsub.f32 %v3554_v39, %v1929_v41  ;;  %v2553_v39 = vsub.f32 %v1907_v53, %v1929_v41 }
 0x224   :  { %v534_v55 = vadd.f32 %v533_v51, %v427_v9  ;;  %v431_v9 = vmul.f32 %v2511_v35, %v2511_v35  ;;  %3555 = vst [vmem:[#allocation49_spill] sm:$0xff] %v2535_v31  ;;  %v2541_v35 = vsub.f32 %v3556_v43, %v1929_v41  ;;  %3560 = vst [vmem:[#allocation52_spill] sm:$0xff] %v2553_v39  ;;  %v3561_v43 = vld [vmem:[#allocation53_spill] sm:$0xff] }
 0x225   :  { %v438_v53 = vmul.f32 %v2553_v39, %v2553_v39 }
 0x226   :  { %v535_v59 = vadd.f32 %v534_v55, %v428_v17  ;;  %v432_v17 = vmul.f32 %v2517_v19, %v2517_v19  ;;  %3557 = vst [vmem:[#allocation50_spill] sm:$0xff] %v2541_v35  ;;  %v2547_v19 = vsub.f32 %v3558_v47, %v1929_v41  ;;  %v2565_v47 = vsub.f32 %v1919_v5, %v1929_v41 }
 0x228   :  { %v536_v63 = vadd.f32 %v535_v59, %v429_v25  ;;  %v433_v25 = vmul.f32 %v2523_v23, %v2523_v23  ;;  %3559 = vst [vmem:[#allocation51_spill] sm:$0xff] %v2547_v19  ;;  %3562 = vst [vmem:[#allocation53_spill] sm:$0xff] %v2565_v47 }
 0x22a   :  { %v537_v51 = vadd.f32 %v536_v63, %v430_v33  ;;  %v434_v33 = vmul.f32 %v2529_v27, %v2529_v27  ;;  %v2559_v27 = vsub.f32 %v3561_v43, %v1929_v41  ;;  %v440_v43 = vmul.f32 %v2565_v47, %v2565_v47 }
 0x22c   :  { %v538_v55 = vadd.f32 %v537_v51, %v431_v9  ;;  %v435_v9 = vmul.f32 %v2535_v31, %v2535_v31 }
 0x22e   :  { %v539_v59 = vadd.f32 %v538_v55, %v432_v17  ;;  %v436_v17 = vmul.f32 %v2541_v35, %v2541_v35 }
 0x230   :  { %v540_v63 = vadd.f32 %v539_v59, %v433_v25  ;;  %v437_v25 = vmul.f32 %v2547_v19, %v2547_v19 }
 0x232   :  { %v541_v51 = vadd.f32 %v540_v63, %v434_v33  ;;  %v3563_v63 = vld [vmem:[#allocation54_spill] sm:$0xff] }
 0x233   :  { %v2571_v35 = vsub.f32 %v3563_v63, %v1929_v41 }
 0x234   :  { %v542_v55 = vadd.f32 %v541_v51, %v435_v9  ;;  %v439_v9 = vmul.f32 %v2559_v27, %v2559_v27 }
 0x235   :  { %v441_v5 = vmul.f32 %v2571_v35, %v2571_v35 }
 0x236   :  { %v543_v59 = vadd.f32 %v542_v55, %v436_v17 }
 0x238   :  { %v544_v33 = vadd.f32 %v543_v59, %v437_v25 }
 0x23a   :  { %v545_v51 = vadd.f32 %v544_v33, %v438_v53 }
 0x23c   :  { %v546_v17 = vadd.f32 %v545_v51, %v439_v9  ;;  %v3564_v9 = vld [vmem:[#allocation55_spill] sm:$0xff] }
 0x23e   :  { %v547_v55 = vadd.f32 %v546_v17, %v440_v43  ;;  %v3565_v43 = vld [vmem:[#allocation56_spill] sm:$0xff] }
 0x240   :  { %v548_v19 = vadd.f32 %v547_v55, %v441_v5 }
 0x242   :  { %549 = vadd.xlane.f32.xlu0 %v548_v19 }
 0x2cf   :  { %v550_v39 = vpop.xlane.xlu0 %549 }
 0x2d0   :  { %v551_v25 = vmul.f32 7.2343195e-05, %v550_v39  ;;  %v3566_v39 = vld [vmem:[#allocation57_spill] sm:$0xff] }
 0x2d2   :  { %1267 = vrsqrt.f32 %v551_v25  ;;  %vm554_vm0 = vcmp.eq.f32.partialorder %v551_v25, inf  ;;  %v557_v63 = vand.u32 2147483648, %v551_v25  ;;  %vm556_vm1 = vcmp.eq.f32.partialorder %v551_v25, 0.0 }
 0x2dc   :  { %v1268_v59 = vpop.eup %1267 }
 0x2dd   :  { %v553_v41 = vmul.f32 %v1268_v59, %v551_v25 }
 0x2df   :  { %v555_v31 = vsel %vm554_vm0, %v551_v25, %v553_v41  ;;  %v3567_v41 = vld [vmem:[#allocation58_spill] sm:$0xff] }
 0x2e0   :  { %v558_v53 = vsel %vm556_vm1, %v557_v63, %v555_v31  ;;  %v3568_v63 = vld [vmem:[#allocation59_spill] sm:$0xff] }
 0x2e1   :  { %v559_v33 = vadd.f32 1e-05, %v558_v53  ;;  %v3570_v53 = vld [vmem:[#allocation60_spill] sm:$0xff] }
 0x2e3   :  { %1269 = vrcp.f32 %v559_v33  ;;  %v3572_v33 = vld [vmem:[#allocation61_spill] sm:$0xff] }
 0x2ed   :  { %v2579_v47 = vpop.eup %1269 }
 0x2ee   :  { %v2583_v51 = vmul.f32 %v2579_v47, %v3564_v9  ;;  %v2587_v19 = vmul.f32 %v2579_v47, %v3565_v43  ;;  %v2591_v17 = vmul.f32 %v2579_v47, %v3566_v39  ;;  %v2595_v5 = vmul.f32 %v2579_v47, %v1949_v49  ;;  %v3574_v9 = vld [vmem:[#allocation62_spill] sm:$0xff] }
 0x2ef   :  { %v2599_v31 = vmul.f32 %v2579_v47, %v1953_v0  ;;  %v2603_v55 = vmul.f32 %v2579_v47, %v1959_v2  ;;  %v2607_v25 = vmul.f32 %v2579_v47, %v1965_v4  ;;  %v2611_v59 = vmul.f32 %v2579_v47, %v1971_v57  ;;  %v3576_v43 = vld [vmem:[#allocation2_spill] sm:$0xff] }
 0x2f0   :  { %v2615_v49 = vmul.f32 %v2579_v47, %v1977_v37  ;;  %v2619_v0 = vmul.f32 %v2579_v47, %v1983_v61  ;;  %v2623_v2 = vmul.f32 %v2579_v47, %v1989_v29  ;;  %v2627_v4 = vmul.f32 %v2579_v47, %v1995_v6 }
 0x2f1   :  { %v2631_v57 = vmul.f32 %v2579_v47, %v2001_v45  ;;  %v2635_v37 = vmul.f32 %v2579_v47, %v2007_v1  ;;  %v2639_v61 = vmul.f32 %v2579_v47, %v2013_v13  ;;  %v2643_v29 = vmul.f32 %v2579_v47, %v2019_v21 }
 0x2f2   :  { %v2647_v6 = vmul.f32 %v2579_v47, %v2025_v8  ;;  %v2651_v45 = vmul.f32 %v2579_v47, %v2031_v10  ;;  %v2655_v1 = vmul.f32 %v2579_v47, %v2037_v12  ;;  %v2659_v13 = vmul.f32 %v2579_v47, %v2043_v14 }
 0x2f3   :  { %v2663_v21 = vmul.f32 %v2579_v47, %v2049_v16  ;;  %v2667_v8 = vmul.f32 %v2579_v47, %v2055_v18  ;;  %v2671_v10 = vmul.f32 %v2579_v47, %v2061_v20  ;;  %v2675_v12 = vmul.f32 %v2579_v47, %v2067_v22 }
 0x2f4   :  { %v2679_v14 = vmul.f32 %v2579_v47, %v2073_v24  ;;  %v2683_v16 = vmul.f32 %v2579_v47, %v2079_v26  ;;  %v2687_v18 = vmul.f32 %v2579_v47, %v2085_v28  ;;  %v2691_v20 = vmul.f32 %v2579_v47, %v2091_v30 }
 0x2f5   :  { %v2695_v22 = vmul.f32 %v2579_v47, %v2097_v32  ;;  %v2699_v24 = vmul.f32 %v2579_v47, %v2103_v34  ;;  %v2703_v26 = vmul.f32 %v2579_v47, %v2109_v36  ;;  %v2707_v28 = vmul.f32 %v2579_v47, %v2115_v38 }
 0x2f6   :  { %v2711_v30 = vmul.f32 %v2579_v47, %v2121_v40  ;;  %v2715_v32 = vmul.f32 %v2579_v47, %v2127_v42  ;;  %v2719_v34 = vmul.f32 %v2579_v47, %v2133_v44  ;;  %v2723_v36 = vmul.f32 %v2579_v47, %v2139_v46 }
 0x2f7   :  { %v2727_v38 = vmul.f32 %v2579_v47, %v2145_v48  ;;  %v2731_v40 = vmul.f32 %v2579_v47, %v2151_v50  ;;  %v2735_v42 = vmul.f32 %v2579_v47, %v2157_v52  ;;  %v2739_v44 = vmul.f32 %v2579_v47, %v2163_v54 }
 0x2f8   :  { %v2743_v46 = vmul.f32 %v2579_v47, %v2169_v56  ;;  %v2747_v48 = vmul.f32 %v2579_v47, %v2175_v58  ;;  %v2751_v50 = vmul.f32 %v2579_v47, %v2181_v60  ;;  %v2755_v52 = vmul.f32 %v2579_v47, %v2187_v62 }
 0x2f9   :  { %v2759_v54 = vmul.f32 %v2579_v47, %v2193_v3  ;;  %v2763_v56 = vmul.f32 %v2579_v47, %v2199_v7  ;;  %v2767_v58 = vmul.f32 %v2579_v47, %v2205_v11  ;;  %v2771_v60 = vmul.f32 %v2579_v47, %v2211_v15 }
 0x2fa   :  { %v2775_v62 = vmul.f32 %v2579_v47, %v3567_v41  ;;  %v2779_v3 = vmul.f32 %v2579_v47, %v3568_v63  ;;  %v2783_v7 = vmul.f32 %v2579_v47, %v3570_v53  ;;  %v2787_v11 = vmul.f32 %v2579_v47, %v3572_v33  ;;  %v3578_v41 = vld [vmem:[#allocation3_spill] sm:$0xff] }
 0x2fb   :  { %v2791_v15 = vmul.f32 %v2579_v47, %v3574_v9  ;;  %v2795_v39 = vmul.f32 %v2579_v47, %v3576_v43  ;;  %v2799_v63 = vmul.f32 %v2579_v47, %v3578_v41 }
 0x2fc   :  { %3569 = vst [vmem:[#allocation54_spill] sm:$0xff] %v2779_v3  ;;  %3571 = vst [vmem:[#allocation55_spill] sm:$0xff] %v2783_v7  ;;  %v3580_v3 = vld [vmem:[#allocation4_spill] sm:$0xff]  ;;  %v3582_v7 = vld [vmem:[#allocation5_spill] sm:$0xff] }
 0x2fd   :  { %3573 = vst [vmem:[#allocation56_spill] sm:$0xff] %v2787_v11  ;;  %3575 = vst [vmem:[#allocation57_spill] sm:$0xff] %v2791_v15  ;;  %v2803_v53 = vmul.f32 %v2579_v47, %v3580_v3  ;;  %v2807_v33 = vmul.f32 %v2579_v47, %v3582_v7  ;;  %v3584_v11 = vld [vmem:[#allocation6_spill] sm:$0xff]  ;;  %v3586_v15 = vld [vmem:[#allocation7_spill] sm:$0xff] }
 0x2fe   :  { %3577 = vst [vmem:[#allocation58_spill] sm:$0xff] %v2795_v39  ;;  %3579 = vst [vmem:[#allocation59_spill] sm:$0xff] %v2799_v63  ;;  %v2811_v9 = vmul.f32 %v2579_v47, %v3584_v11  ;;  %v2815_v43 = vmul.f32 %v2579_v47, %v3586_v15  ;;  %v3588_v39 = vld [vmem:[#allocation8_spill] sm:$0xff]  ;;  %v3590_v63 = vld [vmem:[#allocation9_spill] sm:$0xff] }
 0x2ff   :  { %3581 = vst [vmem:[#allocation60_spill] sm:$0xff] %v2803_v53  ;;  %3583 = vst [vmem:[#allocation61_spill] sm:$0xff] %v2807_v33  ;;  %v2819_v41 = vmul.f32 %v2579_v47, %v3588_v39  ;;  %v2823_v3 = vmul.f32 %v2579_v47, %v3590_v63  ;;  %v3592_v53 = vld [vmem:[#allocation10_spill] sm:$0xff]  ;;  %v3594_v33 = vld [vmem:[#allocation11_spill] sm:$0xff] }
 0x300   :  { %3585 = vst [vmem:[#allocation62_spill] sm:$0xff] %v2811_v9  ;;  %3587 = vst [vmem:[#allocation2_spill] sm:$0xff] %v2815_v43  ;;  %v2827_v7 = vmul.f32 %v2579_v47, %v3592_v53  ;;  %v2831_v11 = vmul.f32 %v2579_v47, %v3594_v33  ;;  %v3596_v9 = vld [vmem:[#allocation12_spill] sm:$0xff]  ;;  %v3598_v43 = vld [vmem:[#allocation13_spill] sm:$0xff] }
 0x301   :  { %3589 = vst [vmem:[#allocation3_spill] sm:$0xff] %v2819_v41  ;;  %3591 = vst [vmem:[#allocation4_spill] sm:$0xff] %v2823_v3  ;;  %v2835_v15 = vmul.f32 %v2579_v47, %v3596_v9  ;;  %v2839_v39 = vmul.f32 %v2579_v47, %v3598_v43  ;;  %v3600_v41 = vld [vmem:[#allocation14_spill] sm:$0xff]  ;;  %v3602_v3 = vld [vmem:[#allocation15_spill] sm:$0xff] }
 0x302   :  { %3593 = vst [vmem:[#allocation5_spill] sm:$0xff] %v2827_v7  ;;  %3595 = vst [vmem:[#allocation6_spill] sm:$0xff] %v2831_v11  ;;  %v2843_v63 = vmul.f32 %v2579_v47, %v3600_v41  ;;  %v2847_v53 = vmul.f32 %v2579_v47, %v3602_v3  ;;  %v3604_v7 = vld [vmem:[#allocation16_spill] sm:$0xff]  ;;  %v3606_v11 = vld [vmem:[#allocation17_spill] sm:$0xff] }
 0x303   :  { %3597 = vst [vmem:[#allocation7_spill] sm:$0xff] %v2835_v15  ;;  %3599 = vst [vmem:[#allocation8_spill] sm:$0xff] %v2839_v39  ;;  %v2851_v33 = vmul.f32 %v2579_v47, %v3604_v7  ;;  %v2855_v9 = vmul.f32 %v2579_v47, %v3606_v11  ;;  %v3608_v15 = vld [vmem:[#allocation18_spill] sm:$0xff]  ;;  %v3610_v39 = vld [vmem:[#allocation19_spill] sm:$0xff] }
 0x304   :  { %3601 = vst [vmem:[#allocation9_spill] sm:$0xff] %v2843_v63  ;;  %3603 = vst [vmem:[#allocation10_spill] sm:$0xff] %v2847_v53  ;;  %v2859_v43 = vmul.f32 %v2579_v47, %v3608_v15  ;;  %v2863_v41 = vmul.f32 %v2579_v47, %v3610_v39  ;;  %v3612_v63 = vld [vmem:[#allocation20_spill] sm:$0xff]  ;;  %v3614_v53 = vld [vmem:[#allocation21_spill] sm:$0xff] }
 0x305   :  { %3605 = vst [vmem:[#allocation11_spill] sm:$0xff] %v2851_v33  ;;  %3607 = vst [vmem:[#allocation12_spill] sm:$0xff] %v2855_v9  ;;  %v2867_v3 = vmul.f32 %v2579_v47, %v3612_v63  ;;  %v2871_v7 = vmul.f32 %v2579_v47, %v3614_v53  ;;  %v3616_v33 = vld [vmem:[#allocation22_spill] sm:$0xff]  ;;  %v3618_v9 = vld [vmem:[#allocation23_spill] sm:$0xff] }
 0x306   :  { %3609 = vst [vmem:[#allocation13_spill] sm:$0xff] %v2859_v43  ;;  %3611 = vst [vmem:[#allocation14_spill] sm:$0xff] %v2863_v41  ;;  %v2875_v11 = vmul.f32 %v2579_v47, %v3616_v33  ;;  %v2879_v15 = vmul.f32 %v2579_v47, %v3618_v9  ;;  %v3620_v43 = vld [vmem:[#allocation24_spill] sm:$0xff]  ;;  %v3622_v41 = vld [vmem:[#allocation25_spill] sm:$0xff] }
 0x307   :  { %3613 = vst [vmem:[#allocation15_spill] sm:$0xff] %v2867_v3  ;;  %3615 = vst [vmem:[#allocation16_spill] sm:$0xff] %v2871_v7  ;;  %v2883_v39 = vmul.f32 %v2579_v47, %v3620_v43  ;;  %v2887_v63 = vmul.f32 %v2579_v47, %v3622_v41  ;;  %v3624_v3 = vld [vmem:[#allocation26_spill] sm:$0xff]  ;;  %v3626_v7 = vld [vmem:[#allocation27_spill] sm:$0xff] }
 0x308   :  { %3617 = vst [vmem:[#allocation17_spill] sm:$0xff] %v2875_v11  ;;  %3619 = vst [vmem:[#allocation18_spill] sm:$0xff] %v2879_v15  ;;  %v2891_v53 = vmul.f32 %v2579_v47, %v3624_v3  ;;  %v2895_v33 = vmul.f32 %v2579_v47, %v3626_v7  ;;  %v3628_v11 = vld [vmem:[#allocation28_spill] sm:$0xff]  ;;  %v3630_v15 = vld [vmem:[#allocation29_spill] sm:$0xff] }
 0x309   :  { %3621 = vst [vmem:[#allocation19_spill] sm:$0xff] %v2883_v39  ;;  %3623 = vst [vmem:[#allocation20_spill] sm:$0xff] %v2887_v63  ;;  %v2899_v9 = vmul.f32 %v2579_v47, %v3628_v11  ;;  %v2903_v43 = vmul.f32 %v2579_v47, %v3630_v15  ;;  %v3632_v39 = vld [vmem:[#allocation30_spill] sm:$0xff]  ;;  %v3634_v63 = vld [vmem:[#allocation31_spill] sm:$0xff] }
 0x30a   :  { %3625 = vst [vmem:[#allocation21_spill] sm:$0xff] %v2891_v53  ;;  %3627 = vst [vmem:[#allocation22_spill] sm:$0xff] %v2895_v33  ;;  %v2907_v41 = vmul.f32 %v2579_v47, %v3632_v39  ;;  %v2911_v3 = vmul.f32 %v2579_v47, %v3634_v63  ;;  %v3636_v53 = vld [vmem:[#allocation32_spill] sm:$0xff]  ;;  %v3638_v33 = vld [vmem:[#allocation33_spill] sm:$0xff] }
 0x30b   :  { %3629 = vst [vmem:[#allocation23_spill] sm:$0xff] %v2899_v9  ;;  %3631 = vst [vmem:[#allocation24_spill] sm:$0xff] %v2903_v43  ;;  %v2915_v7 = vmul.f32 %v2579_v47, %v3636_v53  ;;  %v2919_v11 = vmul.f32 %v2579_v47, %v3638_v33  ;;  %v3640_v9 = vld [vmem:[#allocation34_spill] sm:$0xff]  ;;  %v3642_v43 = vld [vmem:[#allocation35_spill] sm:$0xff] }
 0x30c   :  { %3633 = vst [vmem:[#allocation25_spill] sm:$0xff] %v2907_v41  ;;  %3635 = vst [vmem:[#allocation26_spill] sm:$0xff] %v2911_v3  ;;  %v2923_v15 = vmul.f32 %v2579_v47, %v3640_v9  ;;  %v2927_v39 = vmul.f32 %v2579_v47, %v3642_v43  ;;  %v3644_v41 = vld [vmem:[#allocation36_spill] sm:$0xff]  ;;  %v3646_v3 = vld [vmem:[#allocation37_spill] sm:$0xff] }
 0x30d   :  { %3637 = vst [vmem:[#allocation27_spill] sm:$0xff] %v2915_v7  ;;  %3639 = vst [vmem:[#allocation28_spill] sm:$0xff] %v2919_v11  ;;  %v2931_v63 = vmul.f32 %v2579_v47, %v3644_v41  ;;  %v2935_v53 = vmul.f32 %v2579_v47, %v3646_v3  ;;  %v3648_v7 = vld [vmem:[#allocation38_spill] sm:$0xff]  ;;  %v3650_v11 = vld [vmem:[#allocation39_spill] sm:$0xff] }
 0x30e   :  { %3641 = vst [vmem:[#allocation29_spill] sm:$0xff] %v2923_v15  ;;  %3643 = vst [vmem:[#allocation30_spill] sm:$0xff] %v2927_v39  ;;  %v2939_v33 = vmul.f32 %v2579_v47, %v3648_v7  ;;  %v2943_v9 = vmul.f32 %v2579_v47, %v3650_v11  ;;  %v3652_v15 = vld [vmem:[#allocation40_spill] sm:$0xff]  ;;  %v3654_v39 = vld [vmem:[#allocation41_spill] sm:$0xff] }
 0x30f   :  { %3645 = vst [vmem:[#allocation31_spill] sm:$0xff] %v2931_v63  ;;  %3647 = vst [vmem:[#allocation32_spill] sm:$0xff] %v2935_v53  ;;  %v2947_v43 = vmul.f32 %v2579_v47, %v3652_v15  ;;  %v2951_v41 = vmul.f32 %v2579_v47, %v3654_v39  ;;  %v3656_v63 = vld [vmem:[#allocation42_spill] sm:$0xff]  ;;  %v3657_v53 = vld [vmem:[#allocation43_spill] sm:$0xff] }
 0x310   :  { %3649 = vst [vmem:[#allocation33_spill] sm:$0xff] %v2939_v33  ;;  %3651 = vst [vmem:[#allocation34_spill] sm:$0xff] %v2943_v9  ;;  %v2955_v3 = vmul.f32 %v2579_v47, %v3656_v63  ;;  %v2959_v7 = vmul.f32 %v2579_v47, %v3657_v53  ;;  %v3659_v33 = vld [vmem:[#allocation44_spill] sm:$0xff]  ;;  %v3661_v9 = vld [vmem:[#allocation45_spill] sm:$0xff]  ;;  %v2979_v53 = vmul.f32 %v2579_v47, %v2523_v23 }
 0x311   :  { %3653 = vst [vmem:[#allocation35_spill] sm:$0xff] %v2947_v43  ;;  %3655 = vst [vmem:[#allocation36_spill] sm:$0xff] %v2951_v41  ;;  %v2963_v11 = vmul.f32 %v2579_v47, %v3659_v33  ;;  %v2967_v15 = vmul.f32 %v2579_v47, %v3661_v9  ;;  %v3663_v43 = vld [vmem:[#allocation46_spill] sm:$0xff]  ;;  %v3665_v41 = vld [vmem:[#allocation47_spill] sm:$0xff] }
 0x312   :  { %3658 = vst [vmem:[#allocation37_spill] sm:$0xff] %v2959_v7  ;;  %v2971_v39 = vmul.f32 %v2579_v47, %v3663_v43  ;;  %v2975_v63 = vmul.f32 %v2579_v47, %v3665_v41  ;;  %v3667_v7 = vld [vmem:[#allocation48_spill] sm:$0xff] }
 0x313   :  { %3660 = vst [vmem:[#allocation38_spill] sm:$0xff] %v2963_v11  ;;  %3662 = vst [vmem:[#allocation39_spill] sm:$0xff] %v2967_v15  ;;  %v2983_v33 = vmul.f32 %v2579_v47, %v3667_v7  ;;  %v3669_v11 = vld [vmem:[#allocation49_spill] sm:$0xff]  ;;  %v3670_v15 = vld [vmem:[#allocation50_spill] sm:$0xff]  ;;  %v3003_v7 = vmul.f32 %v2579_v47, %v2559_v27  ;;  %v1216_v27 = vpack.c.bf16 %v2611_v59, %v2607_v25 }
 0x314   :  { %3664 = vst [vmem:[#allocation40_spill] sm:$0xff] %v2971_v39  ;;  %3666 = vst [vmem:[#allocation41_spill] sm:$0xff] %v2975_v63  ;;  %v2987_v9 = vmul.f32 %v2579_v47, %v3669_v11  ;;  %v2991_v43 = vmul.f32 %v2579_v47, %v3670_v15  ;;  %v3671_v39 = vld [vmem:[#allocation51_spill] sm:$0xff]  ;;  %v3673_v63 = vld [vmem:[#allocation52_spill] sm:$0xff]  ;;  %v3011_v15 = vmul.f32 %v2579_v47, %v2571_v35 }
 0x315   :  { %3668 = vst [vmem:[#allocation42_spill] sm:$0xff] %v2983_v33  ;;  %v2995_v41 = vmul.f32 %v2579_v47, %v3671_v39  ;;  %v2999_v23 = vmul.f32 %v2579_v47, %v3673_v63  ;;  %v3674_v33 = vld [vmem:[#allocation53_spill] sm:$0xff]  ;;  %v1213_v39 = vpack.c.bf16 %v2587_v19, %v2583_v51  ;;  %v1215_v63 = vpack.c.bf16 %v2603_v55, %v2599_v31 }
 0x316   :  { %v3007_v11 = vmul.f32 %v2579_v47, %v3674_v33  ;;  %v1217_v33 = vpack.c.bf16 %v2619_v0, %v2615_v49  ;;  %v1219_v35 = vpack.c.bf16 %v2635_v37, %v2631_v57  ;;  %v1220_v47 = vpack.c.bf16 %v2643_v29, %v2639_v61  ;;  %1104 = vst [vmem:[%s3284_s1 + $0x18] sm:$0xff] %v1216_v27 }
 0x317   :  { %3672 = vst [vmem:[#allocation43_spill] sm:$0xff] %v2995_v41  ;;  %v1214_v41 = vpack.c.bf16 %v2595_v5, %v2591_v17  ;;  %v1221_v51 = vpack.c.bf16 %v2651_v45, %v2647_v6  ;;  %v1222_v19 = vpack.c.bf16 %v2659_v13, %v2655_v1  ;;  %v1223_v17 = vpack.c.bf16 %v2667_v8, %v2663_v21  ;;  %v3676_v6 = vld [vmem:[#allocation54_spill] sm:$0xff]  ;;  %v3677_v1 = vld [vmem:[#allocation55_spill] sm:$0xff]  ;;  %v3678_v13 = vld [vmem:[#allocation56_spill] sm:$0xff] }
 0x318   :  { %3675 = vst [vmem:[#allocation44_spill] sm:$0xff] %v3007_v11  ;;  %v1218_v11 = vpack.c.bf16 %v2627_v4, %v2623_v2  ;;  %v1224_v5 = vpack.c.bf16 %v2675_v12, %v2671_v10  ;;  %1101 = vst [vmem:[%s3284_s1] sm:$0xff] %v1213_v39  ;;  %v1225_v31 = vpack.c.bf16 %v2683_v16, %v2679_v14  ;;  %v3679_v8 = vld [vmem:[#allocation57_spill] sm:$0xff]  ;;  %v3680_v10 = vld [vmem:[#allocation58_spill] sm:$0xff] }
 0x319   :  { %1102 = vst [vmem:[%s3284_s1 + $0x8] sm:$0xff] %v1214_v41  ;;  %1103 = vst [vmem:[%s3284_s1 + $0x10] sm:$0xff] %v1215_v63  ;;  %v1226_v55 = vpack.c.bf16 %v2691_v20, %v2687_v18  ;;  %v1227_v25 = vpack.c.bf16 %v2699_v24, %v2695_v22  ;;  %v1228_v59 = vpack.c.bf16 %v2707_v28, %v2703_v26  ;;  %v3681_v14 = vld [vmem:[#allocation59_spill] sm:$0xff]  ;;  %v3682_v16 = vld [vmem:[#allocation60_spill] sm:$0xff] }
 0x31a   :  { %1105 = vst [vmem:[%s3284_s1 + $0x20] sm:$0xff] %v1217_v33  ;;  %1106 = vst [vmem:[%s3284_s1 + $0x28] sm:$0xff] %v1218_v11  ;;  %v1229_v49 = vpack.c.bf16 %v2715_v32, %v2711_v30  ;;  %v1230_v0 = vpack.c.bf16 %v2723_v36, %v2719_v34  ;;  %v1231_v2 = vpack.c.bf16 %v2731_v40, %v2727_v38  ;;  %v3683_v20 = vld [vmem:[#allocation61_spill] sm:$0xff]  ;;  %v3684_v22 = vld [vmem:[#allocation62_spill] sm:$0xff] }
 0x31b   :  { %1107 = vst [vmem:[%s3284_s1 + $0x30] sm:$0xff] %v1219_v35  ;;  %1108 = vst [vmem:[%s3284_s1 + $0x38] sm:$0xff] %v1220_v47  ;;  %v1232_v4 = vpack.c.bf16 %v2739_v44, %v2735_v42  ;;  %v1233_v57 = vpack.c.bf16 %v2747_v48, %v2743_v46  ;;  %v1234_v37 = vpack.c.bf16 %v2755_v52, %v2751_v50  ;;  %v3685_v26 = vld [vmem:[#allocation2_spill] sm:$0xff]  ;;  %v3686_v28 = vld [vmem:[#allocation3_spill] sm:$0xff] }
 0x31c   :  { %1109 = vst [vmem:[%s3284_s1 + $0x40] sm:$0xff] %v1221_v51  ;;  %1110 = vst [vmem:[%s3284_s1 + $0x48] sm:$0xff] %v1222_v19  ;;  %v1235_v61 = vpack.c.bf16 %v2763_v56, %v2759_v54  ;;  %v1236_v29 = vpack.c.bf16 %v2771_v60, %v2767_v58  ;;  %v1237_v45 = vpack.c.bf16 %v3676_v6, %v2775_v62  ;;  %v3687_v32 = vld [vmem:[#allocation4_spill] sm:$0xff]  ;;  %v3688_v34 = vld [vmem:[#allocation5_spill] sm:$0xff] }
 0x31d   :  { %1111 = vst [vmem:[%s3284_s1 + $0x50] sm:$0xff] %v1223_v17  ;;  %1112 = vst [vmem:[%s3284_s1 + $0x58] sm:$0xff] %v1224_v5  ;;  %v1238_v21 = vpack.c.bf16 %v3678_v13, %v3677_v1  ;;  %v1239_v12 = vpack.c.bf16 %v3680_v10, %v3679_v8  ;;  %v1240_v18 = vpack.c.bf16 %v3682_v16, %v3681_v14  ;;  %v3689_v38 = vld [vmem:[#allocation6_spill] sm:$0xff]  ;;  %v3690_v40 = vld [vmem:[#allocation7_spill] sm:$0xff] }
 0x31e   :  { %1113 = vst [vmem:[%s3284_s1 + $0x60] sm:$0xff] %v1225_v31  ;;  %1114 = vst [vmem:[%s3284_s1 + $0x68] sm:$0xff] %v1226_v55  ;;  %v1241_v24 = vpack.c.bf16 %v3684_v22, %v3683_v20  ;;  %v1242_v30 = vpack.c.bf16 %v3686_v28, %v3685_v26  ;;  %v1243_v36 = vpack.c.bf16 %v3688_v34, %v3687_v32  ;;  %v3691_v44 = vld [vmem:[#allocation8_spill] sm:$0xff]  ;;  %v3692_v46 = vld [vmem:[#allocation9_spill] sm:$0xff] }
 0x31f   :  { %1115 = vst [vmem:[%s3284_s1 + $0x70] sm:$0xff] %v1227_v25  ;;  %1116 = vst [vmem:[%s3284_s1 + $0x78] sm:$0xff] %v1228_v59  ;;  %v1244_v42 = vpack.c.bf16 %v3690_v40, %v3689_v38  ;;  %v1245_v48 = vpack.c.bf16 %v3692_v46, %v3691_v44  ;;  %v3693_v50 = vld [vmem:[#allocation10_spill] sm:$0xff]  ;;  %v3694_v52 = vld [vmem:[#allocation11_spill] sm:$0xff] }
 0x320   :  { %1117 = vst [vmem:[%s3284_s1 + $0x80] sm:$0xff] %v1229_v49  ;;  %1118 = vst [vmem:[%s3284_s1 + $0x88] sm:$0xff] %v1230_v0  ;;  %v1246_v54 = vpack.c.bf16 %v3694_v52, %v3693_v50  ;;  %v3695_v56 = vld [vmem:[#allocation12_spill] sm:$0xff]  ;;  %v3696_v58 = vld [vmem:[#allocation13_spill] sm:$0xff] }
 0x321   :  { %1119 = vst [vmem:[%s3284_s1 + $0x90] sm:$0xff] %v1231_v2  ;;  %1120 = vst [vmem:[%s3284_s1 + $0x98] sm:$0xff] %v1232_v4  ;;  %v1247_v60 = vpack.c.bf16 %v3696_v58, %v3695_v56  ;;  %v3697_v62 = vld [vmem:[#allocation14_spill] sm:$0xff]  ;;  %v3698_v41 = vld [vmem:[#allocation15_spill] sm:$0xff] }
 0x322   :  { %1121 = vst [vmem:[%s3284_s1 + $0xa0] sm:$0xff] %v1233_v57  ;;  %1122 = vst [vmem:[%s3284_s1 + $0xa8] sm:$0xff] %v1234_v37  ;;  %v1248_v11 = vpack.c.bf16 %v3698_v41, %v3697_v62  ;;  %v3699_v39 = vld [vmem:[#allocation16_spill] sm:$0xff]  ;;  %v3700_v63 = vld [vmem:[#allocation17_spill] sm:$0xff] }
 0x323   :  { %1123 = vst [vmem:[%s3284_s1 + $0xb0] sm:$0xff] %v1235_v61  ;;  %1124 = vst [vmem:[%s3284_s1 + $0xb8] sm:$0xff] %v1236_v29  ;;  %v1249_v27 = vpack.c.bf16 %v3700_v63, %v3699_v39  ;;  %v3701_v33 = vld [vmem:[#allocation18_spill] sm:$0xff]  ;;  %v3702_v35 = vld [vmem:[#allocation19_spill] sm:$0xff] }
 0x324   :  { %1125 = vst [vmem:[%s3284_s1 + $0xc0] sm:$0xff] %v1237_v45  ;;  %1126 = vst [vmem:[%s3284_s1 + $0xc8] sm:$0xff] %v1238_v21  ;;  %v1250_v47 = vpack.c.bf16 %v3702_v35, %v3701_v33  ;;  %v3703_v51 = vld [vmem:[#allocation20_spill] sm:$0xff]  ;;  %v3704_v19 = vld [vmem:[#allocation21_spill] sm:$0xff] }
 0x325   :  { %1127 = vst [vmem:[%s3284_s1 + $0xd0] sm:$0xff] %v1239_v12  ;;  %1128 = vst [vmem:[%s3284_s1 + $0xd8] sm:$0xff] %v1240_v18  ;;  %v1251_v17 = vpack.c.bf16 %v3704_v19, %v3703_v51  ;;  %v3705_v5 = vld [vmem:[#allocation22_spill] sm:$0xff]  ;;  %v3706_v31 = vld [vmem:[#allocation23_spill] sm:$0xff] }
 0x326   :  { %v1252_v55 = vpack.c.bf16 %v3706_v31, %v3705_v5  ;;  %1129 = vst [vmem:[%s3284_s1 + $0xe0] sm:$0xff] %v1241_v24  ;;  %1130 = vst [vmem:[%s3284_s1 + $0xe8] sm:$0xff] %v1242_v30  ;;  %v3707_v25 = vld [vmem:[#allocation24_spill] sm:$0xff]  ;;  %v3708_v59 = vld [vmem:[#allocation25_spill] sm:$0xff] }
 0x327   :  { %1131 = vst [vmem:[%s3284_s1 + $0xf0] sm:$0xff] %v1243_v36  ;;  %1132 = vst [vmem:[%s3284_s1 + $0xf8] sm:$0xff] %v1244_v42  ;;  %v1253_v49 = vpack.c.bf16 %v3708_v59, %v3707_v25  ;;  %v3709_v0 = vld [vmem:[#allocation26_spill] sm:$0xff]  ;;  %v3710_v2 = vld [vmem:[#allocation27_spill] sm:$0xff] }
 0x328   :  { %v1254_v4 = vpack.c.bf16 %v3710_v2, %v3709_v0  ;;  %v3711_v57 = vld [vmem:[#allocation28_spill] sm:$0xff]  ;;  %v3712_v37 = vld [vmem:[#allocation29_spill] sm:$0xff]  ;;  %v3713_v29 = vld [vmem:[#allocation30_spill] sm:$0xff]  ;;  %1133 = vst [vmem:[%s3284_s1 + $0x100] sm:$0xff] %v1245_v48 }
 0x329   :  { %v1255_v61 = vpack.c.bf16 %v3712_v37, %v3711_v57  ;;  %v3714_v6 = vld [vmem:[#allocation31_spill] sm:$0xff]  ;;  %1134 = vst [vmem:[%s3284_s1 + $0x108] sm:$0xff] %v1246_v54  ;;  %1135 = vst [vmem:[%s3284_s1 + $0x110] sm:$0xff] %v1247_v60  ;;  %v3715_v1 = vld [vmem:[#allocation32_spill] sm:$0xff] }
 0x32a   :  { %v1256_v45 = vpack.c.bf16 %v3714_v6, %v3713_v29  ;;  %1136 = vst [vmem:[%s3284_s1 + $0x118] sm:$0xff] %v1248_v11  ;;  %v3716_v13 = vld [vmem:[#allocation33_spill] sm:$0xff]  ;;  %v3717_v8 = vld [vmem:[#allocation34_spill] sm:$0xff]  ;;  %v3718_v10 = vld [vmem:[#allocation35_spill] sm:$0xff] }
 0x32b   :  { %v1257_v21 = vpack.c.bf16 %v3716_v13, %v3715_v1  ;;  %v1258_v12 = vpack.c.bf16 %v3718_v10, %v3717_v8  ;;  %v3719_v14 = vld [vmem:[#allocation36_spill] sm:$0xff]  ;;  %v3720_v18 = vld [vmem:[#allocation37_spill] sm:$0xff]  ;;  %v3721_v20 = vld [vmem:[#allocation38_spill] sm:$0xff]  ;;  %1137 = vst [vmem:[%s3284_s1 + $0x120] sm:$0xff] %v1249_v27 }
 0x32c   :  { %v1259_v16 = vpack.c.bf16 %v2955_v3, %v3719_v14  ;;  %v1260_v22 = vpack.c.bf16 %v3721_v20, %v3720_v18  ;;  %1138 = vst [vmem:[%s3284_s1 + $0x128] sm:$0xff] %v1250_v47  ;;  %1139 = vst [vmem:[%s3284_s1 + $0x130] sm:$0xff] %v1251_v17  ;;  %v3722_v3 = vld [vmem:[#allocation39_spill] sm:$0xff]  ;;  %v3723_v24 = vld [vmem:[#allocation40_spill] sm:$0xff] }
 0x32d   :  { %1140 = vst [vmem:[%s3284_s1 + $0x138] sm:$0xff] %v1252_v55  ;;  %v1261_v26 = vpack.c.bf16 %v3723_v24, %v3722_v3  ;;  %v3724_v28 = vld [vmem:[#allocation41_spill] sm:$0xff]  ;;  %v3725_v32 = vld [vmem:[#allocation42_spill] sm:$0xff]  ;;  %v3726_v36 = vld [vmem:[#allocation43_spill] sm:$0xff] }
 0x32e   :  { %v1262_v30 = vpack.c.bf16 %v2979_v53, %v3724_v28  ;;  %v1263_v34 = vpack.c.bf16 %v2987_v9, %v3725_v32  ;;  %v1264_v38 = vpack.c.bf16 %v3726_v36, %v2991_v43  ;;  %1141 = vst [vmem:[%s3284_s1 + $0x140] sm:$0xff] %v1253_v49  ;;  %1142 = vst [vmem:[%s3284_s1 + $0x148] sm:$0xff] %v1254_v4  ;;  %v3727_v9 = vld [vmem:[#allocation44_spill] sm:$0xff] }
 0x32f   :  { %1143 = vst [vmem:[%s3284_s1 + $0x150] sm:$0xff] %v1255_v61  ;;  %1144 = vst [vmem:[%s3284_s1 + $0x158] sm:$0xff] %v1256_v45  ;;  %v1265_v53 = vpack.c.bf16 %v3003_v7, %v2999_v23  ;;  %v1266_v43 = vpack.c.bf16 %v3011_v15, %v3727_v9 }
 0x330   :  { %1145 = vst [vmem:[%s3284_s1 + $0x160] sm:$0xff] %v1257_v21  ;;  %1146 = vst [vmem:[%s3284_s1 + $0x168] sm:$0xff] %v1258_v12 }
 0x331   :  { %1147 = vst [vmem:[%s3284_s1 + $0x170] sm:$0xff] %v1259_v16  ;;  %1148 = vst [vmem:[%s3284_s1 + $0x178] sm:$0xff] %v1260_v22 }
 0x332   :  { %1149 = vst [vmem:[%s3284_s1 + $0x180] sm:$0xff] %v1261_v26  ;;  %1150 = vst [vmem:[%s3284_s1 + $0x188] sm:$0xff] %v1262_v30 }
 0x333   :  { %1151 = vst [vmem:[%s3284_s1 + $0x190] sm:$0xff] %v1263_v34  ;;  %1152 = vst [vmem:[%s3284_s1 + $0x198] sm:$0xff] %v1264_v38 }
 0x334   :  { %1153 = vst [vmem:[%s3284_s1 + $0x1a0] sm:$0xff] %v1265_v53  ;;  %1154 = vst [vmem:[%s3284_s1 + $0x1a8] sm:$0xff] %v1266_v43 }

// kernel: conv_head_forward.6
= control target key start
LH: loop header
LB: loop body
LE: loop exit
PB: predicated region body
PF: predicated region fallthrough
CT: control target
= control target key end

     0   :  { %s1811_s12 = smov 0   ;;  %s1813_s13 = smov 0   ;;  %s2307_s0 = inlined_call_operand.vmem [shape: bf16[16,256], index: 0, kind: input, shape index: {}]   ;;  %s2308_s1 = inlined_call_operand.vmem [shape: bf16[256,2048], index: 1, kind: input, shape index: {}]   ;;  %s2309_s2 = inlined_call_operand.vmem [shape: f32[16,1], index: 2, kind: input, shape index: {}]   ;;  %s2310_s3 = inlined_call_operand.vmem [shape: bf16[16,2048], index: 3, kind: output, shape index: {}]  }
   0x1   :  { %s1815_s14 = smov 0  }
   0x2 LB: > { %s1574_s15 = sadd.s32 4294967295, %s1788_s14   ;;  %s1828_s16 = sadd.s32 1, %s1788_s14   ;;  %s1788_s14 = sphi %s1815_s14, %s2314_s14   ;;  %s1784_s13 = sphi %s1813_s13, %s2313_s13   ;;  %s1780_s12 = sphi %s1811_s12, %s2312_s12  }
   0x3   : > { %s38_s17 = ssub.s32 %s1788_s14, %s1828_s16  ;;  %s41_s18 = sadd.s32 1, %s1784_s13 }
   0x4   : > { %p39_p0 = scmp.eq.s32.totalorder %s38_s17, 0  ;;  %p48_p1 = scmp.ne.s32.totalorder %s1784_s13, %s1780_s12 }
   0x5   : > { %p49_p2 = scmp.eq.s32.totalorder %s1788_s14, 0  ;;  %p99_p3 = scmp.eq.s32.totalorder %s1574_s15, 1 }
   0x6   : > { %s1839_s19 = scalar_select %p39_p0, %s1784_s13, %s41_s18  }
   0x7   : > { %p50_p4 = por %p49_p2, %p48_p1  ;;  %p1841_p5 = por %p99_p3, %p48_p1 }
   0x8   : > { %p1577_p6 = scmp.ge.s32.totalorder %s1788_s14, 2 }
   0xa   : > { %127 = sbr.rel (%p1577_p6) target bundleno = 85 (0x55), region = 24 }
  0x11   : > { %130 = sbr.rel (!%p50_p4) target bundleno = 85 (0x55), region = 28  ;;  %s132_s21 = sand.u32 (%p50_p4), 1, %s1784_s13  }
  0x12   : > { %s1727_s22 = sshll.u32 (%p50_p4), %s1788_s14, 5  ;;  %s1578_s23 = sshll.u32 (%p50_p4), %s132_s21, 10 }
  0x13   : > { %s1851_s26 = scalar_lea.vmem (%p50_p4), %s2308_s1, %s1727_s22  ;;  %s1856_s27 = scalar_lea.vmem (%p50_p4), [#allocation2], %s1578_s23 }
  0x14   : > { %v150_v0 = vld [vmem:[%s1851_s26] sm:$0xff] (%p50_p4)  ;;  %v152_v1 = vld [vmem:[%s1851_s26 + $0x8] sm:$0xff] (%p50_p4)  ;;  %v154_v2 = vld [vmem:[%s1851_s26 + $0x10] sm:$0xff] (%p50_p4) }
  0x15   : > { %151 = vst [vmem:[%s1856_s27] sm:$0xff] (%p50_p4), %v150_v0  ;;  %153 = vst [vmem:[%s1856_s27 + $0x8] sm:$0xff] (%p50_p4), %v152_v1  ;;  %v156_v3 = vld [vmem:[%s1851_s26 + $0x18] sm:$0xff] (%p50_p4)  ;;  %v158_v4 = vld [vmem:[%s1851_s26 + $0x40] sm:$0xff] (%p50_p4) }
  0x16   : > { %155 = vst [vmem:[%s1856_s27 + $0x10] sm:$0xff] (%p50_p4), %v154_v2  ;;  %v160_v5 = vld [vmem:[%s1851_s26 + $0x48] sm:$0xff] (%p50_p4)  ;;  %157 = vst [vmem:[%s1856_s27 + $0x18] sm:$0xff] (%p50_p4), %v156_v3  ;;  %v162_v6 = vld [vmem:[%s1851_s26 + $0x50] sm:$0xff] (%p50_p4) }
  0x17   : > { %159 = vst [vmem:[%s1856_s27 + $0x20] sm:$0xff] (%p50_p4), %v158_v4  ;;  %161 = vst [vmem:[%s1856_s27 + $0x28] sm:$0xff] (%p50_p4), %v160_v5  ;;  %v164_v7 = vld [vmem:[%s1851_s26 + $0x58] sm:$0xff] (%p50_p4)  ;;  %v166_v8 = vld [vmem:[%s1851_s26 + $0x80] sm:$0xff] (%p50_p4) }
  0x18   : > { %163 = vst [vmem:[%s1856_s27 + $0x30] sm:$0xff] %v162_v6  ;;  %165 = vst [vmem:[%s1856_s27 + $0x38] sm:$0xff] %v164_v7  ;;  %v168_v9 = vld [vmem:[%s1851_s26 + $0x88] sm:$0xff]  ;;  %v170_v10 = vld [vmem:[%s1851_s26 + $0x90] sm:$0xff] }
  0x19   : > { %167 = vst [vmem:[%s1856_s27 + $0x40] sm:$0xff] %v166_v8  ;;  %v172_v11 = vld [vmem:[%s1851_s26 + $0x98] sm:$0xff]  ;;  %169 = vst [vmem:[%s1856_s27 + $0x48] sm:$0xff] %v168_v9  ;;  %v174_v12 = vld [vmem:[%s1851_s26 + $0xc0] sm:$0xff] }
  0x1a   : > { %171 = vst [vmem:[%s1856_s27 + $0x50] sm:$0xff] %v170_v10  ;;  %173 = vst [vmem:[%s1856_s27 + $0x58] sm:$0xff] %v172_v11  ;;  %v176_v13 = vld [vmem:[%s1851_s26 + $0xc8] sm:$0xff]  ;;  %v178_v14 = vld [vmem:[%s1851_s26 + $0xd0] sm:$0xff] }
  0x1b   : > { %175 = vst [vmem:[%s1856_s27 + $0x60] sm:$0xff] %v174_v12  ;;  %177 = vst [vmem:[%s1856_s27 + $0x68] sm:$0xff] %v176_v13  ;;  %v180_v15 = vld [vmem:[%s1851_s26 + $0xd8] sm:$0xff]  ;;  %v182_v16 = vld [vmem:[%s1851_s26 + $0x100] sm:$0xff] }
  0x1c   : > { %179 = vst [vmem:[%s1856_s27 + $0x70] sm:$0xff] %v178_v14  ;;  %v184_v17 = vld [vmem:[%s1851_s26 + $0x108] sm:$0xff]  ;;  %181 = vst [vmem:[%s1856_s27 + $0x78] sm:$0xff] %v180_v15  ;;  %v186_v18 = vld [vmem:[%s1851_s26 + $0x110] sm:$0xff] }
  0x1d   : > { %183 = vst [vmem:[%s1856_s27 + $0x80] sm:$0xff] %v182_v16  ;;  %185 = vst [vmem:[%s1856_s27 + $0x88] sm:$0xff] %v184_v17  ;;  %v188_v19 = vld [vmem:[%s1851_s26 + $0x118] sm:$0xff]  ;;  %v190_v20 = vld [vmem:[%s1851_s26 + $0x140] sm:$0xff] }
  0x1e   : > { %187 = vst [vmem:[%s1856_s27 + $0x90] sm:$0xff] %v186_v18  ;;  %189 = vst [vmem:[%s1856_s27 + $0x98] sm:$0xff] %v188_v19  ;;  %v192_v21 = vld [vmem:[%s1851_s26 + $0x148] sm:$0xff]  ;;  %v194_v22 = vld [vmem:[%s1851_s26 + $0x150] sm:$0xff] }
  0x1f   : > { %191 = vst [vmem:[%s1856_s27 + $0xa0] sm:$0xff] %v190_v20  ;;  %v196_v23 = vld [vmem:[%s1851_s26 + $0x158] sm:$0xff]  ;;  %193 = vst [vmem:[%s1856_s27 + $0xa8] sm:$0xff] %v192_v21  ;;  %v198_v24 = vld [vmem:[%s1851_s26 + $0x180] sm:$0xff] }
  0x20   : > { %195 = vst [vmem:[%s1856_s27 + $0xb0] sm:$0xff] %v194_v22  ;;  %197 = vst [vmem:[%s1856_s27 + $0xb8] sm:$0xff] %v196_v23  ;;  %v200_v25 = vld [vmem:[%s1851_s26 + $0x188] sm:$0xff]  ;;  %v202_v26 = vld [vmem:[%s1851_s26 + $0x190] sm:$0xff] }
  0x21   : > { %199 = vst [vmem:[%s1856_s27 + $0xc0] sm:$0xff] %v198_v24  ;;  %201 = vst [vmem:[%s1856_s27 + $0xc8] sm:$0xff] %v200_v25  ;;  %v204_v27 = vld [vmem:[%s1851_s26 + $0x198] sm:$0xff]  ;;  %v206_v28 = vld [vmem:[%s1851_s26 + $0x1c0] sm:$0xff] }
  0x22   : > { %203 = vst [vmem:[%s1856_s27 + $0xd0] sm:$0xff] %v202_v26  ;;  %v208_v29 = vld [vmem:[%s1851_s26 + $0x1c8] sm:$0xff]  ;;  %205 = vst [vmem:[%s1856_s27 + $0xd8] sm:$0xff] %v204_v27  ;;  %v210_v30 = vld [vmem:[%s1851_s26 + $0x1d0] sm:$0xff] }
  0x23   : > { %207 = vst [vmem:[%s1856_s27 + $0xe0] sm:$0xff] %v206_v28  ;;  %209 = vst [vmem:[%s1856_s27 + $0xe8] sm:$0xff] %v208_v29  ;;  %v212_v31 = vld [vmem:[%s1851_s26 + $0x1d8] sm:$0xff]  ;;  %v214_v32 = vld [vmem:[%s1851_s26 + $0x200] sm:$0xff] }
  0x24   : > { %211 = vst [vmem:[%s1856_s27 + $0xf0] sm:$0xff] %v210_v30  ;;  %213 = vst [vmem:[%s1856_s27 + $0xf8] sm:$0xff] %v212_v31  ;;  %v216_v33 = vld [vmem:[%s1851_s26 + $0x208] sm:$0xff]  ;;  %v218_v34 = vld [vmem:[%s1851_s26 + $0x210] sm:$0xff] }
  0x25   : > { %215 = vst [vmem:[%s1856_s27 + $0x100] sm:$0xff] %v214_v32  ;;  %v220_v35 = vld [vmem:[%s1851_s26 + $0x218] sm:$0xff]  ;;  %217 = vst [vmem:[%s1856_s27 + $0x108] sm:$0xff] %v216_v33  ;;  %v222_v36 = vld [vmem:[%s1851_s26 + $0x240] sm:$0xff] }
  0x26   : > { %219 = vst [vmem:[%s1856_s27 + $0x110] sm:$0xff] %v218_v34  ;;  %221 = vst [vmem:[%s1856_s27 + $0x118] sm:$0xff] %v220_v35  ;;  %v224_v37 = vld [vmem:[%s1851_s26 + $0x248] sm:$0xff]  ;;  %v226_v38 = vld [vmem:[%s1851_s26 + $0x250] sm:$0xff] }
  0x27   : > { %223 = vst [vmem:[%s1856_s27 + $0x120] sm:$0xff] %v222_v36  ;;  %225 = vst [vmem:[%s1856_s27 + $0x128] sm:$0xff] %v224_v37  ;;  %v228_v39 = vld [vmem:[%s1851_s26 + $0x258] sm:$0xff]  ;;  %v230_v40 = vld [vmem:[%s1851_s26 + $0x280] sm:$0xff] }
  0x28   : > { %227 = vst [vmem:[%s1856_s27 + $0x130] sm:$0xff] %v226_v38  ;;  %v232_v41 = vld [vmem:[%s1851_s26 + $0x288] sm:$0xff]  ;;  %229 = vst [vmem:[%s1856_s27 + $0x138] sm:$0xff] %v228_v39  ;;  %v234_v42 = vld [vmem:[%s1851_s26 + $0x290] sm:$0xff] }
  0x29   : > { %231 = vst [vmem:[%s1856_s27 + $0x140] sm:$0xff] %v230_v40  ;;  %233 = vst [vmem:[%s1856_s27 + $0x148] sm:$0xff] %v232_v41  ;;  %v236_v43 = vld [vmem:[%s1851_s26 + $0x298] sm:$0xff]  ;;  %v238_v44 = vld [vmem:[%s1851_s26 + $0x2c0] sm:$0xff] }
  0x2a   : > { %235 = vst [vmem:[%s1856_s27 + $0x150] sm:$0xff] %v234_v42  ;;  %237 = vst [vmem:[%s1856_s27 + $0x158] sm:$0xff] %v236_v43  ;;  %v240_v45 = vld [vmem:[%s1851_s26 + $0x2c8] sm:$0xff]  ;;  %v242_v46 = vld [vmem:[%s1851_s26 + $0x2d0] sm:$0xff] }
  0x2b   : > { %239 = vst [vmem:[%s1856_s27 + $0x160] sm:$0xff] %v238_v44  ;;  %v244_v47 = vld [vmem:[%s1851_s26 + $0x2d8] sm:$0xff]  ;;  %241 = vst [vmem:[%s1856_s27 + $0x168] sm:$0xff] %v240_v45  ;;  %v246_v48 = vld [vmem:[%s1851_s26 + $0x300] sm:$0xff] }
  0x2c   : > { %243 = vst [vmem:[%s1856_s27 + $0x170] sm:$0xff] %v242_v46  ;;  %245 = vst [vmem:[%s1856_s27 + $0x178] sm:$0xff] %v244_v47  ;;  %v248_v49 = vld [vmem:[%s1851_s26 + $0x308] sm:$0xff]  ;;  %v250_v50 = vld [vmem:[%s1851_s26 + $0x310] sm:$0xff] }
  0x2d   : > { %247 = vst [vmem:[%s1856_s27 + $0x180] sm:$0xff] %v246_v48  ;;  %249 = vst [vmem:[%s1856_s27 + $0x188] sm:$0xff] %v248_v49  ;;  %v252_v51 = vld [vmem:[%s1851_s26 + $0x318] sm:$0xff]  ;;  %v254_v52 = vld [vmem:[%s1851_s26 + $0x340] sm:$0xff] }
  0x2e   : > { %251 = vst [vmem:[%s1856_s27 + $0x190] sm:$0xff] %v250_v50  ;;  %v256_v53 = vld [vmem:[%s1851_s26 + $0x348] sm:$0xff]  ;;  %253 = vst [vmem:[%s1856_s27 + $0x198] sm:$0xff] %v252_v51  ;;  %v258_v54 = vld [vmem:[%s1851_s26 + $0x350] sm:$0xff] }
  0x2f   : > { %255 = vst [vmem:[%s1856_s27 + $0x1a0] sm:$0xff] %v254_v52  ;;  %257 = vst [vmem:[%s1856_s27 + $0x1a8] sm:$0xff] %v256_v53  ;;  %v260_v55 = vld [vmem:[%s1851_s26 + $0x358] sm:$0xff]  ;;  %v262_v56 = vld [vmem:[%s1851_s26 + $0x380] sm:$0xff] }
  0x30   : > { %259 = vst [vmem:[%s1856_s27 + $0x1b0] sm:$0xff] %v258_v54  ;;  %261 = vst [vmem:[%s1856_s27 + $0x1b8] sm:$0xff] %v260_v55  ;;  %v264_v57 = vld [vmem:[%s1851_s26 + $0x388] sm:$0xff]  ;;  %v266_v58 = vld [vmem:[%s1851_s26 + $0x390] sm:$0xff] }
  0x31   : > { %263 = vst [vmem:[%s1856_s27 + $0x1c0] sm:$0xff] %v262_v56  ;;  %v268_v59 = vld [vmem:[%s1851_s26 + $0x398] sm:$0xff]  ;;  %265 = vst [vmem:[%s1856_s27 + $0x1c8] sm:$0xff] %v264_v57  ;;  %v270_v60 = vld [vmem:[%s1851_s26 + $0x3c0] sm:$0xff] }
  0x32   : > { %267 = vst [vmem:[%s1856_s27 + $0x1d0] sm:$0xff] %v266_v58  ;;  %269 = vst [vmem:[%s1856_s27 + $0x1d8] sm:$0xff] %v268_v59  ;;  %v272_v61 = vld [vmem:[%s1851_s26 + $0x3c8] sm:$0xff]  ;;  %v274_v62 = vld [vmem:[%s1851_s26 + $0x3d0] sm:$0xff] }
  0x33   : > { %271 = vst [vmem:[%s1856_s27 + $0x1e0] sm:$0xff] %v270_v60  ;;  %273 = vst [vmem:[%s1856_s27 + $0x1e8] sm:$0xff] %v272_v61  ;;  %v276_v63 = vld [vmem:[%s1851_s26 + $0x3d8] sm:$0xff]  ;;  %v278_v0 = vld [vmem:[%s1851_s26 + $0x400] sm:$0xff] }
  0x34   : > { %275 = vst [vmem:[%s1856_s27 + $0x1f0] sm:$0xff] %v274_v62  ;;  %v280_v1 = vld [vmem:[%s1851_s26 + $0x408] sm:$0xff]  ;;  %277 = vst [vmem:[%s1856_s27 + $0x1f8] sm:$0xff] %v276_v63  ;;  %v282_v2 = vld [vmem:[%s1851_s26 + $0x410] sm:$0xff] }
  0x35   : > { %279 = vst [vmem:[%s1856_s27 + $0x200] sm:$0xff] %v278_v0  ;;  %281 = vst [vmem:[%s1856_s27 + $0x208] sm:$0xff] %v280_v1  ;;  %v284_v3 = vld [vmem:[%s1851_s26 + $0x418] sm:$0xff]  ;;  %v286_v4 = vld [vmem:[%s1851_s26 + $0x440] sm:$0xff] }
  0x36   : > { %283 = vst [vmem:[%s1856_s27 + $0x210] sm:$0xff] %v282_v2  ;;  %285 = vst [vmem:[%s1856_s27 + $0x218] sm:$0xff] %v284_v3  ;;  %v288_v5 = vld [vmem:[%s1851_s26 + $0x448] sm:$0xff]  ;;  %v290_v6 = vld [vmem:[%s1851_s26 + $0x450] sm:$0xff] }
  0x37   : > { %287 = vst [vmem:[%s1856_s27 + $0x220] sm:$0xff] %v286_v4  ;;  %v292_v7 = vld [vmem:[%s1851_s26 + $0x458] sm:$0xff]  ;;  %289 = vst [vmem:[%s1856_s27 + $0x228] sm:$0xff] %v288_v5  ;;  %v294_v8 = vld [vmem:[%s1851_s26 + $0x480] sm:$0xff] }
  0x38   : > { %291 = vst [vmem:[%s1856_s27 + $0x230] sm:$0xff] %v290_v6  ;;  %293 = vst [vmem:[%s1856_s27 + $0x238] sm:$0xff] %v292_v7  ;;  %v296_v9 = vld [vmem:[%s1851_s26 + $0x488] sm:$0xff]  ;;  %v298_v10 = vld [vmem:[%s1851_s26 + $0x490] sm:$0xff] }
  0x39   : > { %295 = vst [vmem:[%s1856_s27 + $0x240] sm:$0xff] %v294_v8  ;;  %297 = vst [vmem:[%s1856_s27 + $0x248] sm:$0xff] %v296_v9  ;;  %v300_v11 = vld [vmem:[%s1851_s26 + $0x498] sm:$0xff]  ;;  %v302_v12 = vld [vmem:[%s1851_s26 + $0x4c0] sm:$0xff] }
  0x3a   : > { %299 = vst [vmem:[%s1856_s27 + $0x250] sm:$0xff] %v298_v10  ;;  %v304_v13 = vld [vmem:[%s1851_s26 + $0x4c8] sm:$0xff]  ;;  %301 = vst [vmem:[%s1856_s27 + $0x258] sm:$0xff] %v300_v11  ;;  %v306_v14 = vld [vmem:[%s1851_s26 + $0x4d0] sm:$0xff] }
  0x3b   : > { %303 = vst [vmem:[%s1856_s27 + $0x260] sm:$0xff] %v302_v12  ;;  %305 = vst [vmem:[%s1856_s27 + $0x268] sm:$0xff] %v304_v13  ;;  %v308_v15 = vld [vmem:[%s1851_s26 + $0x4d8] sm:$0xff]  ;;  %v310_v16 = vld [vmem:[%s1851_s26 + $0x500] sm:$0xff] }
  0x3c   : > { %307 = vst [vmem:[%s1856_s27 + $0x270] sm:$0xff] %v306_v14  ;;  %309 = vst [vmem:[%s1856_s27 + $0x278] sm:$0xff] %v308_v15  ;;  %v312_v17 = vld [vmem:[%s1851_s26 + $0x508] sm:$0xff]  ;;  %v314_v18 = vld [vmem:[%s1851_s26 + $0x510] sm:$0xff] }
  0x3d   : > { %311 = vst [vmem:[%s1856_s27 + $0x280] sm:$0xff] %v310_v16  ;;  %v316_v19 = vld [vmem:[%s1851_s26 + $0x518] sm:$0xff]  ;;  %313 = vst [vmem:[%s1856_s27 + $0x288] sm:$0xff] %v312_v17  ;;  %v318_v20 = vld [vmem:[%s1851_s26 + $0x540] sm:$0xff] }
  0x3e   : > { %315 = vst [vmem:[%s1856_s27 + $0x290] sm:$0xff] %v314_v18  ;;  %317 = vst [vmem:[%s1856_s27 + $0x298] sm:$0xff] %v316_v19  ;;  %v320_v21 = vld [vmem:[%s1851_s26 + $0x548] sm:$0xff]  ;;  %v322_v22 = vld [vmem:[%s1851_s26 + $0x550] sm:$0xff] }
  0x3f   : > { %319 = vst [vmem:[%s1856_s27 + $0x2a0] sm:$0xff] %v318_v20  ;;  %321 = vst [vmem:[%s1856_s27 + $0x2a8] sm:$0xff] %v320_v21  ;;  %v324_v23 = vld [vmem:[%s1851_s26 + $0x558] sm:$0xff]  ;;  %v326_v24 = vld [vmem:[%s1851_s26 + $0x580] sm:$0xff] }
  0x40   : > { %323 = vst [vmem:[%s1856_s27 + $0x2b0] sm:$0xff] %v322_v22  ;;  %v328_v25 = vld [vmem:[%s1851_s26 + $0x588] sm:$0xff]  ;;  %325 = vst [vmem:[%s1856_s27 + $0x2b8] sm:$0xff] %v324_v23  ;;  %v330_v26 = vld [vmem:[%s1851_s26 + $0x590] sm:$0xff] }
  0x41   : > { %327 = vst [vmem:[%s1856_s27 + $0x2c0] sm:$0xff] %v326_v24  ;;  %329 = vst [vmem:[%s1856_s27 + $0x2c8] sm:$0xff] %v328_v25  ;;  %v332_v27 = vld [vmem:[%s1851_s26 + $0x598] sm:$0xff]  ;;  %v334_v28 = vld [vmem:[%s1851_s26 + $0x5c0] sm:$0xff] }
  0x42   : > { %331 = vst [vmem:[%s1856_s27 + $0x2d0] sm:$0xff] %v330_v26  ;;  %333 = vst [vmem:[%s1856_s27 + $0x2d8] sm:$0xff] %v332_v27  ;;  %v336_v29 = vld [vmem:[%s1851_s26 + $0x5c8] sm:$0xff]  ;;  %v338_v30 = vld [vmem:[%s1851_s26 + $0x5d0] sm:$0xff] }
  0x43   : > { %335 = vst [vmem:[%s1856_s27 + $0x2e0] sm:$0xff] %v334_v28  ;;  %v340_v31 = vld [vmem:[%s1851_s26 + $0x5d8] sm:$0xff]  ;;  %337 = vst [vmem:[%s1856_s27 + $0x2e8] sm:$0xff] %v336_v29  ;;  %v342_v32 = vld [vmem:[%s1851_s26 + $0x600] sm:$0xff] }
  0x44   : > { %339 = vst [vmem:[%s1856_s27 + $0x2f0] sm:$0xff] %v338_v30  ;;  %341 = vst [vmem:[%s1856_s27 + $0x2f8] sm:$0xff] %v340_v31  ;;  %v344_v33 = vld [vmem:[%s1851_s26 + $0x608] sm:$0xff]  ;;  %v346_v34 = vld [vmem:[%s1851_s26 + $0x610] sm:$0xff] }
  0x45   : > { %343 = vst [vmem:[%s1856_s27 + $0x300] sm:$0xff] %v342_v32  ;;  %345 = vst [vmem:[%s1856_s27 + $0x308] sm:$0xff] %v344_v33  ;;  %v348_v35 = vld [vmem:[%s1851_s26 + $0x618] sm:$0xff]  ;;  %v350_v36 = vld [vmem:[%s1851_s26 + $0x640] sm:$0xff] }
  0x46   : > { %347 = vst [vmem:[%s1856_s27 + $0x310] sm:$0xff] %v346_v34  ;;  %v352_v37 = vld [vmem:[%s1851_s26 + $0x648] sm:$0xff]  ;;  %349 = vst [vmem:[%s1856_s27 + $0x318] sm:$0xff] %v348_v35  ;;  %v354_v38 = vld [vmem:[%s1851_s26 + $0x650] sm:$0xff] }
  0x47   : > { %351 = vst [vmem:[%s1856_s27 + $0x320] sm:$0xff] %v350_v36  ;;  %353 = vst [vmem:[%s1856_s27 + $0x328] sm:$0xff] %v352_v37  ;;  %v356_v39 = vld [vmem:[%s1851_s26 + $0x658] sm:$0xff]  ;;  %v358_v40 = vld [vmem:[%s1851_s26 + $0x680] sm:$0xff] }
  0x48   : > { %355 = vst [vmem:[%s1856_s27 + $0x330] sm:$0xff] %v354_v38  ;;  %357 = vst [vmem:[%s1856_s27 + $0x338] sm:$0xff] %v356_v39  ;;  %v360_v41 = vld [vmem:[%s1851_s26 + $0x688] sm:$0xff]  ;;  %v362_v42 = vld [vmem:[%s1851_s26 + $0x690] sm:$0xff] }
  0x49   : > { %359 = vst [vmem:[%s1856_s27 + $0x340] sm:$0xff] %v358_v40  ;;  %v364_v43 = vld [vmem:[%s1851_s26 + $0x698] sm:$0xff]  ;;  %361 = vst [vmem:[%s1856_s27 + $0x348] sm:$0xff] %v360_v41  ;;  %v366_v44 = vld [vmem:[%s1851_s26 + $0x6c0] sm:$0xff] }
  0x4a   : > { %363 = vst [vmem:[%s1856_s27 + $0x350] sm:$0xff] %v362_v42  ;;  %365 = vst [vmem:[%s1856_s27 + $0x358] sm:$0xff] %v364_v43  ;;  %v368_v45 = vld [vmem:[%s1851_s26 + $0x6c8] sm:$0xff]  ;;  %v370_v46 = vld [vmem:[%s1851_s26 + $0x6d0] sm:$0xff] }
  0x4b   : > { %367 = vst [vmem:[%s1856_s27 + $0x360] sm:$0xff] %v366_v44  ;;  %369 = vst [vmem:[%s1856_s27 + $0x368] sm:$0xff] %v368_v45  ;;  %v372_v47 = vld [vmem:[%s1851_s26 + $0x6d8] sm:$0xff]  ;;  %v374_v48 = vld [vmem:[%s1851_s26 + $0x700] sm:$0xff] }
  0x4c   : > { %371 = vst [vmem:[%s1856_s27 + $0x370] sm:$0xff] %v370_v46  ;;  %v376_v49 = vld [vmem:[%s1851_s26 + $0x708] sm:$0xff]  ;;  %373 = vst [vmem:[%s1856_s27 + $0x378] sm:$0xff] %v372_v47  ;;  %v378_v50 = vld [vmem:[%s1851_s26 + $0x710] sm:$0xff] }
  0x4d   : > { %375 = vst [vmem:[%s1856_s27 + $0x380] sm:$0xff] %v374_v48  ;;  %377 = vst [vmem:[%s1856_s27 + $0x388] sm:$0xff] %v376_v49  ;;  %v380_v51 = vld [vmem:[%s1851_s26 + $0x718] sm:$0xff]  ;;  %v382_v52 = vld [vmem:[%s1851_s26 + $0x740] sm:$0xff] }
  0x4e   : > { %379 = vst [vmem:[%s1856_s27 + $0x390] sm:$0xff] %v378_v50  ;;  %381 = vst [vmem:[%s1856_s27 + $0x398] sm:$0xff] %v380_v51  ;;  %v384_v53 = vld [vmem:[%s1851_s26 + $0x748] sm:$0xff]  ;;  %v386_v54 = vld [vmem:[%s1851_s26 + $0x750] sm:$0xff] }
  0x4f   : > { %383 = vst [vmem:[%s1856_s27 + $0x3a0] sm:$0xff] %v382_v52  ;;  %v388_v55 = vld [vmem:[%s1851_s26 + $0x758] sm:$0xff]  ;;  %385 = vst [vmem:[%s1856_s27 + $0x3a8] sm:$0xff] %v384_v53  ;;  %v390_v56 = vld [vmem:[%s1851_s26 + $0x780] sm:$0xff] }
  0x50   : > { %387 = vst [vmem:[%s1856_s27 + $0x3b0] sm:$0xff] %v386_v54  ;;  %389 = vst [vmem:[%s1856_s27 + $0x3b8] sm:$0xff] %v388_v55  ;;  %v392_v57 = vld [vmem:[%s1851_s26 + $0x788] sm:$0xff]  ;;  %v394_v58 = vld [vmem:[%s1851_s26 + $0x790] sm:$0xff] }
  0x51   : > { %391 = vst [vmem:[%s1856_s27 + $0x3c0] sm:$0xff] %v390_v56  ;;  %393 = vst [vmem:[%s1856_s27 + $0x3c8] sm:$0xff] %v392_v57  ;;  %v396_v59 = vld [vmem:[%s1851_s26 + $0x798] sm:$0xff]  ;;  %v398_v60 = vld [vmem:[%s1851_s26 + $0x7c0] sm:$0xff] }
  0x52   : > { %395 = vst [vmem:[%s1856_s27 + $0x3d0] sm:$0xff] %v394_v58  ;;  %v400_v61 = vld [vmem:[%s1851_s26 + $0x7c8] sm:$0xff]  ;;  %397 = vst [vmem:[%s1856_s27 + $0x3d8] sm:$0xff] %v396_v59  ;;  %v402_v62 = vld [vmem:[%s1851_s26 + $0x7d0] sm:$0xff] }
  0x53   : > { %399 = vst [vmem:[%s1856_s27 + $0x3e0] sm:$0xff] %v398_v60  ;;  %401 = vst [vmem:[%s1856_s27 + $0x3e8] sm:$0xff] %v400_v61  ;;  %v404_v63 = vld [vmem:[%s1851_s26 + $0x7d8] sm:$0xff] }
  0x54   : > { %403 = vst [vmem:[%s1856_s27 + $0x3f0] sm:$0xff] %v402_v62  ;;  %405 = vst [vmem:[%s1856_s27 + $0x3f8] sm:$0xff] %v404_v63 }
  0x55 PF: > { %p1581_p7 = scmp.ge.s32.totalorder %s1788_s14, 1  ;;  %p410_p8 = scmp.lt.s32.totalorder %s1788_s14, 3 }
  0x57   : > { %p411_p9 = pnand %p1581_p7, %p410_p8 }
  0x58   : > { %s417_s28 = sand.u32 (!%p411_p9), 1, %s1780_s12   ;;  %v2117_v0 = vld [vmem:[%s2307_s0 + $0x4] ss:$8 sps:$4 sm:$0xff] (!%p411_p9)   ;;  %v1790_v27 = vmov (!%p411_p9), 0  }
  0x59   : > { %414 = sbr.rel (%p411_p9) target bundleno = 453 (0x1c5), region = 51  ;;  %s1582_s4 = sshll.u32 (!%p411_p9), %s417_s28, 10  ;;  %1265 = vmatprep.mubr.bf16.mxu0 (!%p411_p9), %v2117_v0  ;;  %1308 = vmatprep.mubr.bf16.mxu1 (!%p411_p9), %v2117_v0 }
  0x5a   : > { %s2123_s5 = scalar_lea.vmem (!%p411_p9), [#allocation2], %s1582_s4  ;;  %1762 = vset.pattern.permute.xlu0 (!%p411_p9), %v1790_v27  ;;  %s1583_s17 = sshll.u32 (!%p411_p9), %s417_s28, 6 }
  0x5b   : > { %v443_v1 = vld [vmem:[%s2123_s5] sm:$0xff] (!%p411_p9)  ;;  %v444_v3 = vld [vmem:[%s2123_s5 + $0x8] sm:$0xff] (!%p411_p9)  ;;  %s2272_s12 = scalar_lea.vmem (!%p411_p9), [#allocation3], %s1583_s17 }
  0x5c   : > { %v447_v2 = vld [vmem:[%s2123_s5 + $0x20] sm:$0xff] (!%p411_p9)  ;;  %v448_v5 = vld [vmem:[%s2123_s5 + $0x28] sm:$0xff] (!%p411_p9) }
  0x5d   : > { %v1587_v4 = vcombine.high (!%p411_p9), %v443_v1, %v447_v2  ;;  %v1586_v6 = vcombine.low (!%p411_p9), %v443_v1, %v447_v2  ;;  %v451_v7 = vld [vmem:[%s2123_s5 + $0x40] sm:$0xff] (!%p411_p9)  ;;  %v1589_v9 = vcombine.high (!%p411_p9), %v444_v3, %v448_v5  ;;  %v1588_v10 = vcombine.low (!%p411_p9), %v444_v3, %v448_v5  ;;  %v452_v12 = vld [vmem:[%s2123_s5 + $0x48] sm:$0xff] (!%p411_p9) }
  0x5e   : > { %v455_v8 = vld [vmem:[%s2123_s5 + $0x60] sm:$0xff] (!%p411_p9)  ;;  %v456_v13 = vld [vmem:[%s2123_s5 + $0x68] sm:$0xff] (!%p411_p9) }
  0x5f   : > { %v1595_v11 = vcombine.high (!%p411_p9), %v451_v7, %v455_v8  ;;  %v459_v14 = vld [vmem:[%s2123_s5 + $0x80] sm:$0xff] (!%p411_p9)  ;;  %1233 = vmatprep.subr.bf16.mxu0 (!%p411_p9), %v1587_v4  ;;  %v1597_v15 = vcombine.high (!%p411_p9), %v452_v12, %v456_v13  ;;  %v460_v17 = vld [vmem:[%s2123_s5 + $0x88] sm:$0xff] (!%p411_p9)  ;;  %1276 = vmatprep.subr.bf16.mxu1 (!%p411_p9), %v1589_v9  ;;  %v1594_v19 = vcombine.low (!%p411_p9), %v451_v7, %v455_v8 }
  0x60   : > { %v463_v16 = vld [vmem:[%s2123_s5 + $0xa0] sm:$0xff]  ;;  %v464_v18 = vld [vmem:[%s2123_s5 + $0xa8] sm:$0xff]  ;;  %1234 = vmatpush1.bf16.msra.mxu0 %v1586_v6  ;;  %1277 = vmatpush1.bf16.msra.mxu1 %v1588_v10  ;;  %v1596_v20 = vcombine.low %v452_v12, %v456_v13  ;;  %s1736_s18 = sshll.u32 (%p1841_p5), %s1574_s15, 5 }
  0x61   : > { %1235 = vmatprep.subr.bf16.mxu0 %v1595_v11  ;;  %v1603_v21 = vcombine.high %v459_v14, %v463_v16  ;;  %1278 = vmatprep.subr.bf16.mxu1 %v1597_v15  ;;  %v1605_v22 = vcombine.high %v460_v17, %v464_v18  ;;  %v467_v23 = vld [vmem:[%s2123_s5 + $0xc0] sm:$0xff]  ;;  %v468_v25 = vld [vmem:[%s2123_s5 + $0xc8] sm:$0xff]  ;;  %v1602_v28 = vcombine.low %v459_v14, %v463_v16  ;;  %s1486_s23 = scalar_lea.vmem (%p1841_p5), %s2310_s3, %s1736_s18 }
  0x62   : > { %v471_v24 = vld [vmem:[%s2123_s5 + $0xe0] sm:$0xff]  ;;  %v472_v26 = vld [vmem:[%s2123_s5 + $0xe8] sm:$0xff]  ;;  %v1604_v29 = vcombine.low %v460_v17, %v464_v18 }
  0x63   : > { %v1611_v30 = vcombine.high %v467_v23, %v471_v24  ;;  %v1613_v31 = vcombine.high %v468_v25, %v472_v26  ;;  %v475_v32 = vld [vmem:[%s2123_s5 + $0x100] sm:$0xff]  ;;  %v476_v34 = vld [vmem:[%s2123_s5 + $0x108] sm:$0xff]  ;;  %v1610_v36 = vcombine.low %v467_v23, %v471_v24  ;;  %v1612_v37 = vcombine.low %v468_v25, %v472_v26 }
  0x64   : > { %1236 = vmatpush1.bf16.msra.mxu0 %v1594_v19  ;;  %1279 = vmatpush1.bf16.msra.mxu1 %v1596_v20  ;;  %v479_v33 = vld [vmem:[%s2123_s5 + $0x120] sm:$0xff]  ;;  %v480_v35 = vld [vmem:[%s2123_s5 + $0x128] sm:$0xff] }
  0x65   : > { %1237 = vmatprep.subr.bf16.mxu0 %v1603_v21  ;;  %1280 = vmatprep.subr.bf16.mxu1 %v1605_v22  ;;  %v1619_v38 = vcombine.high %v475_v32, %v479_v33  ;;  %v1621_v39 = vcombine.high %v476_v34, %v480_v35  ;;  %v483_v40 = vld [vmem:[%s2123_s5 + $0x140] sm:$0xff]  ;;  %v484_v42 = vld [vmem:[%s2123_s5 + $0x148] sm:$0xff]  ;;  %v1618_v44 = vcombine.low %v475_v32, %v479_v33 }
  0x66   : > { %v487_v41 = vld [vmem:[%s2123_s5 + $0x160] sm:$0xff]  ;;  %v488_v43 = vld [vmem:[%s2123_s5 + $0x168] sm:$0xff]  ;;  %v1620_v45 = vcombine.low %v476_v34, %v480_v35 }
  0x67   : > { %v1627_v46 = vcombine.high %v483_v40, %v487_v41  ;;  %v1629_v47 = vcombine.high %v484_v42, %v488_v43  ;;  %v491_v48 = vld [vmem:[%s2123_s5 + $0x180] sm:$0xff]  ;;  %v492_v50 = vld [vmem:[%s2123_s5 + $0x188] sm:$0xff]  ;;  %v1626_v52 = vcombine.low %v483_v40, %v487_v41  ;;  %v1628_v53 = vcombine.low %v484_v42, %v488_v43 }
  0x68   : > { %1238 = vmatpush1.bf16.msra.mxu0 %v1602_v28  ;;  %1281 = vmatpush1.bf16.msra.mxu1 %v1604_v29  ;;  %v495_v49 = vld [vmem:[%s2123_s5 + $0x1a0] sm:$0xff]  ;;  %v496_v51 = vld [vmem:[%s2123_s5 + $0x1a8] sm:$0xff] }
  0x69   : > { %1239 = vmatprep.subr.bf16.mxu0 %v1611_v30  ;;  %1282 = vmatprep.subr.bf16.mxu1 %v1613_v31  ;;  %v1635_v54 = vcombine.high %v491_v48, %v495_v49  ;;  %v1637_v55 = vcombine.high %v492_v50, %v496_v51  ;;  %v499_v56 = vld [vmem:[%s2123_s5 + $0x1c0] sm:$0xff]  ;;  %v500_v58 = vld [vmem:[%s2123_s5 + $0x1c8] sm:$0xff]  ;;  %v1634_v60 = vcombine.low %v491_v48, %v495_v49 }
  0x6a   : > { %v503_v57 = vld [vmem:[%s2123_s5 + $0x1e0] sm:$0xff]  ;;  %v504_v59 = vld [vmem:[%s2123_s5 + $0x1e8] sm:$0xff]  ;;  %v1636_v61 = vcombine.low %v492_v50, %v496_v51 }
  0x6b   : > { %v1643_v62 = vcombine.high %v499_v56, %v503_v57  ;;  %v1645_v63 = vcombine.high %v500_v58, %v504_v59  ;;  %v507_v1 = vld [vmem:[%s2123_s5 + $0x200] sm:$0xff]  ;;  %v508_v3 = vld [vmem:[%s2123_s5 + $0x208] sm:$0xff]  ;;  %v1642_v5 = vcombine.low %v499_v56, %v503_v57  ;;  %v1644_v6 = vcombine.low %v500_v58, %v504_v59 }
  0x6c   : > { %1240 = vmatpush1.bf16.msra.mxu0 %v1610_v36  ;;  %1283 = vmatpush1.bf16.msra.mxu1 %v1612_v37  ;;  %v511_v2 = vld [vmem:[%s2123_s5 + $0x220] sm:$0xff]  ;;  %v512_v4 = vld [vmem:[%s2123_s5 + $0x228] sm:$0xff] }
  0x6d   : > { %1241 = vmatprep.subr.bf16.mxu0 %v1619_v38  ;;  %1284 = vmatprep.subr.bf16.mxu1 %v1621_v39  ;;  %v1651_v7 = vcombine.high %v507_v1, %v511_v2  ;;  %v1653_v8 = vcombine.high %v508_v3, %v512_v4  ;;  %v515_v9 = vld [vmem:[%s2123_s5 + $0x240] sm:$0xff]  ;;  %v516_v11 = vld [vmem:[%s2123_s5 + $0x248] sm:$0xff]  ;;  %v1650_v13 = vcombine.low %v507_v1, %v511_v2 }
  0x6e   : > { %v519_v10 = vld [vmem:[%s2123_s5 + $0x260] sm:$0xff]  ;;  %v520_v12 = vld [vmem:[%s2123_s5 + $0x268] sm:$0xff]  ;;  %v1652_v14 = vcombine.low %v508_v3, %v512_v4  ;;  %v445_v4 = vld [vmem:[%s2123_s5 + $0x10] sm:$0xff] }
  0x6f   : > { %v1659_v15 = vcombine.high %v515_v9, %v519_v10  ;;  %v1661_v16 = vcombine.high %v516_v11, %v520_v12  ;;  %v523_v17 = vld [vmem:[%s2123_s5 + $0x280] sm:$0xff]  ;;  %v524_v19 = vld [vmem:[%s2123_s5 + $0x288] sm:$0xff]  ;;  %v1658_v21 = vcombine.low %v515_v9, %v519_v10  ;;  %v1660_v22 = vcombine.low %v516_v11, %v520_v12  ;;  %v453_v12 = vld [vmem:[%s2123_s5 + $0x50] sm:$0xff] }
  0x70   : > { %1242 = vmatpush1.bf16.msra.mxu0 %v1618_v44  ;;  %1285 = vmatpush1.bf16.msra.mxu1 %v1620_v45  ;;  %v527_v18 = vld [vmem:[%s2123_s5 + $0x2a0] sm:$0xff]  ;;  %v528_v20 = vld [vmem:[%s2123_s5 + $0x2a8] sm:$0xff] }
  0x71   : > { %1243 = vmatprep.subr.bf16.mxu0 %v1627_v46  ;;  %1286 = vmatprep.subr.bf16.mxu1 %v1629_v47  ;;  %v1667_v23 = vcombine.high %v523_v17, %v527_v18  ;;  %v1669_v24 = vcombine.high %v524_v19, %v528_v20  ;;  %v531_v25 = vld [vmem:[%s2123_s5 + $0x2c0] sm:$0xff]  ;;  %v532_v27 = vld [vmem:[%s2123_s5 + $0x2c8] sm:$0xff]  ;;  %v1666_v29 = vcombine.low %v523_v17, %v527_v18 }
  0x72   : > { %v535_v26 = vld [vmem:[%s2123_s5 + $0x2e0] sm:$0xff]  ;;  %v536_v28 = vld [vmem:[%s2123_s5 + $0x2e8] sm:$0xff]  ;;  %v1668_v30 = vcombine.low %v524_v19, %v528_v20 }
  0x73   : > { %v1675_v31 = vcombine.high %v531_v25, %v535_v26  ;;  %v1677_v32 = vcombine.high %v532_v27, %v536_v28  ;;  %v539_v33 = vld [vmem:[%s2123_s5 + $0x300] sm:$0xff]  ;;  %v540_v36 = vld [vmem:[%s2123_s5 + $0x308] sm:$0xff]  ;;  %v1674_v38 = vcombine.low %v531_v25, %v535_v26  ;;  %v1676_v40 = vcombine.low %v532_v27, %v536_v28 }
  0x74   : > { %1244 = vmatpush1.bf16.msra.mxu0 %v1626_v52  ;;  %1287 = vmatpush1.bf16.msra.mxu1 %v1628_v53  ;;  %v543_v34 = vld [vmem:[%s2123_s5 + $0x320] sm:$0xff]  ;;  %v544_v37 = vld [vmem:[%s2123_s5 + $0x328] sm:$0xff] }
  0x75   : > { %1245 = vmatprep.subr.bf16.mxu0 %v1635_v54  ;;  %1288 = vmatprep.subr.bf16.mxu1 %v1637_v55  ;;  %v571_v35 = vld [vmem:[%s2309_s2] sm:$0xff]  ;;  %v572_v39 = vld [vmem:[%s2309_s2 + $0x8] sm:$0xff]  ;;  %v1683_v41 = vcombine.high %v539_v33, %v543_v34  ;;  %v1685_v42 = vcombine.high %v540_v36, %v544_v37  ;;  %v1682_v47 = vcombine.low %v539_v33, %v543_v34 }
  0x76   : > { %575 = vperm.xlu0 %1762, %v571_v35   ;;  %v547_v43 = vld [vmem:[%s2123_s5 + $0x340] sm:$0xff]  ;;  %v548_v45 = vld [vmem:[%s2123_s5 + $0x348] sm:$0xff]  ;;  %v1684_v48 = vcombine.low %v540_v36, %v544_v37  ;;  %v477_v37 = vld [vmem:[%s2123_s5 + $0x110] sm:$0xff] }
  0x77   : > { %v551_v44 = vld [vmem:[%s2123_s5 + $0x360] sm:$0xff]  ;;  %v552_v46 = vld [vmem:[%s2123_s5 + $0x368] sm:$0xff] }
  0x78   : > { %1246 = vmatpush1.bf16.msra.mxu0 %v1634_v60  ;;  %1289 = vmatpush1.bf16.msra.mxu1 %v1636_v61  ;;  %v1691_v49 = vcombine.high %v547_v43, %v551_v44  ;;  %v1693_v50 = vcombine.high %v548_v45, %v552_v46  ;;  %v555_v51 = vld [vmem:[%s2123_s5 + $0x380] sm:$0xff]  ;;  %v556_v53 = vld [vmem:[%s2123_s5 + $0x388] sm:$0xff]  ;;  %v1690_v55 = vcombine.low %v547_v43, %v551_v44  ;;  %v485_v44 = vld [vmem:[%s2123_s5 + $0x150] sm:$0xff] }
  0x79   : > { %1247 = vmatprep.subr.bf16.mxu0 %v1643_v62  ;;  %1290 = vmatprep.subr.bf16.mxu1 %v1645_v63  ;;  %v559_v52 = vld [vmem:[%s2123_s5 + $0x3a0] sm:$0xff]  ;;  %v560_v54 = vld [vmem:[%s2123_s5 + $0x3a8] sm:$0xff]  ;;  %v1692_v56 = vcombine.low %v548_v45, %v552_v46  ;;  %v489_v45 = vld [vmem:[%s2123_s5 + $0x170] sm:$0xff] }
  0x7a   : > { %580 = vperm.xlu0 %1762, %v572_v39   ;;  %v1699_v57 = vcombine.high %v555_v51, %v559_v52  ;;  %v1701_v58 = vcombine.high %v556_v53, %v560_v54  ;;  %v563_v59 = vld [vmem:[%s2123_s5 + $0x3c0] sm:$0xff]  ;;  %v564_v61 = vld [vmem:[%s2123_s5 + $0x3c8] sm:$0xff]  ;;  %v1698_v63 = vcombine.low %v555_v51, %v559_v52  ;;  %v1700_v1 = vcombine.low %v556_v53, %v560_v54  ;;  %v478_v39 = vld [vmem:[%s2123_s5 + $0x118] sm:$0xff] }
  0x7b   : > { %v567_v60 = vld [vmem:[%s2123_s5 + $0x3e0] sm:$0xff]  ;;  %v568_v62 = vld [vmem:[%s2123_s5 + $0x3e8] sm:$0xff]  ;;  %v486_v46 = vld [vmem:[%s2123_s5 + $0x158] sm:$0xff] }
  0x7c   : > { %1248 = vmatpush1.bf16.msra.mxu0 %v1642_v5  ;;  %1291 = vmatpush1.bf16.msra.mxu1 %v1644_v6  ;;  %v1707_v2 = vcombine.high %v563_v59, %v567_v60  ;;  %v1709_v3 = vcombine.high %v564_v61, %v568_v62  ;;  %v449_v5 = vld [vmem:[%s2123_s5 + $0x30] sm:$0xff]  ;;  %v446_v6 = vld [vmem:[%s2123_s5 + $0x18] sm:$0xff]  ;;  %v1708_v9 = vcombine.low %v564_v61, %v568_v62 }
  0x7d   : > { %1249 = vmatprep.subr.bf16.mxu0 %v1651_v7  ;;  %1292 = vmatprep.subr.bf16.mxu1 %v1653_v8  ;;  %v450_v7 = vld [vmem:[%s2123_s5 + $0x38] sm:$0xff]  ;;  %v1706_v8 = vcombine.low %v563_v59, %v567_v60  ;;  %v1591_v10 = vcombine.high %v445_v4, %v449_v5  ;;  %v1590_v17 = vcombine.low %v445_v4, %v449_v5  ;;  %v493_v52 = vld [vmem:[%s2123_s5 + $0x190] sm:$0xff] }
  0x7e   : > { %v1593_v11 = vcombine.high %v446_v6, %v450_v7  ;;  %v1592_v18 = vcombine.low %v446_v6, %v450_v7  ;;  %v497_v53 = vld [vmem:[%s2123_s5 + $0x1b0] sm:$0xff]  ;;  %v494_v54 = vld [vmem:[%s2123_s5 + $0x198] sm:$0xff] }
  0x7f   : > { %v501_v60 = vld [vmem:[%s2123_s5 + $0x1d0] sm:$0xff]  ;;  %v502_v62 = vld [vmem:[%s2123_s5 + $0x1d8] sm:$0xff] }
  0x80   : > { %1250 = vmatpush1.bf16.msra.mxu0 %v1650_v13  ;;  %1293 = vmatpush1.bf16.msra.mxu1 %v1652_v14  ;;  %v457_v13 = vld [vmem:[%s2123_s5 + $0x70] sm:$0xff]  ;;  %v2204_v14 = vld [vmem:[%s2307_s0] ss:$8 sps:$4 sm:$0xff]   ;;  %v510_v7 = vld [vmem:[%s2123_s5 + $0x218] sm:$0xff] }
  0x81   : > { %1251 = vmatprep.subr.bf16.mxu0 %v1659_v15  ;;  %1294 = vmatprep.subr.bf16.mxu1 %v1661_v16  ;;  %v454_v15 = vld [vmem:[%s2123_s5 + $0x58] sm:$0xff]  ;;  %v1599_v19 = vcombine.high %v453_v12, %v457_v13  ;;  %v1598_v25 = vcombine.low %v453_v12, %v457_v13  ;;  %v505_v61 = vld [vmem:[%s2123_s5 + $0x1f0] sm:$0xff] }
  0x82   : > { %v458_v16 = vld [vmem:[%s2123_s5 + $0x78] sm:$0xff]  ;;  %v509_v5 = vld [vmem:[%s2123_s5 + $0x210] sm:$0xff] }
  0x83   : > { %v1601_v20 = vcombine.high %v454_v15, %v458_v16  ;;  %v1600_v26 = vcombine.low %v454_v15, %v458_v16  ;;  %v513_v6 = vld [vmem:[%s2123_s5 + $0x230] sm:$0xff]  ;;  %v518_v16 = vld [vmem:[%s2123_s5 + $0x258] sm:$0xff] }
  0x84   : > { %1252 = vmatpush1.bf16.msra.mxu0 %v1658_v21  ;;  %1295 = vmatpush1.bf16.msra.mxu1 %v1660_v22  ;;  %v461_v21 = vld [vmem:[%s2123_s5 + $0x90] sm:$0xff] }
  0x85   : > { %1253 = vmatprep.subr.bf16.mxu0 %v1667_v23  ;;  %1296 = vmatprep.subr.bf16.mxu1 %v1669_v24  ;;  %v465_v22 = vld [vmem:[%s2123_s5 + $0xb0] sm:$0xff]  ;;  %v462_v23 = vld [vmem:[%s2123_s5 + $0x98] sm:$0xff] }
  0x86   : > { %v466_v24 = vld [vmem:[%s2123_s5 + $0xb8] sm:$0xff]  ;;  %v1607_v27 = vcombine.high %v461_v21, %v465_v22  ;;  %v1606_v33 = vcombine.low %v461_v21, %v465_v22  ;;  %v517_v13 = vld [vmem:[%s2123_s5 + $0x250] sm:$0xff] }
  0x87   : > { %v1609_v28 = vcombine.high %v462_v23, %v466_v24  ;;  %v1608_v34 = vcombine.low %v462_v23, %v466_v24  ;;  %v521_v15 = vld [vmem:[%s2123_s5 + $0x270] sm:$0xff]  ;;  %v526_v24 = vld [vmem:[%s2123_s5 + $0x298] sm:$0xff] }
  0x88   : > { %1254 = vmatpush1.bf16.msra.mxu0 %v1666_v29  ;;  %1297 = vmatpush1.bf16.msra.mxu1 %v1668_v30  ;;  %v469_v29 = vld [vmem:[%s2123_s5 + $0xd0] sm:$0xff] }
  0x89   : > { %1255 = vmatprep.subr.bf16.mxu0 %v1675_v31  ;;  %1298 = vmatprep.subr.bf16.mxu1 %v1677_v32  ;;  %v473_v30 = vld [vmem:[%s2123_s5 + $0xf0] sm:$0xff]  ;;  %v470_v31 = vld [vmem:[%s2123_s5 + $0xd8] sm:$0xff] }
  0x8a   : > { %v474_v32 = vld [vmem:[%s2123_s5 + $0xf8] sm:$0xff]  ;;  %v1615_v35 = vcombine.high %v469_v29, %v473_v30  ;;  %v525_v22 = vld [vmem:[%s2123_s5 + $0x290] sm:$0xff] }
  0x8b   : > { %v1617_v36 = vcombine.high %v470_v31, %v474_v32  ;;  %v529_v23 = vld [vmem:[%s2123_s5 + $0x2b0] sm:$0xff] }
  0x8c   : > { %1256 = vmatpush1.bf16.msra.mxu0 %v1674_v38  ;;  %1299 = vmatpush1.bf16.msra.mxu1 %v1676_v40  ;;  %v481_v38 = vld [vmem:[%s2123_s5 + $0x130] sm:$0xff]  ;;  %v482_v40 = vld [vmem:[%s2123_s5 + $0x138] sm:$0xff] }
  0x8d   : > { %1257 = vmatprep.subr.bf16.mxu0 %v1683_v41  ;;  %1300 = vmatprep.subr.bf16.mxu1 %v1685_v42  ;;  %v1614_v41 = vcombine.low %v469_v29, %v473_v30  ;;  %v1623_v42 = vcombine.high %v477_v37, %v481_v38  ;;  %v1625_v43 = vcombine.high %v478_v39, %v482_v40  ;;  %v533_v30 = vld [vmem:[%s2123_s5 + $0x2d0] sm:$0xff] }
  0x90   : > { %1258 = vmatpush1.bf16.msra.mxu0 %v1682_v47  ;;  %1301 = vmatpush1.bf16.msra.mxu1 %v1684_v48  ;;  %v490_v47 = vld [vmem:[%s2123_s5 + $0x178] sm:$0xff]  ;;  %v1622_v48 = vcombine.low %v477_v37, %v481_v38  ;;  %v541_v38 = vld [vmem:[%s2123_s5 + $0x310] sm:$0xff] }
  0x91   : > { %1259 = vmatprep.subr.bf16.mxu0 %v1691_v49  ;;  %1302 = vmatprep.subr.bf16.mxu1 %v1693_v50  ;;  %v1624_v49 = vcombine.low %v478_v39, %v482_v40  ;;  %v1631_v50 = vcombine.high %v485_v44, %v489_v45  ;;  %v1633_v51 = vcombine.high %v486_v46, %v490_v47  ;;  %v545_v39 = vld [vmem:[%s2123_s5 + $0x330] sm:$0xff]  ;;  %v542_v40 = vld [vmem:[%s2123_s5 + $0x318] sm:$0xff] }
  0x94   : > { %1260 = vmatpush1.bf16.msra.mxu0 %v1690_v55  ;;  %1303 = vmatpush1.bf16.msra.mxu1 %v1692_v56  ;;  %v498_v55 = vld [vmem:[%s2123_s5 + $0x1b8] sm:$0xff]  ;;  %v1630_v56 = vcombine.low %v485_v44, %v489_v45  ;;  %v549_v45 = vld [vmem:[%s2123_s5 + $0x350] sm:$0xff] }
  0x95   : > { %1261 = vmatprep.subr.bf16.mxu0 %v1699_v57  ;;  %1304 = vmatprep.subr.bf16.mxu1 %v1701_v58  ;;  %v1632_v57 = vcombine.low %v486_v46, %v490_v47  ;;  %v1639_v58 = vcombine.high %v493_v52, %v497_v53  ;;  %v1641_v59 = vcombine.high %v494_v54, %v498_v55  ;;  %v553_v46 = vld [vmem:[%s2123_s5 + $0x370] sm:$0xff]  ;;  %v550_v47 = vld [vmem:[%s2123_s5 + $0x358] sm:$0xff] }
  0x98   : > { %1262 = vmatpush1.bf16.msra.mxu0 %v1698_v63  ;;  %1305 = vmatpush1.bf16.msra.mxu1 %v1700_v1  ;;  %v506_v63 = vld [vmem:[%s2123_s5 + $0x1f8] sm:$0xff]  ;;  %v1638_v1 = vcombine.low %v493_v52, %v497_v53  ;;  %v557_v53 = vld [vmem:[%s2123_s5 + $0x390] sm:$0xff] }
  0x99   : > { %1263 = vmatprep.subr.bf16.mxu0 %v1707_v2  ;;  %1306 = vmatprep.subr.bf16.mxu1 %v1709_v3  ;;  %v1640_v2 = vcombine.low %v494_v54, %v498_v55  ;;  %v1647_v3 = vcombine.high %v501_v60, %v505_v61  ;;  %v1649_v4 = vcombine.high %v502_v62, %v506_v63  ;;  %v561_v54 = vld [vmem:[%s2123_s5 + $0x3b0] sm:$0xff]  ;;  %v558_v55 = vld [vmem:[%s2123_s5 + $0x398] sm:$0xff] }
  0x9c   : > { %1264 = vmatpush1.bf16.msra.mxu0 %v1706_v8  ;;  %1307 = vmatpush1.bf16.msra.mxu1 %v1708_v9  ;;  %v514_v8 = vld [vmem:[%s2123_s5 + $0x238] sm:$0xff]  ;;  %v1646_v9 = vcombine.low %v501_v60, %v505_v61  ;;  %v565_v61 = vld [vmem:[%s2123_s5 + $0x3d0] sm:$0xff] }
  0x9d   : > { %1319 = vmatprep.subr.bf16.mxu0 %v1591_v10  ;;  %1362 = vmatprep.subr.bf16.mxu1 %v1593_v11  ;;  %v1648_v10 = vcombine.low %v502_v62, %v506_v63  ;;  %v1655_v11 = vcombine.high %v509_v5, %v513_v6  ;;  %v1657_v12 = vcombine.high %v510_v7, %v514_v8  ;;  %v569_v62 = vld [vmem:[%s2123_s5 + $0x3f0] sm:$0xff]  ;;  %v566_v63 = vld [vmem:[%s2123_s5 + $0x3d8] sm:$0xff] }
  0x9f   : > { %1266 = vmatmul.mubr.bf16.vlgmr.msra.gmra.mrb[0].mxu0 %v2204_v14  ;;  %1309 = vmatmul.mubr.bf16.vlgmr.msra.gmra.mrb[0].mxu1 %v2204_v14 }
  0xa0   : > { %1320 = vmatpush1.bf16.msra.mxu0 %v1590_v17  ;;  %1363 = vmatpush1.bf16.msra.mxu1 %v1592_v18  ;;  %v522_v17 = vld [vmem:[%s2123_s5 + $0x278] sm:$0xff]  ;;  %v1654_v18 = vcombine.low %v509_v5, %v513_v6  ;;  %v1710_v6 = vcombine.low %v565_v61, %v569_v62 }
  0xa1   : > { %1321 = vmatprep.subr.bf16.mxu0 %v1599_v19  ;;  %1364 = vmatprep.subr.bf16.mxu1 %v1601_v20  ;;  %v1656_v19 = vcombine.low %v510_v7, %v514_v8  ;;  %v1663_v20 = vcombine.high %v517_v13, %v521_v15  ;;  %v1665_v21 = vcombine.high %v518_v16, %v522_v17 }
  0xa2   : > { %1351 = vmatprep.mubr.bf16.mxu0 %v2117_v0  ;;  %1394 = vmatprep.mubr.bf16.mxu1 %v2117_v0  ;;  %v1616_v0 = vcombine.low %v470_v31, %v474_v32  ;;  %v537_v31 = vld [vmem:[%s2123_s5 + $0x2f0] sm:$0xff]  ;;  %v534_v32 = vld [vmem:[%s2123_s5 + $0x2d8] sm:$0xff] }
  0xa4   : > { %1322 = vmatpush1.bf16.msra.mxu0 %v1598_v25  ;;  %1365 = vmatpush1.bf16.msra.mxu1 %v1600_v26  ;;  %v530_v25 = vld [vmem:[%s2123_s5 + $0x2b8] sm:$0xff]  ;;  %v1662_v26 = vcombine.low %v517_v13, %v521_v15 }
  0xa5   : > { %1323 = vmatprep.subr.bf16.mxu0 %v1607_v27  ;;  %1366 = vmatprep.subr.bf16.mxu1 %v1609_v28  ;;  %v1664_v27 = vcombine.low %v518_v16, %v522_v17  ;;  %v1671_v28 = vcombine.high %v525_v22, %v529_v23  ;;  %v1673_v29 = vcombine.high %v526_v24, %v530_v25 }
  0xa8   : > { %1324 = vmatpush1.bf16.msra.mxu0 %v1606_v33  ;;  %1367 = vmatpush1.bf16.msra.mxu1 %v1608_v34  ;;  %v538_v33 = vld [vmem:[%s2123_s5 + $0x2f8] sm:$0xff]  ;;  %v1670_v34 = vcombine.low %v525_v22, %v529_v23 }
  0xa9   : > { %1325 = vmatprep.subr.bf16.mxu0 %v1615_v35  ;;  %1368 = vmatprep.subr.bf16.mxu1 %v1617_v36  ;;  %v1672_v35 = vcombine.low %v526_v24, %v530_v25  ;;  %v1679_v36 = vcombine.high %v533_v30, %v537_v31  ;;  %v1681_v37 = vcombine.high %v534_v32, %v538_v33 }
  0xac   : > { %1326 = vmatpush1.bf16.msra.mxu0 %v1614_v41  ;;  %1369 = vmatpush1.bf16.msra.mxu1 %v1616_v0  ;;  %v546_v41 = vld [vmem:[%s2123_s5 + $0x338] sm:$0xff]  ;;  %v1678_v0 = vcombine.low %v533_v30, %v537_v31 }
  0xad   : > { %1327 = vmatprep.subr.bf16.mxu0 %v1623_v42  ;;  %1370 = vmatprep.subr.bf16.mxu1 %v1625_v43  ;;  %v1680_v42 = vcombine.low %v534_v32, %v538_v33  ;;  %v1687_v43 = vcombine.high %v541_v38, %v545_v39  ;;  %v1689_v44 = vcombine.high %v542_v40, %v546_v41 }
  0xb0   : > { %1328 = vmatpush1.bf16.msra.mxu0 %v1622_v48  ;;  %1371 = vmatpush1.bf16.msra.mxu1 %v1624_v49  ;;  %v554_v48 = vld [vmem:[%s2123_s5 + $0x378] sm:$0xff]  ;;  %v1686_v49 = vcombine.low %v541_v38, %v545_v39 }
  0xb1   : > { %1329 = vmatprep.subr.bf16.mxu0 %v1631_v50  ;;  %1372 = vmatprep.subr.bf16.mxu1 %v1633_v51  ;;  %v1688_v50 = vcombine.low %v542_v40, %v546_v41  ;;  %v1695_v51 = vcombine.high %v549_v45, %v553_v46  ;;  %v1697_v52 = vcombine.high %v550_v47, %v554_v48 }
  0xb4   : > { %1330 = vmatpush1.bf16.msra.mxu0 %v1630_v56  ;;  %1373 = vmatpush1.bf16.msra.mxu1 %v1632_v57  ;;  %v562_v56 = vld [vmem:[%s2123_s5 + $0x3b8] sm:$0xff]  ;;  %v1694_v57 = vcombine.low %v549_v45, %v553_v46 }
  0xb5   : > { %1331 = vmatprep.subr.bf16.mxu0 %v1639_v58  ;;  %1374 = vmatprep.subr.bf16.mxu1 %v1641_v59  ;;  %v1696_v58 = vcombine.low %v550_v47, %v554_v48  ;;  %v1703_v59 = vcombine.high %v557_v53, %v561_v54  ;;  %v1705_v60 = vcombine.high %v558_v55, %v562_v56 }
  0xb8   : > { %1332 = vmatpush1.bf16.msra.mxu0 %v1638_v1  ;;  %1375 = vmatpush1.bf16.msra.mxu1 %v1640_v2  ;;  %v570_v1 = vld [vmem:[%s2123_s5 + $0x3f8] sm:$0xff]  ;;  %v1702_v2 = vcombine.low %v557_v53, %v561_v54 }
  0xb9   : > { %1333 = vmatprep.subr.bf16.mxu0 %v1647_v3  ;;  %1376 = vmatprep.subr.bf16.mxu1 %v1649_v4  ;;  %v1704_v3 = vcombine.low %v558_v55, %v562_v56  ;;  %v1711_v4 = vcombine.high %v565_v61, %v569_v62  ;;  %v1713_v5 = vcombine.high %v566_v63, %v570_v1 }
  0xba   : > { %v1712_v7 = vcombine.low %v566_v63, %v570_v1 }
  0xbc   : > { %1334 = vmatpush1.bf16.msra.mxu0 %v1646_v9  ;;  %1377 = vmatpush1.bf16.msra.mxu1 %v1648_v10 }
  0xbd   : > { %1335 = vmatprep.subr.bf16.mxu0 %v1655_v11  ;;  %1378 = vmatprep.subr.bf16.mxu1 %v1657_v12 }
  0xc0   : > { %1336 = vmatpush1.bf16.msra.mxu0 %v1654_v18  ;;  %1379 = vmatpush1.bf16.msra.mxu1 %v1656_v19 }
  0xc1   : > { %1337 = vmatprep.subr.bf16.mxu0 %v1663_v20  ;;  %1380 = vmatprep.subr.bf16.mxu1 %v1665_v21 }
  0xc4   : > { %1338 = vmatpush1.bf16.msra.mxu0 %v1662_v26  ;;  %1381 = vmatpush1.bf16.msra.mxu1 %v1664_v27 }
  0xc5   : > { %1339 = vmatprep.subr.bf16.mxu0 %v1671_v28  ;;  %1382 = vmatprep.subr.bf16.mxu1 %v1673_v29 }
  0xc8   : > { %1340 = vmatpush1.bf16.msra.mxu0 %v1670_v34  ;;  %1383 = vmatpush1.bf16.msra.mxu1 %v1672_v35 }
  0xc9   : > { %1341 = vmatprep.subr.bf16.mxu0 %v1679_v36  ;;  %1384 = vmatprep.subr.bf16.mxu1 %v1681_v37 }
  0xcc   : > { %1342 = vmatpush1.bf16.msra.mxu0 %v1678_v0  ;;  %1385 = vmatpush1.bf16.msra.mxu1 %v1680_v42 }
  0xcd   : > { %1343 = vmatprep.subr.bf16.mxu0 %v1687_v43  ;;  %1386 = vmatprep.subr.bf16.mxu1 %v1689_v44 }
  0xd0   : > { %1344 = vmatpush1.bf16.msra.mxu0 %v1686_v49  ;;  %1387 = vmatpush1.bf16.msra.mxu1 %v1688_v50 }
  0xd1   : > { %1345 = vmatprep.subr.bf16.mxu0 %v1695_v51  ;;  %1388 = vmatprep.subr.bf16.mxu1 %v1697_v52 }
  0xd4   : > { %1346 = vmatpush1.bf16.msra.mxu0 %v1694_v57  ;;  %1389 = vmatpush1.bf16.msra.mxu1 %v1696_v58 }
  0xd5   : > { %1347 = vmatprep.subr.bf16.mxu0 %v1703_v59  ;;  %1390 = vmatprep.subr.bf16.mxu1 %v1705_v60 }
  0xd8   : > { %1348 = vmatpush1.bf16.msra.mxu0 %v1702_v2  ;;  %1391 = vmatpush1.bf16.msra.mxu1 %v1704_v3 }
  0xd9   : > { %1349 = vmatprep.subr.bf16.mxu0 %v1711_v4  ;;  %1392 = vmatprep.subr.bf16.mxu1 %v1713_v5 }
  0xdc   : > { %1350 = vmatpush1.bf16.msra.mxu0 %v1710_v6  ;;  %1393 = vmatpush1.bf16.msra.mxu1 %v1712_v7 }
  0xdf   : > { %1352 = vmatmul.mubr.bf16.vlgmr.msra.gmra.mrb[4].mxu0 %v2204_v14  ;;  %1395 = vmatmul.mubr.bf16.vlgmr.msra.gmra.mrb[4].mxu1 %v2204_v14 }
  0xf5   : > { %v576_v8 = vpop.permute.xlu0 %575 }
  0xf9   : > { %v581_v10 = vpop.permute.xlu0 %580 }
 0x172   : > { %v1267_v9 = vpop.f32.mrb[0].mxu0  ;;  %v1310_v12 = vpop.f32.mrb[0].mxu1 }
 0x173   : > { %v1268_v11 = vadd.f32 %v1267_v9, %v576_v8  ;;  %v1269_v13 = vpop.f32.mrb[1].mxu0  ;;  %v1311_v15 = vadd.f32 %v1310_v12, %v576_v8  ;;  %v1312_v17 = vpop.f32.mrb[1].mxu1 }
 0x174   : > { %v1270_v16 = vadd.f32 %v1269_v13, %v576_v8  ;;  %v1271_v18 = vpop.f32.mrb[2].mxu0  ;;  %v1313_v20 = vadd.f32 %v1312_v17, %v576_v8  ;;  %v1314_v22 = vpop.f32.mrb[2].mxu1 }
 0x175   : > { %v1405_v19 = vmax.f32 %v1268_v11, 0.0  ;;  %v1272_v21 = vadd.f32 %v1271_v18, %v581_v10  ;;  %v1273_v23 = vpop.f32.mrb[3].mxu0  ;;  %v1407_v24 = vmax.f32 %v1311_v15, 0.0  ;;  %v1315_v14 = vadd.f32 %v1314_v22, %v581_v10  ;;  %v1316_v27 = vpop.f32.mrb[3].mxu1 }
 0x176   : > { %v1406_v25 = vmax.f32 %v1270_v16, 0.0  ;;  %v1274_v26 = vadd.f32 %v1273_v23, %v581_v10  ;;  %v1408_v28 = vmax.f32 %v1313_v20, 0.0  ;;  %v1317_v30 = vadd.f32 %v1316_v27, %v581_v10 }
 0x177   : > { %v1413_v29 = vmax.f32 %v1272_v21, 0.0  ;;  %v1415_v32 = vmax.f32 %v1315_v14, 0.0 }
 0x178   : > { %v1728_v31 = vpack.c.bf16 %v1406_v25, %v1405_v19  ;;  %v1414_v33 = vmax.f32 %v1274_v26, 0.0  ;;  %v1729_v34 = vpack.c.bf16 %v1408_v28, %v1407_v24  ;;  %v1416_v35 = vmax.f32 %v1317_v30, 0.0 }
 0x17a   : > { %1469 = vst [vmem:[%s2272_s12] sm:$0xff] %v1728_v31  ;;  %v1732_v36 = vpack.c.bf16 %v1414_v33, %v1413_v29  ;;  %1470 = vst [vmem:[%s2272_s12 + $0x8] sm:$0xff] %v1729_v34  ;;  %v1733_v37 = vpack.c.bf16 %v1416_v35, %v1415_v32 }
 0x17c   : > { %1473 = vst [vmem:[%s2272_s12 + $0x20] sm:$0xff] %v1732_v36  ;;  %1474 = vst [vmem:[%s2272_s12 + $0x28] sm:$0xff] %v1733_v37 }
 0x181   : > { %v1499_v2 = vld [vmem:[%s2272_s12] sm:$0xff] (%p1841_p5)  ;;  %v1501_v3 = vld [vmem:[%s2272_s12 + $0x8] sm:$0xff] (%p1841_p5) }
 0x182   : > { %1500 = vst [vmem:[%s1486_s23] sm:$0xff] (%p1841_p5), %v1499_v2  ;;  %1502 = vst [vmem:[%s1486_s23 + $0x8] sm:$0xff] (%p1841_p5), %v1501_v3 }
 0x183   : > { %v1507_v6 = vld [vmem:[%s2272_s12 + $0x20] sm:$0xff] (%p1841_p5)  ;;  %v1509_v7 = vld [vmem:[%s2272_s12 + $0x28] sm:$0xff] (%p1841_p5) }
 0x184   : > { %1508 = vst [vmem:[%s1486_s23 + $0x40] sm:$0xff] (%p1841_p5), %v1507_v6  ;;  %1510 = vst [vmem:[%s1486_s23 + $0x48] sm:$0xff] (%p1841_p5), %v1509_v7 }
 0x1b2   : > { %v1353_v38 = vpop.f32.mrb[4].mxu0  ;;  %v1396_v40 = vpop.f32.mrb[4].mxu1 }
 0x1b3   : > { %v1354_v39 = vadd.f32 %v1353_v38, %v576_v8  ;;  %v1355_v41 = vpop.f32.mrb[5].mxu0  ;;  %v1397_v0 = vadd.f32 %v1396_v40, %v576_v8  ;;  %v1398_v43 = vpop.f32.mrb[5].mxu1 }
 0x1b4   : > { %v1356_v42 = vadd.f32 %v1355_v41, %v576_v8  ;;  %v1357_v44 = vpop.f32.mrb[6].mxu0  ;;  %v1399_v46 = vadd.f32 %v1398_v43, %v576_v8  ;;  %v1400_v48 = vpop.f32.mrb[6].mxu1 }
 0x1b5   : > { %v1409_v45 = vmax.f32 %v1354_v39, 0.0  ;;  %v1358_v47 = vadd.f32 %v1357_v44, %v581_v10  ;;  %v1359_v49 = vpop.f32.mrb[7].mxu0  ;;  %v1411_v50 = vmax.f32 %v1397_v0, 0.0  ;;  %v1401_v52 = vadd.f32 %v1400_v48, %v581_v10  ;;  %v1402_v54 = vpop.f32.mrb[7].mxu1 }
 0x1b6   : > { %v1410_v51 = vmax.f32 %v1356_v42, 0.0  ;;  %v1360_v53 = vadd.f32 %v1359_v49, %v581_v10  ;;  %v1412_v55 = vmax.f32 %v1399_v46, 0.0  ;;  %v1403_v57 = vadd.f32 %v1402_v54, %v581_v10  ;;  %1483 = sbr.rel (!%p1841_p5) target bundleno = 453 (0x1c5), region = 59 }
 0x1b7   : > { %v1417_v56 = vmax.f32 %v1358_v47, 0.0  ;;  %v1419_v59 = vmax.f32 %v1401_v52, 0.0 }
 0x1b8   : > { %v1730_v58 = vpack.c.bf16 %v1410_v51, %v1409_v45  ;;  %v1418_v60 = vmax.f32 %v1360_v53, 0.0  ;;  %v1731_v61 = vpack.c.bf16 %v1412_v55, %v1411_v50  ;;  %v1420_v62 = vmax.f32 %v1403_v57, 0.0 }
 0x1ba   : > { %1471 = vst [vmem:[%s2272_s12 + $0x10] sm:$0xff] %v1730_v58  ;;  %v1734_v63 = vpack.c.bf16 %v1418_v60, %v1417_v56  ;;  %1472 = vst [vmem:[%s2272_s12 + $0x18] sm:$0xff] %v1731_v61  ;;  %v1735_v1 = vpack.c.bf16 %v1420_v62, %v1419_v59 }
 0x1bc   : > { %1475 = vst [vmem:[%s2272_s12 + $0x30] sm:$0xff] %v1734_v63  ;;  %1476 = vst [vmem:[%s2272_s12 + $0x38] sm:$0xff] %v1735_v1 }
 0x1c1   : > { %v1503_v4 = vld [vmem:[%s2272_s12 + $0x10] sm:$0xff]  ;;  %v1505_v5 = vld [vmem:[%s2272_s12 + $0x18] sm:$0xff] }
 0x1c2   : > { %1504 = vst [vmem:[%s1486_s23 + $0x10] sm:$0xff] %v1503_v4  ;;  %1506 = vst [vmem:[%s1486_s23 + $0x18] sm:$0xff] %v1505_v5 }
 0x1c3   : > { %v1511_v8 = vld [vmem:[%s2272_s12 + $0x30] sm:$0xff]  ;;  %v1513_v9 = vld [vmem:[%s2272_s12 + $0x38] sm:$0xff] }
 0x1c4   : > { %1512 = vst [vmem:[%s1486_s23 + $0x50] sm:$0xff] %v1511_v8  ;;  %1514 = vst [vmem:[%s1486_s23 + $0x58] sm:$0xff] %v1513_v9 }
 0x1c5 PF: > { %p10_p10 = scmp.ge.s32.totalorder %s1828_s16, 4   ;;  %s2312_s12 = smov %s1784_s13 }
 0x1c6   : > { %s2313_s13 = smov %s1839_s19  ;;  %s2314_s14 = smov %s1828_s16 }
 0x1c7   :  { %12 = sbr.rel (!%p10_p10) target bundleno = 2 (0x2), region = 113 }

// kernel: conv_head_forward.7
= control target key start
LH: loop header
LB: loop body
LE: loop exit
PB: predicated region body
PF: predicated region fallthrough
CT: control target
= control target key end

     0   :  { %v1487_v18 = vmov 0   ;;  %s1937_s1 = inlined_call_operand.vmem [shape: bf16[512,512], index: 1, kind: input, shape index: {}]   ;;  %s1938_s0 = inlined_call_operand.vmem [shape: bf16[24,512], index: 0, kind: input, shape index: {}]   ;;  %s1939_s2 = inlined_call_operand.vmem [shape: f32[24,1], index: 2, kind: input, shape index: {}]   ;;  %s1940_s3 = inlined_call_operand.vmem [shape: bf16[24,512], index: 3, kind: output, shape index: {}]  }
   0x1   :  { %v1285_v0 = vld [vmem:[%s1937_s1 + $0x4] ss:$16 sps:$4 sm:$0xff]   ;;  %v1287_v1 = vld [vmem:[%s1937_s1 + $0xc] ss:$16 sps:$4 sm:$0xff]   ;;  %v1289_v2 = vld [vmem:[%s1937_s1] ss:$16 sps:$4 sm:$0xff]   ;;  %1283 = vset.pattern.permute.xlu0 %v1487_v18  ;;  %1284 = vset.pattern.permute.xlu1 %v1487_v18 }
   0x2   :  { %840 = vmatprep.subr.bf16.mxu0 %v1285_v0  ;;  %v1290_v3 = vld [vmem:[%s1937_s1 + $0x8] ss:$16 sps:$4 sm:$0xff]   ;;  %942 = vmatprep.subr.bf16.mxu1 %v1287_v1  ;;  %v1291_v4 = vld [vmem:[%s1937_s1 + $0x24] ss:$16 sps:$4 sm:$0xff]   ;;  %v1293_v5 = vld [vmem:[%s1937_s1 + $0x2c] ss:$16 sps:$4 sm:$0xff]  }
   0x3   :  { %841 = vmatpush1.bf16.msra.mxu0 %v1289_v2  ;;  %943 = vmatpush1.bf16.msra.mxu1 %v1290_v3  ;;  %v1295_v6 = vld [vmem:[%s1937_s1 + $0x20] ss:$16 sps:$4 sm:$0xff]   ;;  %v1296_v7 = vld [vmem:[%s1937_s1 + $0x28] ss:$16 sps:$4 sm:$0xff]   ;;  %v1297_v8 = vld [vmem:[%s1937_s1 + $0x44] ss:$16 sps:$4 sm:$0xff]  }
   0x4   :  { %842 = vmatprep.subr.bf16.mxu0 %v1291_v4  ;;  %944 = vmatprep.subr.bf16.mxu1 %v1293_v5  ;;  %v1299_v9 = vld [vmem:[%s1937_s1 + $0x4c] ss:$16 sps:$4 sm:$0xff]   ;;  %v1301_v10 = vld [vmem:[%s1937_s1 + $0x40] ss:$16 sps:$4 sm:$0xff]   ;;  %v1302_v11 = vld [vmem:[%s1937_s1 + $0x48] ss:$16 sps:$4 sm:$0xff]  }
   0x5   :  { %v1303_v12 = vld [vmem:[%s1937_s1 + $0x64] ss:$16 sps:$4 sm:$0xff]   ;;  %v1305_v13 = vld [vmem:[%s1937_s1 + $0x6c] ss:$16 sps:$4 sm:$0xff]   ;;  %v1307_v14 = vld [vmem:[%s1937_s1 + $0x60] ss:$16 sps:$4 sm:$0xff]  }
   0x6   :  { %v1308_v15 = vld [vmem:[%s1937_s1 + $0x68] ss:$16 sps:$4 sm:$0xff]   ;;  %v1309_v16 = vld [vmem:[%s1937_s1 + $0x84] ss:$16 sps:$4 sm:$0xff]   ;;  %v1311_v17 = vld [vmem:[%s1937_s1 + $0x8c] ss:$16 sps:$4 sm:$0xff]  }
   0x7   :  { %843 = vmatpush1.bf16.msra.mxu0 %v1295_v6  ;;  %945 = vmatpush1.bf16.msra.mxu1 %v1296_v7  ;;  %v1313_v19 = vld [vmem:[%s1937_s1 + $0x80] ss:$16 sps:$4 sm:$0xff]   ;;  %v1314_v20 = vld [vmem:[%s1937_s1 + $0x88] ss:$16 sps:$4 sm:$0xff]   ;;  %v1315_v21 = vld [vmem:[%s1937_s1 + $0xa4] ss:$16 sps:$4 sm:$0xff]  }
   0x8   :  { %844 = vmatprep.subr.bf16.mxu0 %v1297_v8  ;;  %946 = vmatprep.subr.bf16.mxu1 %v1299_v9  ;;  %v1317_v22 = vld [vmem:[%s1937_s1 + $0xac] ss:$16 sps:$4 sm:$0xff]   ;;  %v1319_v23 = vld [vmem:[%s1937_s1 + $0xa0] ss:$16 sps:$4 sm:$0xff]   ;;  %v1320_v24 = vld [vmem:[%s1937_s1 + $0xa8] ss:$16 sps:$4 sm:$0xff]  }
   0x9   :  { %v1321_v25 = vld [vmem:[%s1937_s1 + $0xc4] ss:$16 sps:$4 sm:$0xff]   ;;  %v1323_v26 = vld [vmem:[%s1937_s1 + $0xcc] ss:$16 sps:$4 sm:$0xff]   ;;  %v1325_v27 = vld [vmem:[%s1937_s1 + $0xc0] ss:$16 sps:$4 sm:$0xff]  }
   0xa   :  { %v1326_v28 = vld [vmem:[%s1937_s1 + $0xc8] ss:$16 sps:$4 sm:$0xff]   ;;  %v1327_v29 = vld [vmem:[%s1937_s1 + $0xe4] ss:$16 sps:$4 sm:$0xff]   ;;  %v1329_v30 = vld [vmem:[%s1937_s1 + $0xec] ss:$16 sps:$4 sm:$0xff]  }
   0xb   :  { %845 = vmatpush1.bf16.msra.mxu0 %v1301_v10  ;;  %947 = vmatpush1.bf16.msra.mxu1 %v1302_v11  ;;  %v1331_v31 = vld [vmem:[%s1937_s1 + $0xe0] ss:$16 sps:$4 sm:$0xff]   ;;  %v1332_v32 = vld [vmem:[%s1937_s1 + $0xe8] ss:$16 sps:$4 sm:$0xff]   ;;  %v1333_v33 = vld [vmem:[%s1937_s1 + $0x104] ss:$16 sps:$4 sm:$0xff]  }
   0xc   :  { %846 = vmatprep.subr.bf16.mxu0 %v1303_v12  ;;  %948 = vmatprep.subr.bf16.mxu1 %v1305_v13  ;;  %v1335_v34 = vld [vmem:[%s1937_s1 + $0x10c] ss:$16 sps:$4 sm:$0xff]   ;;  %v1337_v35 = vld [vmem:[%s1937_s1 + $0x100] ss:$16 sps:$4 sm:$0xff]   ;;  %v1338_v36 = vld [vmem:[%s1937_s1 + $0x108] ss:$16 sps:$4 sm:$0xff]  }
   0xd   :  { %v1339_v37 = vld [vmem:[%s1937_s1 + $0x124] ss:$16 sps:$4 sm:$0xff]   ;;  %v1341_v38 = vld [vmem:[%s1937_s1 + $0x12c] ss:$16 sps:$4 sm:$0xff]   ;;  %v1343_v39 = vld [vmem:[%s1937_s1 + $0x120] ss:$16 sps:$4 sm:$0xff]  }
   0xe   :  { %v1344_v40 = vld [vmem:[%s1937_s1 + $0x128] ss:$16 sps:$4 sm:$0xff]   ;;  %v1345_v41 = vld [vmem:[%s1937_s1 + $0x144] ss:$16 sps:$4 sm:$0xff]   ;;  %v1347_v42 = vld [vmem:[%s1937_s1 + $0x14c] ss:$16 sps:$4 sm:$0xff]  }
   0xf   :  { %847 = vmatpush1.bf16.msra.mxu0 %v1307_v14  ;;  %949 = vmatpush1.bf16.msra.mxu1 %v1308_v15  ;;  %v1349_v43 = vld [vmem:[%s1937_s1 + $0x140] ss:$16 sps:$4 sm:$0xff]   ;;  %v1350_v44 = vld [vmem:[%s1937_s1 + $0x148] ss:$16 sps:$4 sm:$0xff]   ;;  %v1351_v45 = vld [vmem:[%s1937_s1 + $0x164] ss:$16 sps:$4 sm:$0xff]  }
  0x10   :  { %848 = vmatprep.subr.bf16.mxu0 %v1309_v16  ;;  %950 = vmatprep.subr.bf16.mxu1 %v1311_v17  ;;  %v1353_v46 = vld [vmem:[%s1937_s1 + $0x16c] ss:$16 sps:$4 sm:$0xff]   ;;  %v1355_v47 = vld [vmem:[%s1937_s1 + $0x160] ss:$16 sps:$4 sm:$0xff]   ;;  %v1356_v48 = vld [vmem:[%s1937_s1 + $0x168] ss:$16 sps:$4 sm:$0xff]  }
  0x11   :  { %v1383_v49 = vld [vmem:[%s1938_s0 + $0x4] ss:$16 sps:$4 sm:$0xff]   ;;  %v1359_v51 = vld [vmem:[%s1937_s1 + $0x18c] ss:$16 sps:$4 sm:$0xff]   ;;  %v1361_v52 = vld [vmem:[%s1937_s1 + $0x180] ss:$16 sps:$4 sm:$0xff]  }
  0x12   :  { %v1357_v50 = vld [vmem:[%s1937_s1 + $0x184] ss:$16 sps:$4 sm:$0xff]   ;;  %872 = vmatprep.mubr.bf16.mxu0 %v1383_v49  ;;  %974 = vmatprep.mubr.bf16.mxu1 %v1383_v49  ;;  %v1362_v53 = vld [vmem:[%s1937_s1 + $0x188] ss:$16 sps:$4 sm:$0xff]   ;;  %v1365_v55 = vld [vmem:[%s1937_s1 + $0x1ac] ss:$16 sps:$4 sm:$0xff]  }
  0x13   :  { %849 = vmatpush1.bf16.msra.mxu0 %v1313_v19  ;;  %951 = vmatpush1.bf16.msra.mxu1 %v1314_v20  ;;  %v1363_v54 = vld [vmem:[%s1937_s1 + $0x1a4] ss:$16 sps:$4 sm:$0xff]   ;;  %v1367_v56 = vld [vmem:[%s1937_s1 + $0x1a0] ss:$16 sps:$4 sm:$0xff]   ;;  %v1368_v57 = vld [vmem:[%s1937_s1 + $0x1a8] ss:$16 sps:$4 sm:$0xff]  }
  0x14   :  { %850 = vmatprep.subr.bf16.mxu0 %v1315_v21  ;;  %952 = vmatprep.subr.bf16.mxu1 %v1317_v22  ;;  %v1369_v58 = vld [vmem:[%s1937_s1 + $0x1c4] ss:$16 sps:$4 sm:$0xff]   ;;  %v1371_v59 = vld [vmem:[%s1937_s1 + $0x1cc] ss:$16 sps:$4 sm:$0xff]   ;;  %v1373_v60 = vld [vmem:[%s1937_s1 + $0x1c0] ss:$16 sps:$4 sm:$0xff]  }
  0x15   :  { %v1374_v61 = vld [vmem:[%s1937_s1 + $0x1c8] ss:$16 sps:$4 sm:$0xff]   ;;  %v1375_v62 = vld [vmem:[%s1937_s1 + $0x1e4] ss:$16 sps:$4 sm:$0xff]   ;;  %v1377_v63 = vld [vmem:[%s1937_s1 + $0x1ec] ss:$16 sps:$4 sm:$0xff]  }
  0x16   :  { %v1379_v0 = vld [vmem:[%s1937_s1 + $0x1e0] ss:$16 sps:$4 sm:$0xff]   ;;  %v1380_v1 = vld [vmem:[%s1937_s1 + $0x1e8] ss:$16 sps:$4 sm:$0xff]   ;;  %v1386_v2 = vld [vmem:[%s1937_s1 + $0x204] ss:$16 sps:$4 sm:$0xff]  }
  0x17   :  { %851 = vmatpush1.bf16.msra.mxu0 %v1319_v23  ;;  %953 = vmatpush1.bf16.msra.mxu1 %v1320_v24  ;;  %v1389_v3 = vld [vmem:[%s1937_s1 + $0x20c] ss:$16 sps:$4 sm:$0xff]   ;;  %v1381_v4 = vld [vmem:[%s1938_s0] ss:$16 sps:$4 sm:$0xff]   ;;  %v1387_v6 = vld [vmem:[%s1937_s1 + $0x208] ss:$16 sps:$4 sm:$0xff]  }
  0x18   :  { %852 = vmatprep.subr.bf16.mxu0 %v1321_v25  ;;  %954 = vmatprep.subr.bf16.mxu1 %v1323_v26  ;;  %v1384_v5 = vld [vmem:[%s1937_s1 + $0x200] ss:$16 sps:$4 sm:$0xff]   ;;  %v1392_v7 = vld [vmem:[%s1937_s1 + $0x224] ss:$16 sps:$4 sm:$0xff]   ;;  %v1395_v8 = vld [vmem:[%s1937_s1 + $0x22c] ss:$16 sps:$4 sm:$0xff]  }
  0x19   :  { %v1390_v9 = vld [vmem:[%s1937_s1 + $0x220] ss:$16 sps:$4 sm:$0xff]   ;;  %v1393_v10 = vld [vmem:[%s1937_s1 + $0x228] ss:$16 sps:$4 sm:$0xff]   ;;  %v1398_v11 = vld [vmem:[%s1937_s1 + $0x244] ss:$16 sps:$4 sm:$0xff]  }
  0x1a   :  { %v1401_v12 = vld [vmem:[%s1937_s1 + $0x24c] ss:$16 sps:$4 sm:$0xff]   ;;  %v1396_v13 = vld [vmem:[%s1937_s1 + $0x240] ss:$16 sps:$4 sm:$0xff]   ;;  %v1399_v14 = vld [vmem:[%s1937_s1 + $0x248] ss:$16 sps:$4 sm:$0xff]  }
  0x1b   :  { %853 = vmatpush1.bf16.msra.mxu0 %v1325_v27  ;;  %955 = vmatpush1.bf16.msra.mxu1 %v1326_v28  ;;  %v1404_v15 = vld [vmem:[%s1937_s1 + $0x264] ss:$16 sps:$4 sm:$0xff]   ;;  %v1407_v16 = vld [vmem:[%s1937_s1 + $0x26c] ss:$16 sps:$4 sm:$0xff]   ;;  %v1402_v17 = vld [vmem:[%s1937_s1 + $0x260] ss:$16 sps:$4 sm:$0xff]  }
  0x1c   :  { %854 = vmatprep.subr.bf16.mxu0 %v1327_v29  ;;  %956 = vmatprep.subr.bf16.mxu1 %v1329_v30  ;;  %v1405_v18 = vld [vmem:[%s1937_s1 + $0x268] ss:$16 sps:$4 sm:$0xff]   ;;  %v1410_v19 = vld [vmem:[%s1937_s1 + $0x284] ss:$16 sps:$4 sm:$0xff]   ;;  %v1413_v20 = vld [vmem:[%s1937_s1 + $0x28c] ss:$16 sps:$4 sm:$0xff]  }
  0x1d   :  { %v1408_v21 = vld [vmem:[%s1937_s1 + $0x280] ss:$16 sps:$4 sm:$0xff]   ;;  %v1411_v22 = vld [vmem:[%s1937_s1 + $0x288] ss:$16 sps:$4 sm:$0xff]   ;;  %v1416_v23 = vld [vmem:[%s1937_s1 + $0x2a4] ss:$16 sps:$4 sm:$0xff]  }
  0x1e   :  { %v1419_v24 = vld [vmem:[%s1937_s1 + $0x2ac] ss:$16 sps:$4 sm:$0xff]   ;;  %v18_v25 = vld [vmem:[%s1938_s0 + $0x20] sm:$0xff]  ;;  %v1417_v29 = vld [vmem:[%s1937_s1 + $0x2a8] ss:$16 sps:$4 sm:$0xff]  }
  0x1f   :  { %855 = vmatpush1.bf16.msra.mxu0 %v1331_v31  ;;  %957 = vmatpush1.bf16.msra.mxu1 %v1332_v32  ;;  %v1111_v26 = vcombine.high %v18_v25, %v18_v25  ;;  %v1414_v27 = vld [vmem:[%s1937_s1 + $0x2a0] ss:$16 sps:$4 sm:$0xff]   ;;  %v1110_v28 = vcombine.low %v18_v25, %v18_v25  ;;  %v1422_v30 = vld [vmem:[%s1937_s1 + $0x2c4] ss:$16 sps:$4 sm:$0xff]   ;;  %v1425_v31 = vld [vmem:[%s1937_s1 + $0x2cc] ss:$16 sps:$4 sm:$0xff]  }
  0x20   :  { %856 = vmatprep.subr.bf16.mxu0 %v1333_v33  ;;  %958 = vmatprep.subr.bf16.mxu1 %v1335_v34  ;;  %v1420_v32 = vld [vmem:[%s1937_s1 + $0x2c0] ss:$16 sps:$4 sm:$0xff]   ;;  %v1423_v33 = vld [vmem:[%s1937_s1 + $0x2c8] ss:$16 sps:$4 sm:$0xff]   ;;  %v1484_v34 = vld [vmem:[%s1938_s0 + $0xc] ss:$16 sps:$4 sm:$0xff]  }
  0x21   :  { %v1441_v49 = vld [vmem:[%s1937_s1 + $0x328] ss:$16 sps:$4 sm:$0xff]  }
  0x23   :  { %857 = vmatpush1.bf16.msra.mxu0 %v1337_v35  ;;  %959 = vmatpush1.bf16.msra.mxu1 %v1338_v36  ;;  %v148_v35 = vld [vmem:[%s1939_s2] sm:$0xff] }
  0x24   :  { %858 = vmatprep.subr.bf16.mxu0 %v1339_v37  ;;  %960 = vmatprep.subr.bf16.mxu1 %v1341_v38  ;;  %v1428_v36 = vld [vmem:[%s1937_s1 + $0x2e4] ss:$16 sps:$4 sm:$0xff]   ;;  %v1431_v37 = vld [vmem:[%s1937_s1 + $0x2ec] ss:$16 sps:$4 sm:$0xff]  }
  0x25   :  { %v150_v38 = vld [vmem:[%s1939_s2 + $0x10] sm:$0xff]  ;;  %153 = vperm.xlu0 %1283, %v148_v35  }
  0x26   :  { %163 = vperm.xlu1 %1284, %v150_v38  }
  0x27   :  { %859 = vmatpush1.bf16.msra.mxu0 %v1343_v39  ;;  %961 = vmatpush1.bf16.msra.mxu1 %v1344_v40  ;;  %v1426_v39 = vld [vmem:[%s1937_s1 + $0x2e0] ss:$16 sps:$4 sm:$0xff]   ;;  %v1429_v40 = vld [vmem:[%s1937_s1 + $0x2e8] ss:$16 sps:$4 sm:$0xff]  }
  0x28   :  { %860 = vmatprep.subr.bf16.mxu0 %v1345_v41  ;;  %962 = vmatprep.subr.bf16.mxu1 %v1347_v42  ;;  %v149_v41 = vld [vmem:[%s1939_s2 + $0x8] sm:$0xff]  ;;  %v1434_v42 = vld [vmem:[%s1937_s1 + $0x304] ss:$16 sps:$4 sm:$0xff]  }
  0x29   :  { %158 = vperm.xlu0 %1283, %v149_v41  }
  0x2b   :  { %861 = vmatpush1.bf16.msra.mxu0 %v1349_v43  ;;  %963 = vmatpush1.bf16.msra.mxu1 %v1350_v44  ;;  %v1437_v43 = vld [vmem:[%s1937_s1 + $0x30c] ss:$16 sps:$4 sm:$0xff]   ;;  %v1432_v44 = vld [vmem:[%s1937_s1 + $0x300] ss:$16 sps:$4 sm:$0xff]  }
  0x2c   :  { %862 = vmatprep.subr.bf16.mxu0 %v1351_v45  ;;  %964 = vmatprep.subr.bf16.mxu1 %v1353_v46  ;;  %v1435_v45 = vld [vmem:[%s1937_s1 + $0x308] ss:$16 sps:$4 sm:$0xff]   ;;  %v1440_v46 = vld [vmem:[%s1937_s1 + $0x324] ss:$16 sps:$4 sm:$0xff]  }
  0x2f   :  { %863 = vmatpush1.bf16.msra.mxu0 %v1355_v47  ;;  %965 = vmatpush1.bf16.msra.mxu1 %v1356_v48  ;;  %v1443_v47 = vld [vmem:[%s1937_s1 + $0x32c] ss:$16 sps:$4 sm:$0xff]   ;;  %v1438_v48 = vld [vmem:[%s1937_s1 + $0x320] ss:$16 sps:$4 sm:$0xff]  }
  0x30   :  { %864 = vmatprep.subr.bf16.mxu0 %v1357_v50  ;;  %966 = vmatprep.subr.bf16.mxu1 %v1359_v51  ;;  %v1446_v50 = vld [vmem:[%s1937_s1 + $0x344] ss:$16 sps:$4 sm:$0xff]   ;;  %v1449_v51 = vld [vmem:[%s1937_s1 + $0x34c] ss:$16 sps:$4 sm:$0xff]  }
  0x33   :  { %865 = vmatpush1.bf16.msra.mxu0 %v1361_v52  ;;  %967 = vmatpush1.bf16.msra.mxu1 %v1362_v53  ;;  %v1444_v52 = vld [vmem:[%s1937_s1 + $0x340] ss:$16 sps:$4 sm:$0xff]   ;;  %v1447_v53 = vld [vmem:[%s1937_s1 + $0x348] ss:$16 sps:$4 sm:$0xff]  }
  0x34   :  { %866 = vmatprep.subr.bf16.mxu0 %v1363_v54  ;;  %968 = vmatprep.subr.bf16.mxu1 %v1365_v55  ;;  %v1452_v54 = vld [vmem:[%s1937_s1 + $0x364] ss:$16 sps:$4 sm:$0xff]   ;;  %v1455_v55 = vld [vmem:[%s1937_s1 + $0x36c] ss:$16 sps:$4 sm:$0xff]  }
  0x37   :  { %867 = vmatpush1.bf16.msra.mxu0 %v1367_v56  ;;  %969 = vmatpush1.bf16.msra.mxu1 %v1368_v57  ;;  %v1450_v56 = vld [vmem:[%s1937_s1 + $0x360] ss:$16 sps:$4 sm:$0xff]   ;;  %v1453_v57 = vld [vmem:[%s1937_s1 + $0x368] ss:$16 sps:$4 sm:$0xff]  }
  0x38   :  { %868 = vmatprep.subr.bf16.mxu0 %v1369_v58  ;;  %970 = vmatprep.subr.bf16.mxu1 %v1371_v59  ;;  %v1458_v58 = vld [vmem:[%s1937_s1 + $0x384] ss:$16 sps:$4 sm:$0xff]   ;;  %v1461_v59 = vld [vmem:[%s1937_s1 + $0x38c] ss:$16 sps:$4 sm:$0xff]  }
  0x3b   :  { %869 = vmatpush1.bf16.msra.mxu0 %v1373_v60  ;;  %971 = vmatpush1.bf16.msra.mxu1 %v1374_v61  ;;  %v1456_v60 = vld [vmem:[%s1937_s1 + $0x380] ss:$16 sps:$4 sm:$0xff]   ;;  %v1459_v61 = vld [vmem:[%s1937_s1 + $0x388] ss:$16 sps:$4 sm:$0xff]  }
  0x3c   :  { %870 = vmatprep.subr.bf16.mxu0 %v1375_v62  ;;  %972 = vmatprep.subr.bf16.mxu1 %v1377_v63  ;;  %v1464_v62 = vld [vmem:[%s1937_s1 + $0x3a4] ss:$16 sps:$4 sm:$0xff]   ;;  %v1467_v63 = vld [vmem:[%s1937_s1 + $0x3ac] ss:$16 sps:$4 sm:$0xff]  }
  0x3f   :  { %871 = vmatpush1.bf16.msra.mxu0 %v1379_v0  ;;  %973 = vmatpush1.bf16.msra.mxu1 %v1380_v1  ;;  %v1462_v0 = vld [vmem:[%s1937_s1 + $0x3a0] ss:$16 sps:$4 sm:$0xff]   ;;  %v1465_v1 = vld [vmem:[%s1937_s1 + $0x3a8] ss:$16 sps:$4 sm:$0xff]  }
  0x40   :  { %891 = vmatprep.subr.bf16.mxu0 %v1386_v2  ;;  %993 = vmatprep.subr.bf16.mxu1 %v1389_v3  ;;  %v1472_v2 = vld [vmem:[%s1937_s1 + $0x3c4] ss:$16 sps:$4 sm:$0xff]   ;;  %v1475_v3 = vld [vmem:[%s1937_s1 + $0x3cc] ss:$16 sps:$4 sm:$0xff]  }
  0x42   :  { %873 = vmatmul.mubr.bf16.vlgmr.msra.gmra.mrb[0].mxu0 %v1381_v4  ;;  %975 = vmatmul.mubr.bf16.vlgmr.msra.gmra.mrb[0].mxu1 %v1381_v4  ;;  %v1470_v4 = vld [vmem:[%s1937_s1 + $0x3c0] ss:$16 sps:$4 sm:$0xff]  }
  0x43   :  { %892 = vmatpush1.bf16.msra.mxu0 %v1384_v5  ;;  %994 = vmatpush1.bf16.msra.mxu1 %v1387_v6  ;;  %v1473_v5 = vld [vmem:[%s1937_s1 + $0x3c8] ss:$16 sps:$4 sm:$0xff]   ;;  %v1478_v6 = vld [vmem:[%s1937_s1 + $0x3e4] ss:$16 sps:$4 sm:$0xff]  }
  0x44   :  { %893 = vmatprep.subr.bf16.mxu0 %v1392_v7  ;;  %995 = vmatprep.subr.bf16.mxu1 %v1395_v8  ;;  %v1481_v7 = vld [vmem:[%s1937_s1 + $0x3ec] ss:$16 sps:$4 sm:$0xff]   ;;  %v1476_v8 = vld [vmem:[%s1937_s1 + $0x3e0] ss:$16 sps:$4 sm:$0xff]  }
  0x45   :  { %882 = vmatprep.mubr.bf16.mxu0 %v1111_v26  ;;  %984 = vmatprep.mubr.bf16.mxu1 %v1111_v26 }
  0x47   :  { %894 = vmatpush1.bf16.msra.mxu0 %v1390_v9  ;;  %996 = vmatpush1.bf16.msra.mxu1 %v1393_v10  ;;  %v1479_v9 = vld [vmem:[%s1937_s1 + $0x3e8] ss:$16 sps:$4 sm:$0xff]  }
  0x48   :  { %895 = vmatprep.subr.bf16.mxu0 %v1398_v11  ;;  %997 = vmatprep.subr.bf16.mxu1 %v1401_v12  ;;  %v19_v10 = vld [vmem:[%s1938_s0 + $0x28] sm:$0xff] }
  0x49   :  { %v1482_v11 = vld [vmem:[%s1938_s0 + $0x8] ss:$16 sps:$4 sm:$0xff]   ;;  %v1113_v12 = vcombine.high %v19_v10, %v19_v10 }
  0x4a   :  { %883 = vmatmul.mubr.bf16.gmra.mrb[4].mxu0 %v1110_v28  ;;  %985 = vmatmul.mubr.bf16.gmra.mrb[4].mxu1 %v1110_v28 }
  0x4b   :  { %896 = vmatpush1.bf16.msra.mxu0 %v1396_v13  ;;  %998 = vmatpush1.bf16.msra.mxu1 %v1399_v14  ;;  %v1112_v13 = vcombine.low %v19_v10, %v19_v10 }
  0x4c   :  { %897 = vmatprep.subr.bf16.mxu0 %v1404_v15  ;;  %999 = vmatprep.subr.bf16.mxu1 %v1407_v16 }
  0x4d   :  { %923 = vmatprep.mubr.bf16.mxu0 %v1484_v34  ;;  %1025 = vmatprep.mubr.bf16.mxu1 %v1484_v34 }
  0x4f   :  { %898 = vmatpush1.bf16.msra.mxu0 %v1402_v17  ;;  %1000 = vmatpush1.bf16.msra.mxu1 %v1405_v18 }
  0x50   :  { %899 = vmatprep.subr.bf16.mxu0 %v1410_v19  ;;  %1001 = vmatprep.subr.bf16.mxu1 %v1413_v20 }
  0x53   :  { %900 = vmatpush1.bf16.msra.mxu0 %v1408_v21  ;;  %1002 = vmatpush1.bf16.msra.mxu1 %v1411_v22 }
  0x54   :  { %901 = vmatprep.subr.bf16.mxu0 %v1416_v23  ;;  %1003 = vmatprep.subr.bf16.mxu1 %v1419_v24 }
  0x57   :  { %902 = vmatpush1.bf16.msra.mxu0 %v1414_v27  ;;  %1004 = vmatpush1.bf16.msra.mxu1 %v1417_v29 }
  0x58   :  { %903 = vmatprep.subr.bf16.mxu0 %v1422_v30  ;;  %1005 = vmatprep.subr.bf16.mxu1 %v1425_v31 }
  0x5b   :  { %904 = vmatpush1.bf16.msra.mxu0 %v1420_v32  ;;  %1006 = vmatpush1.bf16.msra.mxu1 %v1423_v33 }
  0x5c   :  { %905 = vmatprep.subr.bf16.mxu0 %v1428_v36  ;;  %1007 = vmatprep.subr.bf16.mxu1 %v1431_v37 }
  0x5f   :  { %906 = vmatpush1.bf16.msra.mxu0 %v1426_v39  ;;  %1008 = vmatpush1.bf16.msra.mxu1 %v1429_v40 }
  0x60   :  { %907 = vmatprep.subr.bf16.mxu0 %v1434_v42  ;;  %1009 = vmatprep.subr.bf16.mxu1 %v1437_v43 }
  0x63   :  { %908 = vmatpush1.bf16.msra.mxu0 %v1432_v44  ;;  %1010 = vmatpush1.bf16.msra.mxu1 %v1435_v45 }
  0x64   :  { %909 = vmatprep.subr.bf16.mxu0 %v1440_v46  ;;  %1011 = vmatprep.subr.bf16.mxu1 %v1443_v47 }
  0x67   :  { %910 = vmatpush1.bf16.msra.mxu0 %v1438_v48  ;;  %1012 = vmatpush1.bf16.msra.mxu1 %v1441_v49 }
  0x68   :  { %911 = vmatprep.subr.bf16.mxu0 %v1446_v50  ;;  %1013 = vmatprep.subr.bf16.mxu1 %v1449_v51 }
  0x6b   :  { %912 = vmatpush1.bf16.msra.mxu0 %v1444_v52  ;;  %1014 = vmatpush1.bf16.msra.mxu1 %v1447_v53 }
  0x6c   :  { %913 = vmatprep.subr.bf16.mxu0 %v1452_v54  ;;  %1015 = vmatprep.subr.bf16.mxu1 %v1455_v55 }
  0x6f   :  { %914 = vmatpush1.bf16.msra.mxu0 %v1450_v56  ;;  %1016 = vmatpush1.bf16.msra.mxu1 %v1453_v57 }
  0x70   :  { %915 = vmatprep.subr.bf16.mxu0 %v1458_v58  ;;  %1017 = vmatprep.subr.bf16.mxu1 %v1461_v59 }
  0x73   :  { %916 = vmatpush1.bf16.msra.mxu0 %v1456_v60  ;;  %1018 = vmatpush1.bf16.msra.mxu1 %v1459_v61 }
  0x74   :  { %917 = vmatprep.subr.bf16.mxu0 %v1464_v62  ;;  %1019 = vmatprep.subr.bf16.mxu1 %v1467_v63 }
  0x77   :  { %918 = vmatpush1.bf16.msra.mxu0 %v1462_v0  ;;  %1020 = vmatpush1.bf16.msra.mxu1 %v1465_v1 }
  0x78   :  { %919 = vmatprep.subr.bf16.mxu0 %v1472_v2  ;;  %1021 = vmatprep.subr.bf16.mxu1 %v1475_v3 }
  0x7b   :  { %920 = vmatpush1.bf16.msra.mxu0 %v1470_v4  ;;  %1022 = vmatpush1.bf16.msra.mxu1 %v1473_v5 }
  0x7c   :  { %921 = vmatprep.subr.bf16.mxu0 %v1478_v6  ;;  %1023 = vmatprep.subr.bf16.mxu1 %v1481_v7 }
  0x7f   :  { %922 = vmatpush1.bf16.msra.mxu0 %v1476_v8  ;;  %1024 = vmatpush1.bf16.msra.mxu1 %v1479_v9 }
  0x82   :  { %924 = vmatmul.mubr.bf16.vlgmr.msra.gmra.mrb[0].mxu0 %v1482_v11  ;;  %1026 = vmatmul.mubr.bf16.vlgmr.msra.gmra.mrb[0].mxu1 %v1482_v11 }
  0x83   :  { %933 = vmatprep.mubr.bf16.mxu0 %v1113_v12  ;;  %1035 = vmatprep.mubr.bf16.mxu1 %v1113_v12 }
  0x8a   :  { %934 = vmatmul.mubr.bf16.gmra.mrb[4].mxu0 %v1112_v13  ;;  %1036 = vmatmul.mubr.bf16.gmra.mrb[4].mxu1 %v1112_v13 }
  0xa4   :  { %v154_v14 = vpop.permute.xlu0 %153 }
  0xa5   :  { %v164_v42 = vpop.permute.xlu1 %163 }
  0xa8   :  { %v159_v15 = vpop.permute.xlu0 %158 }
 0x155   :  { %v925_v16 = vpop.f32.mrb[0].mxu0  ;;  %v1027_v17 = vpop.f32.mrb[0].mxu1 }
 0x156   :  { %v1254_v18 = vadd.f32 %v925_v16, %v154_v14  ;;  %v1260_v19 = vadd.f32 %v1027_v17, %v154_v14  ;;  %v927_v20 = vpop.f32.mrb[1].mxu0  ;;  %v1029_v21 = vpop.f32.mrb[1].mxu1 }
 0x157   :  { %v1255_v22 = vadd.f32 %v927_v20, %v154_v14  ;;  %v1261_v23 = vadd.f32 %v1029_v21, %v154_v14  ;;  %v929_v24 = vpop.f32.mrb[2].mxu0  ;;  %v1031_v25 = vpop.f32.mrb[2].mxu1 }
 0x158   :  { %v1044_v26 = vmax.f32 %v1254_v18, 0.0  ;;  %v1046_v27 = vmax.f32 %v1260_v19, 0.0  ;;  %v1256_v28 = vadd.f32 %v929_v24, %v159_v15  ;;  %v1262_v29 = vadd.f32 %v1031_v25, %v159_v15  ;;  %v931_v30 = vpop.f32.mrb[3].mxu0  ;;  %v1033_v31 = vpop.f32.mrb[3].mxu1 }
 0x159   :  { %v1045_v32 = vmax.f32 %v1255_v22, 0.0  ;;  %v1047_v33 = vmax.f32 %v1261_v23, 0.0  ;;  %v1257_v34 = vadd.f32 %v931_v30, %v159_v15  ;;  %v1263_v35 = vadd.f32 %v1033_v31, %v159_v15 }
 0x15a   :  { %v1048_v36 = vmax.f32 %v1256_v28, 0.0  ;;  %v1050_v37 = vmax.f32 %v1262_v29, 0.0 }
 0x15b   :  { %v1248_v38 = vpack.c.bf16 %v1045_v32, %v1044_v26  ;;  %v1249_v39 = vpack.c.bf16 %v1047_v33, %v1046_v27  ;;  %v1049_v40 = vmax.f32 %v1257_v34, 0.0  ;;  %v1051_v41 = vmax.f32 %v1263_v35, 0.0 }
 0x15d   :  { %1096 = vst [vmem:[%s1940_s3] sm:$0xff] %v1248_v38  ;;  %1097 = vst [vmem:[%s1940_s3 + $0x8] sm:$0xff] %v1249_v39  ;;  %v1250_v43 = vpack.c.bf16 %v1049_v40, %v1048_v36  ;;  %v1251_v44 = vpack.c.bf16 %v1051_v41, %v1050_v37  ;;  %v935_v45 = vpop.f32.mrb[4].mxu0  ;;  %v1037_v46 = vpop.f32.mrb[4].mxu1 }
 0x15e   :  { %v1258_v47 = vadd.f32 %v935_v45, %v164_v42  ;;  %v1264_v48 = vadd.f32 %v1037_v46, %v164_v42  ;;  %v937_v49 = vpop.f32.mrb[5].mxu0  ;;  %v1039_v50 = vpop.f32.mrb[5].mxu1 }
 0x15f   :  { %1098 = vst [vmem:[%s1940_s3 + $0x10] sm:$0xff] %v1250_v43  ;;  %1099 = vst [vmem:[%s1940_s3 + $0x18] sm:$0xff] %v1251_v44  ;;  %v1259_v51 = vadd.f32 %v937_v49, %v164_v42  ;;  %v1265_v52 = vadd.f32 %v1039_v50, %v164_v42  ;;  %v939_v53 = vpop.f32.mrb[6].mxu0  ;;  %v1041_v54 = vpop.f32.mrb[6].mxu1 }
 0x160   :  { %v1052_v55 = vmax.f32 %v1258_v47, 0.0  ;;  %v1054_v56 = vmax.f32 %v1264_v48, 0.0  ;;  %v940_v57 = vpop.f32.mrb[7].mxu0  ;;  %v1042_v58 = vpop.f32.mrb[7].mxu1 }
 0x161   :  { %v1053_v59 = vmax.f32 %v1259_v51, 0.0  ;;  %v1055_v60 = vmax.f32 %v1265_v52, 0.0 }
 0x163   :  { %v1252_v61 = vpack.c.bf16 %v1053_v59, %v1052_v55  ;;  %v1253_v62 = vpack.c.bf16 %v1055_v60, %v1054_v56 }
 0x165   :  { %1100 = vst [vmem:[%s1940_s3 + $0x20] sm:$0xff] %v1252_v61  ;;  %1101 = vst [vmem:[%s1940_s3 + $0x28] sm:$0xff] %v1253_v62 }

// kernel: conv_head_forward.8
= control target key start
LH: loop header
LB: loop body
LE: loop exit
PB: predicated region body
PF: predicated region fallthrough
CT: control target
= control target key end

     0   :  { %v916_v1 = vmov 0   ;;  %v917_v35 = vmov 0.0   ;;  %vm918_vm0 = vmmov 0   ;;  %s1144_s1 = inlined_call_operand.vmem [shape: bf16[640,128], index: 1, kind: input, shape index: {}]   ;;  %s1145_s0 = inlined_call_operand.vmem [shape: bf16[36,640], index: 0, kind: input, shape index: {}]   ;;  %s1146_s2 = inlined_call_operand.vmem [shape: f32[36,1], index: 2, kind: input, shape index: {}]   ;;  %s1147_s3 = inlined_call_operand.vmem [shape: bf16[36,128], index: 3, kind: output, shape index: {}]  }
   0x1   :  { %v857_v0 = vld [vmem:[%s1144_s1 + $0x40] sm:$0xff]   ;;  %855 = vset.pattern.permute.xlu0 %v916_v1  ;;  %856 = vset.pattern.permute.xlu1 %v916_v1  ;;  %v861_v5 = vld [vmem:[%s1144_s1 + $0x48] sm:$0xff]   ;;  %v865_v9 = vld [vmem:[%s1144_s1 + $0x50] sm:$0xff]  }
   0x2   :  { %v858_v2 = vld [vmem:[%s1144_s1 + $0xc0] sm:$0xff]   ;;  %729 = vmatprep.subr.bf16.mxu0 %v857_v0  ;;  %v862_v6 = vld [vmem:[%s1144_s1 + $0xc8] sm:$0xff]   ;;  %v866_v10 = vld [vmem:[%s1144_s1 + $0xd0] sm:$0xff]  }
   0x3   :  { %v859_v3 = vld [vmem:[%s1144_s1] sm:$0xff]   ;;  %763 = vmatprep.subr.bf16.mxu1 %v858_v2  ;;  %v863_v7 = vld [vmem:[%s1144_s1 + $0x8] sm:$0xff]   ;;  %v867_v11 = vld [vmem:[%s1144_s1 + $0x10] sm:$0xff]  }
   0x4   :  { %v860_v4 = vld [vmem:[%s1144_s1 + $0x80] sm:$0xff]   ;;  %730 = vmatpush3.bf16.msra.mxu0 %v859_v3  ;;  %v864_v8 = vld [vmem:[%s1144_s1 + $0x88] sm:$0xff]   ;;  %v868_v12 = vld [vmem:[%s1144_s1 + $0x90] sm:$0xff]  }
   0x5   :  { %764 = vmatpush3.bf16.msra.mxu1 %v860_v4  ;;  %731 = vmatprep.subr.bf16.mxu0 %v861_v5  ;;  %v869_v13 = vld [vmem:[%s1144_s1 + $0x58] sm:$0xff]   ;;  %v873_v17 = vld [vmem:[%s1144_s1 + $0x60] sm:$0xff]   ;;  %v877_v21 = vld [vmem:[%s1144_s1 + $0x68] sm:$0xff]  }
   0x6   :  { %765 = vmatprep.subr.bf16.mxu1 %v862_v6  ;;  %v870_v14 = vld [vmem:[%s1144_s1 + $0xd8] sm:$0xff]   ;;  %v874_v18 = vld [vmem:[%s1144_s1 + $0xe0] sm:$0xff]   ;;  %v878_v22 = vld [vmem:[%s1144_s1 + $0xe8] sm:$0xff]  }
   0x7   :  { %v871_v15 = vld [vmem:[%s1144_s1 + $0x18] sm:$0xff]   ;;  %v875_v19 = vld [vmem:[%s1144_s1 + $0x20] sm:$0xff]   ;;  %v879_v23 = vld [vmem:[%s1144_s1 + $0x28] sm:$0xff]  }
   0x8   :  { %732 = vmatpush3.bf16.msra.mxu0 %v863_v7  ;;  %v872_v16 = vld [vmem:[%s1144_s1 + $0x98] sm:$0xff]   ;;  %v876_v20 = vld [vmem:[%s1144_s1 + $0xa0] sm:$0xff]   ;;  %v880_v24 = vld [vmem:[%s1144_s1 + $0xa8] sm:$0xff]  }
   0x9   :  { %766 = vmatpush3.bf16.msra.mxu1 %v864_v8  ;;  %733 = vmatprep.subr.bf16.mxu0 %v865_v9  ;;  %v881_v25 = vld [vmem:[%s1144_s1 + $0x70] sm:$0xff]   ;;  %v885_v29 = vld [vmem:[%s1144_s1 + $0x78] sm:$0xff]   ;;  %v894_v37 = vld [vmem:[%s1145_s0 + $0xc] ss:$20 sps:$4 sm:$0xff]  }
   0xa   :  { %767 = vmatprep.subr.bf16.mxu1 %v866_v10  ;;  %v882_v26 = vld [vmem:[%s1144_s1 + $0xf0] sm:$0xff]   ;;  %v886_v30 = vld [vmem:[%s1144_s1 + $0xf8] sm:$0xff]   ;;  %v895_v38 = vld [vmem:[%s1144_s1 + $0x100] sm:$0xff]   ;;  %538 = vmatprep.mubr.bf16.mxu1 %v894_v37 }
   0xb   :  { %v883_v27 = vld [vmem:[%s1144_s1 + $0x30] sm:$0xff]   ;;  %v887_v31 = vld [vmem:[%s1144_s1 + $0x38] sm:$0xff]   ;;  %v896_v39 = vld [vmem:[%s1144_s1 + $0x108] sm:$0xff]  }
   0xc   :  { %734 = vmatpush3.bf16.msra.mxu0 %v867_v11  ;;  %v884_v28 = vld [vmem:[%s1144_s1 + $0xb0] sm:$0xff]   ;;  %v888_v32 = vld [vmem:[%s1144_s1 + $0xb8] sm:$0xff]   ;;  %v898_v40 = vld [vmem:[%s1145_s0 + $0x2c] ss:$20 sps:$4 sm:$0xff]  }
   0xd   :  { %768 = vmatpush3.bf16.msra.mxu1 %v868_v12  ;;  %735 = vmatprep.subr.bf16.mxu0 %v869_v13  ;;  %v889_v33 = vld [vmem:[%s1145_s0] ss:$20 sps:$4 sm:$0xff]   ;;  %v891_v34 = vld [vmem:[%s1145_s0 + $0x4] ss:$20 sps:$4 sm:$0xff]   ;;  %v892_v36 = vld [vmem:[%s1145_s0 + $0x8] ss:$20 sps:$4 sm:$0xff]  }
   0xe   :  { %769 = vmatprep.subr.bf16.mxu1 %v870_v14  ;;  %482 = vmatprep.mubr.bf16.mxu0 %v891_v34  ;;  %v897_v41 = vld [vmem:[%s1144_s1 + $0x110] sm:$0xff]   ;;  %v900_v43 = vld [vmem:[%s1145_s0 + $0x28] ss:$20 sps:$4 sm:$0xff]   ;;  %v110_v51 = vld [vmem:[%s1146_s2] sm:$0xff] }
   0xf   :  { %v901_v42 = vld [vmem:[%s1145_s0 + $0x34] ss:$20 sps:$4 sm:$0xff]   ;;  %v903_v44 = vld [vmem:[%s1145_s0 + $0x30] ss:$20 sps:$4 sm:$0xff]   ;;  %v28_v46 = vld [vmem:[%s1145_s0 + $0x58] sm:$0x33]  ;;  %117 = vperm.xlu0 %855, %v110_v51  }
  0x10   :  { %736 = vmatpush3.bf16.msra.mxu0 %v871_v15  ;;  %v27_v45 = vld [vmem:[%s1145_s0 + $0x50] sm:$0x33]  ;;  %v666_v48 = vcombine.high %v28_v46, %v28_v46  ;;  %v904_v49 = vld [vmem:[%s1144_s1 + $0x118] sm:$0xff]   ;;  %v905_v52 = vld [vmem:[%s1144_s1 + $0x120] sm:$0xff]   ;;  %v665_v53 = vcombine.low %v28_v46, %v28_v46 }
  0x11   :  { %770 = vmatpush3.bf16.msra.mxu1 %v872_v16  ;;  %737 = vmatprep.subr.bf16.mxu0 %v873_v17  ;;  %v664_v47 = vcombine.high %v27_v45, %v27_v45  ;;  %v663_v50 = vcombine.low %v27_v45, %v27_v45  ;;  %v112_v54 = vld [vmem:[%s1146_s2 + $0x10] sm:$0xff]  ;;  %v910_v55 = vld [vmem:[%s1144_s1 + $0x128] sm:$0xff]   ;;  %v113_v57 = vld [vmem:[%s1146_s2 + $0x18] sm:$0xff] }
  0x12   :  { %771 = vmatprep.subr.bf16.mxu1 %v874_v18  ;;  %127 = vperm.xlu1 %856, %v112_v54   ;;  %v111_v56 = vld [vmem:[%s1146_s2 + $0x8] sm:$0xff]  ;;  %v911_v58 = vld [vmem:[%s1144_s1 + $0x130] sm:$0xff]   ;;  %v114_v59 = vld [vmem:[%s1146_s2 + $0x20] sm:$0xf] }
  0x13   :  { %122 = vperm.xlu0 %855, %v111_v56   ;;  %v912_v60 = vld [vmem:[%s1144_s1 + $0x138] sm:$0xff]   ;;  %v913_v61 = vld [vmem:[%s1145_s0 + $0x10] ss:$20 sps:$4 sm:$0xff]   ;;  %v915_v63 = vld [vmem:[%s1145_s0 + $0x60] ss:$0 sps:$4 sm:$0x33]  }
  0x14   :  { %738 = vmatpush3.bf16.msra.mxu0 %v875_v19  ;;  %v914_v62 = vld [vmem:[%s1145_s0 + $0x38] ss:$20 sps:$4 sm:$0xff]  }
  0x15   :  { %772 = vmatpush3.bf16.msra.mxu1 %v876_v20  ;;  %739 = vmatprep.subr.bf16.mxu0 %v877_v21 }
  0x16   :  { %773 = vmatprep.subr.bf16.mxu1 %v878_v22  ;;  %132 = vperm.xlu1 %856, %v113_v57  }
  0x17   :  { %137 = vperm.xlu0 %855, %v114_v59  }
  0x18   :  { %740 = vmatpush3.bf16.msra.mxu0 %v879_v23 }
  0x19   :  { %774 = vmatpush3.bf16.msra.mxu1 %v880_v24  ;;  %741 = vmatprep.subr.bf16.mxu0 %v881_v25 }
  0x1a   :  { %775 = vmatprep.subr.bf16.mxu1 %v882_v26 }
  0x1c   :  { %742 = vmatpush3.bf16.msra.mxu0 %v883_v27 }
  0x1d   :  { %776 = vmatpush3.bf16.msra.mxu1 %v884_v28  ;;  %743 = vmatprep.subr.bf16.mxu0 %v885_v29 }
  0x1e   :  { %777 = vmatprep.subr.bf16.mxu1 %v886_v30 }
  0x20   :  { %744 = vmatpush3.bf16.msra.mxu0 %v887_v31 }
  0x21   :  { %778 = vmatpush3.bf16.msra.mxu1 %v888_v32  ;;  %808 = vmatprep.subr.bf16.mxu0 %v917_v35 }
  0x22   :  { %836 = vmatprep.subr.bf16.mxu1 %v917_v35 }
  0x23   :  { %483 = vmatmul.mubr.bf16.vlgmr.msra.gmra.mrb[0].mxu0 %v889_v33 }
  0x24   :  { %539 = vmatmul.mubr.bf16.vlgmr.msra.gmra.mrb[0].mxu1 %v892_v36  ;;  %809 = vmatpush3.bf16.msra.mxu0 %v895_v38 }
  0x25   :  { %844 = vmatpush3.bf16.msra.mxu1 %v895_v38  ;;  %810 = vmatprep.subr.bf16.mxu0 %v917_v35 }
  0x26   :  { %837 = vmatprep.subr.bf16.mxu1 %v917_v35  ;;  %490 = vmatprep.mubr.bf16.mxu0 %v898_v40 }
  0x27   :  { %546 = vmatprep.mubr.bf16.mxu1 %v901_v42 }
  0x28   :  { %811 = vmatpush3.bf16.msra.mxu0 %v896_v39 }
  0x29   :  { %845 = vmatpush3.bf16.msra.mxu1 %v896_v39  ;;  %812 = vmatprep.subr.bf16.mxu0 %v917_v35 }
  0x2a   :  { %838 = vmatprep.subr.bf16.mxu1 %v917_v35 }
  0x2b   :  { %491 = vmatmul.mubr.bf16.gmra.mrb[4].mxu0 %v900_v43 }
  0x2c   :  { %813 = vmatpush3.bf16.msra.mxu0 %v897_v41  ;;  %547 = vmatmul.mubr.bf16.gmra.mrb[4].mxu1 %v903_v44 }
  0x2d   :  { %846 = vmatpush3.bf16.msra.mxu1 %v897_v41  ;;  %814 = vmatprep.subr.bf16.mxu0 %v917_v35 }
  0x2e   :  { %839 = vmatprep.subr.bf16.mxu1 %v917_v35  ;;  %498 = vmatprep.mubr.bf16.mxu0 %v664_v47 }
  0x2f   :  { %554 = vmatprep.mubr.bf16.mxu1 %v666_v48 }
  0x30   :  { %815 = vmatpush3.bf16.msra.mxu0 %v904_v49 }
  0x31   :  { %847 = vmatpush3.bf16.msra.mxu1 %v904_v49  ;;  %816 = vmatprep.subr.bf16.mxu0 %v917_v35 }
  0x32   :  { %840 = vmatprep.subr.bf16.mxu1 %v917_v35 }
  0x33   :  { %499 = vmatmul.mubr.bf16.gmra.mrb[8].mxu0 %v663_v50 }
  0x34   :  { %817 = vmatpush3.bf16.msra.mxu0 %v905_v52  ;;  %555 = vmatmul.mubr.bf16.gmra.mrb[8].mxu1 %v665_v53 }
  0x35   :  { %848 = vmatpush3.bf16.msra.mxu1 %v905_v52  ;;  %818 = vmatprep.subr.bf16.mxu0 %v917_v35 }
  0x36   :  { %841 = vmatprep.subr.bf16.mxu1 %v917_v35  ;;  %824 = vmatprep.mubr.msk.bf16.mxu0 %vm918_vm0, %v917_v35 }
  0x37   :  { %828 = vmatprep.mubr.msk.bf16.mxu1 %vm918_vm0, %v917_v35 }
  0x38   :  { %819 = vmatpush3.bf16.msra.mxu0 %v910_v55 }
  0x39   :  { %849 = vmatpush3.bf16.msra.mxu1 %v910_v55  ;;  %820 = vmatprep.subr.bf16.mxu0 %v917_v35 }
  0x3a   :  { %842 = vmatprep.subr.bf16.mxu1 %v917_v35 }
  0x3c   :  { %821 = vmatpush3.bf16.msra.mxu0 %v911_v58 }
  0x3d   :  { %850 = vmatpush3.bf16.msra.mxu1 %v911_v58  ;;  %822 = vmatprep.subr.bf16.mxu0 %v917_v35 }
  0x3e   :  { %843 = vmatprep.subr.bf16.mxu1 %v917_v35 }
  0x40   :  { %823 = vmatpush3.bf16.msra.mxu0 %v912_v60 }
  0x41   :  { %851 = vmatpush3.bf16.msra.mxu1 %v912_v60 }
  0x43   :  { %825 = vmatmul.mubr.bf16.vlgmr.msra.gmra.mrb[12].mxu0 %v913_v61 }
  0x44   :  { %829 = vmatmul.mubr.bf16.vlgmr.msra.gmra.mrb[12].mxu1 %v914_v62 }
  0x45   :  { %832 = vmatprep.mubr.msk.bf16.mxu1 %vm918_vm0, %v917_v35 }
  0x4c   :  { %833 = vmatmul.mubr.bf16.gmra.mrb[16].mxu1 %v915_v63 }
  0x8e   :  { %v118_v0 = vpop.permute.xlu0 %117 }
  0x91   :  { %v128_v1 = vpop.permute.xlu1 %127 }
  0x92   :  { %v123_v3 = vpop.permute.xlu0 %122 }
  0x95   :  { %v133_v19 = vpop.permute.xlu1 %132 }
  0x96   :  { %v138_v36 = vpop.permute.xlu0 %137 }
  0xf6   :  { %v745_v2 = vpop.f32.mrb[0].mxu0 }
  0xf7   :  { %v779_v4 = vpop.f32.mrb[0].mxu1  ;;  %v746_v5 = vpop.f32.mrb[1].mxu0 }
  0xf8   :  { %v747_v6 = vadd.f32 %v746_v5, %v745_v2  ;;  %v780_v7 = vpop.f32.mrb[1].mxu1  ;;  %v748_v8 = vpop.f32.mrb[2].mxu0 }
  0xf9   :  { %v781_v9 = vadd.f32 %v780_v7, %v779_v4  ;;  %v782_v10 = vpop.f32.mrb[2].mxu1  ;;  %v749_v11 = vpop.f32.mrb[3].mxu0 }
  0xfa   :  { %v485_v12 = vadd.f32 %v747_v6, %v118_v0  ;;  %v750_v13 = vadd.f32 %v749_v11, %v748_v8  ;;  %v783_v14 = vpop.f32.mrb[3].mxu1 }
  0xfb   :  { %v784_v15 = vadd.f32 %v783_v14, %v782_v10 }
  0xfc   :  { %v488_v16 = vadd.f32 %v750_v13, %v123_v3  ;;  %v541_v17 = vadd.f32 %v781_v9, %v485_v12 }
  0xfe   :  { %v751_v18 = vpop.f32.mrb[4].mxu0  ;;  %v544_v20 = vadd.f32 %v784_v15, %v488_v16 }
  0xff   :  { %v752_v21 = vpop.f32.mrb[5].mxu0  ;;  %v785_v22 = vpop.f32.mrb[4].mxu1 }
 0x100   :  { %v753_v23 = vadd.f32 %v752_v21, %v751_v18  ;;  %v754_v24 = vpop.f32.mrb[6].mxu0  ;;  %v786_v25 = vpop.f32.mrb[5].mxu1 }
 0x101   :  { %v755_v26 = vpop.f32.mrb[7].mxu0  ;;  %v787_v27 = vadd.f32 %v786_v25, %v785_v22  ;;  %v788_v28 = vpop.f32.mrb[6].mxu1 }
 0x102   :  { %v493_v29 = vadd.f32 %v753_v23, %v128_v1  ;;  %v756_v30 = vadd.f32 %v755_v26, %v754_v24  ;;  %v789_v31 = vpop.f32.mrb[7].mxu1 }
 0x103   :  { %v790_v32 = vadd.f32 %v789_v31, %v788_v28 }
 0x104   :  { %v496_v33 = vadd.f32 %v756_v30, %v133_v19  ;;  %v549_v34 = vadd.f32 %v787_v27, %v493_v29 }
 0x106   :  { %v757_v35 = vpop.f32.mrb[8].mxu0  ;;  %v552_v37 = vadd.f32 %v790_v32, %v496_v33 }
 0x107   :  { %v791_v38 = vpop.f32.mrb[8].mxu1  ;;  %v758_v39 = vpop.f32.mrb[9].mxu0 }
 0x108   :  { %v759_v40 = vadd.f32 %v758_v39, %v757_v35  ;;  %v792_v41 = vpop.f32.mrb[9].mxu1  ;;  %v760_v42 = vpop.f32.mrb[10].mxu0 }
 0x109   :  { %v793_v43 = vadd.f32 %v792_v41, %v791_v38  ;;  %v794_v44 = vpop.f32.mrb[10].mxu1  ;;  %v761_v45 = vpop.f32.mrb[11].mxu0 }
 0x10a   :  { %v501_v46 = vadd.f32 %v759_v40, %v138_v36  ;;  %v795_v47 = vpop.f32.mrb[11].mxu1 }
 0x10c   :  { %v557_v48 = vadd.f32 %v793_v43, %v501_v46 }
 0x116   :  { %v596_v49 = vpop.f32.mrb[12].mxu0 }
 0x117   :  { %v597_v50 = vadd.f32 %v596_v49, %v541_v17  ;;  %v604_v51 = vpop.f32.mrb[12].mxu1  ;;  %v826_v52 = vpop.f32.mrb[13].mxu0 }
 0x118   :  { %v605_v53 = vadd.f32 %v604_v51, %v549_v34  ;;  %v830_v54 = vpop.f32.mrb[13].mxu1  ;;  %v599_v55 = vpop.f32.mrb[14].mxu0 }
 0x119   :  { %v600_v56 = vadd.f32 %v599_v55, %v544_v20  ;;  %v607_v57 = vpop.f32.mrb[14].mxu1  ;;  %v827_v58 = vpop.f32.mrb[15].mxu0  ;;  %v618_v61 = vmax.f32 %v597_v50, 0.0 }
 0x11a   :  { %v608_v59 = vadd.f32 %v607_v57, %v552_v37  ;;  %v831_v60 = vpop.f32.mrb[15].mxu1  ;;  %v620_v63 = vmax.f32 %v605_v53, 0.0 }
 0x11b   :  { %v619_v62 = vmax.f32 %v600_v56, 0.0 }
 0x11c   :  { %v621_v0 = vmax.f32 %v608_v59, 0.0 }
 0x11d   :  { %v721_v1 = vpack.c.bf16 %v619_v62, %v618_v61 }
 0x11e   :  { %v726_v2 = vpack.c.bf16 %v621_v0, %v620_v63 }
 0x11f   :  { %722 = vst [vmem:[%s1147_s3] sm:$0xff] %v721_v1   ;;  %v612_v3 = vpop.f32.mrb[16].mxu1 }
 0x120   :  { %728 = vst [vmem:[%s1147_s3 + $0x8] sm:$0xff] %v726_v2   ;;  %v613_v4 = vadd.f32 %v612_v3, %v557_v48  ;;  %v834_v5 = vpop.f32.mrb[17].mxu1 }
 0x121   :  { %v615_v6 = vpop.f32.mrb[18].mxu1 }
 0x122   :  { %v622_v7 = vmax.f32 %v613_v4, 0.0  ;;  %v835_v8 = vpop.f32.mrb[19].mxu1 }
 0x124   :  { %v717_v9 = vpack.c.bf16 %v622_v7, %v622_v7 }
 0x126   :  { %648 = vst [vmem:[%s1147_s3 + $0x10] sm:$0x3] %v717_v9 }

// kernel: conv_head_forward.9
= control target key start
LH: loop header
LB: loop body
LE: loop exit
PB: predicated region body
PF: predicated region fallthrough
CT: control target
= control target key end

     0   :  { %vm4191_vm0 = vmmov 0   ;;  %vm3092_vm1 = vcmask 523264   ;;  %s5398_s1 = inlined_call_operand.vmem [shape: bf16[1152,384], index: 1, kind: input, shape index: {}]   ;;  %s5399_s0 = inlined_call_operand.vmem [shape: bf16[8,1152], index: 0, kind: input, shape index: {}]   ;;  %s5400_s3 = inlined_call_operand.vmem [shape: bf16[384,512], index: 3, kind: input, shape index: {}]   ;;  %s5401_s2 = inlined_call_operand.vmem [shape: f32[1,384], index: 2, kind: input, shape index: {}]   ;;  %s5402_s5 = inlined_call_operand.vmem [shape: bf16[512,64], index: 5, kind: input, shape index: {}]   ;;  %s5403_s4 = inlined_call_operand.vmem [shape: f32[1,512], index: 4, kind: input, shape index: {}]   ;;  %s5404_s7 = inlined_call_operand.vmem [shape: bf16[64,64], index: 7, kind: input, shape index: {}]   ;;  %s5405_s6 = inlined_call_operand.vmem [shape: f32[1,64], index: 6, kind: input, shape index: {}]   ;;  %s5406_s8 = inlined_call_operand.vmem [shape: f32[1,64], index: 8, kind: input, shape index: {}]   ;;  %s5407_s9 = inlined_call_operand.vmem [shape: f32[8,64], index: 9, kind: output, shape index: {}]  }
   0x1   :  { %v3713_v0 = vld [vmem:[%s5398_s1 + $0x4] ss:$12 sps:$4 sm:$0xff]   ;;  %v3715_v1 = vld [vmem:[%s5398_s1] ss:$12 sps:$4 sm:$0xff]   ;;  %v3716_v2 = vld [vmem:[%s5398_s1 + $0x1c] ss:$12 sps:$4 sm:$0xff]  }
   0x2   :  { %1527 = vmatprep.subr.bf16.mxu0 %v3713_v0  ;;  %v3718_v3 = vld [vmem:[%s5398_s1 + $0x18] ss:$12 sps:$4 sm:$0xff]   ;;  %v3719_v4 = vld [vmem:[%s5398_s1 + $0x34] ss:$12 sps:$4 sm:$0xff]   ;;  %v3721_v5 = vld [vmem:[%s5398_s1 + $0x30] ss:$12 sps:$4 sm:$0xff]  }
   0x3   :  { %1528 = vmatpush1.bf16.msra.mxu0 %v3715_v1  ;;  %v3722_v6 = vld [vmem:[%s5398_s1 + $0x4c] ss:$12 sps:$4 sm:$0xff]   ;;  %v3724_v7 = vld [vmem:[%s5398_s1 + $0x48] ss:$12 sps:$4 sm:$0xff]   ;;  %v3725_v8 = vld [vmem:[%s5398_s1 + $0x64] ss:$12 sps:$4 sm:$0xff]  }
   0x4   :  { %1529 = vmatprep.subr.bf16.mxu0 %v3716_v2  ;;  %v3727_v9 = vld [vmem:[%s5398_s1 + $0x60] ss:$12 sps:$4 sm:$0xff]   ;;  %v3728_v10 = vld [vmem:[%s5398_s1 + $0x7c] ss:$12 sps:$4 sm:$0xff]   ;;  %v3730_v13 = vld [vmem:[%s5398_s1 + $0x78] ss:$12 sps:$4 sm:$0xff]  }
   0x5   :  { %v3749_v11 = vld [vmem:[%s5398_s1 + $0xc8] ss:$12 sps:$4 sm:$0xff]   ;;  %v3754_v15 = vld [vmem:[%s5398_s1 + $0xe0] ss:$12 sps:$4 sm:$0xff]   ;;  %v3733_v17 = vld [vmem:[%s5398_s1 + $0x90] ss:$12 sps:$4 sm:$0xff]  }
   0x6   :  { %v3750_v12 = vld [vmem:[%s5398_s1 + $0x8] ss:$12 sps:$4 sm:$0xff]   ;;  %3502 = vmatprep.subr.bf16.mxu1 %v3749_v11  ;;  %v3755_v16 = vld [vmem:[%s5398_s1 + $0x20] ss:$12 sps:$4 sm:$0xff]   ;;  %v3759_v19 = vld [vmem:[%s5398_s1 + $0xf8] ss:$12 sps:$4 sm:$0xff]  }
   0x7   :  { %1530 = vmatpush1.bf16.msra.mxu0 %v3718_v3  ;;  %v3731_v14 = vld [vmem:[%s5398_s1 + $0x94] ss:$12 sps:$4 sm:$0xff]   ;;  %3503 = vmatpush3.bf16.msra.mxu1 %v3750_v12  ;;  %v3734_v18 = vld [vmem:[%s5398_s1 + $0xac] ss:$12 sps:$4 sm:$0xff]   ;;  %v3764_v22 = vld [vmem:[%s5398_s1 + $0x110] ss:$12 sps:$4 sm:$0xff]  }
   0x8   :  { %1531 = vmatprep.subr.bf16.mxu0 %v3719_v4  ;;  %3504 = vmatprep.subr.bf16.mxu1 %v3754_v15  ;;  %v3760_v20 = vld [vmem:[%s5398_s1 + $0x38] ss:$12 sps:$4 sm:$0xff]   ;;  %v3736_v21 = vld [vmem:[%s5398_s1 + $0xa8] ss:$12 sps:$4 sm:$0xff]   ;;  %v3765_v23 = vld [vmem:[%s5398_s1 + $0x50] ss:$12 sps:$4 sm:$0xff]  }
   0x9   :  { %v3737_v24 = vld [vmem:[%s5398_s1 + $0xc4] ss:$12 sps:$4 sm:$0xff]   ;;  %v3739_v25 = vld [vmem:[%s5398_s1 + $0xc0] ss:$12 sps:$4 sm:$0xff]   ;;  %v3769_v26 = vld [vmem:[%s5398_s1 + $0x128] ss:$12 sps:$4 sm:$0xff]  }
   0xa   :  { %v3770_v27 = vld [vmem:[%s5398_s1 + $0x68] ss:$12 sps:$4 sm:$0xff]   ;;  %v33_v28 = vld [vmem:[%s5399_s0] sm:$0xff]  ;;  %v3745_v36 = vld [vmem:[%s5398_s1 + $0xf0] ss:$12 sps:$4 sm:$0xff]  }
   0xb   :  { %1532 = vmatpush1.bf16.msra.mxu0 %v3721_v5  ;;  %3505 = vmatpush3.bf16.msra.mxu1 %v3755_v16  ;;  %v3740_v29 = vld [vmem:[%s5398_s1 + $0xdc] ss:$12 sps:$4 sm:$0xff]   ;;  %v3143_v30 = vcombine.high %v33_v28, %v33_v28  ;;  %v3776_v31 = vld [vmem:[%s5398_s1 + $0x140] ss:$12 sps:$4 sm:$0xff]   ;;  %v3742_v32 = vld [vmem:[%s5398_s1 + $0xd8] ss:$12 sps:$4 sm:$0xff]   ;;  %v3142_v47 = vcombine.low %v33_v28, %v33_v28 }
   0xc   :  { %1533 = vmatprep.subr.bf16.mxu0 %v3722_v6  ;;  %3506 = vmatprep.subr.bf16.mxu1 %v3759_v19  ;;  %v3777_v33 = vld [vmem:[%s5398_s1 + $0x80] ss:$12 sps:$4 sm:$0xff]   ;;  %v3781_v35 = vld [vmem:[%s5398_s1 + $0x158] ss:$12 sps:$4 sm:$0xff]   ;;  %v3786_v39 = vld [vmem:[%s5398_s1 + $0x170] ss:$12 sps:$4 sm:$0xff]  }
   0xd   :  { %1559 = vmatprep.mubr.bf16.mxu0 %v3143_v30  ;;  %1764 = vmatprep.mubr.bf16.mxu1 %v3143_v30  ;;  %v3743_v34 = vld [vmem:[%s5398_s1 + $0xf4] ss:$12 sps:$4 sm:$0xff]   ;;  %v3746_v37 = vld [vmem:[%s5398_s1 + $0x10c] ss:$12 sps:$4 sm:$0xff]   ;;  %v3751_v41 = vld [vmem:[%s5398_s1 + $0x124] ss:$12 sps:$4 sm:$0xff]  }
   0xe   :  { %v3782_v38 = vld [vmem:[%s5398_s1 + $0x98] ss:$12 sps:$4 sm:$0xff]   ;;  %v3748_v40 = vld [vmem:[%s5398_s1 + $0x108] ss:$12 sps:$4 sm:$0xff]   ;;  %v3787_v42 = vld [vmem:[%s5398_s1 + $0xb0] ss:$12 sps:$4 sm:$0xff]  }
   0xf   :  { %1534 = vmatpush1.bf16.msra.mxu0 %v3724_v7  ;;  %3507 = vmatpush3.bf16.msra.mxu1 %v3760_v20  ;;  %v3791_v43 = vld [vmem:[%s5398_s1 + $0x248] ss:$12 sps:$4 sm:$0xff]   ;;  %v3753_v44 = vld [vmem:[%s5398_s1 + $0x120] ss:$12 sps:$4 sm:$0xff]   ;;  %v3758_v49 = vld [vmem:[%s5398_s1 + $0x138] ss:$12 sps:$4 sm:$0xff]  }
  0x10   :  { %1535 = vmatprep.subr.bf16.mxu0 %v3725_v8  ;;  %3508 = vmatprep.subr.bf16.mxu1 %v3764_v22  ;;  %v3756_v45 = vld [vmem:[%s5398_s1 + $0x13c] ss:$12 sps:$4 sm:$0xff]   ;;  %v3796_v48 = vld [vmem:[%s5398_s1 + $0x260] ss:$12 sps:$4 sm:$0xff]   ;;  %v3801_v52 = vld [vmem:[%s5398_s1 + $0x278] ss:$12 sps:$4 sm:$0xff]  }
  0x11   :  { %v3792_v46 = vld [vmem:[%s5398_s1 + $0x188] ss:$12 sps:$4 sm:$0xff]   ;;  %v3797_v50 = vld [vmem:[%s5398_s1 + $0x1a0] ss:$12 sps:$4 sm:$0xff]   ;;  %v3763_v53 = vld [vmem:[%s5398_s1 + $0x150] ss:$12 sps:$4 sm:$0xff]  }
  0x12   :  { %v3761_v51 = vld [vmem:[%s5398_s1 + $0x154] ss:$12 sps:$4 sm:$0xff]   ;;  %v3766_v54 = vld [vmem:[%s5398_s1 + $0x16c] ss:$12 sps:$4 sm:$0xff]   ;;  %v3806_v56 = vld [vmem:[%s5398_s1 + $0x290] ss:$12 sps:$4 sm:$0xff]  }
  0x13   :  { %1536 = vmatpush1.bf16.msra.mxu0 %v3727_v9  ;;  %3509 = vmatpush3.bf16.msra.mxu1 %v3765_v23  ;;  %v3802_v55 = vld [vmem:[%s5398_s1 + $0x1b8] ss:$12 sps:$4 sm:$0xff]   ;;  %v3768_v57 = vld [vmem:[%s5398_s1 + $0x168] ss:$12 sps:$4 sm:$0xff]   ;;  %v3807_v59 = vld [vmem:[%s5398_s1 + $0x1d0] ss:$12 sps:$4 sm:$0xff]  }
  0x14   :  { %1537 = vmatprep.subr.bf16.mxu0 %v3728_v10  ;;  %3510 = vmatprep.subr.bf16.mxu1 %v3769_v26  ;;  %v3775_v58 = vld [vmem:[%s5398_s1 + $0x184] ss:$12 sps:$4 sm:$0xff]   ;;  %v3811_v60 = vld [vmem:[%s5398_s1 + $0x2a8] ss:$12 sps:$4 sm:$0xff]   ;;  %v3773_v61 = vld [vmem:[%s5398_s1 + $0x180] ss:$12 sps:$4 sm:$0xff]  }
  0x15   :  { %v3780_v62 = vld [vmem:[%s5398_s1 + $0x19c] ss:$12 sps:$4 sm:$0xff]   ;;  %v3816_v0 = vld [vmem:[%s5398_s1 + $0x2c0] ss:$12 sps:$4 sm:$0xff]   ;;  %v3778_v1 = vld [vmem:[%s5398_s1 + $0x198] ss:$12 sps:$4 sm:$0xff]  }
  0x16   :  { %v3812_v63 = vld [vmem:[%s5398_s1 + $0x1e8] ss:$12 sps:$4 sm:$0xff]   ;;  %v3817_v3 = vld [vmem:[%s5398_s1 + $0x200] ss:$12 sps:$4 sm:$0xff]   ;;  %v3821_v4 = vld [vmem:[%s5398_s1 + $0x2d8] ss:$12 sps:$4 sm:$0xff]  }
  0x17   :  { %1538 = vmatpush1.bf16.msra.mxu0 %v3730_v13  ;;  %3511 = vmatpush3.bf16.msra.mxu1 %v3770_v27  ;;  %v3785_v2 = vld [vmem:[%s5398_s1 + $0x1b4] ss:$12 sps:$4 sm:$0xff]   ;;  %v3783_v5 = vld [vmem:[%s5398_s1 + $0x1b0] ss:$12 sps:$4 sm:$0xff]   ;;  %v34_v6 = vld [vmem:[%s5399_s0 + $0x8] sm:$0xff] }
  0x18   :  { %1539 = vmatprep.subr.bf16.mxu0 %v3731_v14  ;;  %3512 = vmatprep.subr.bf16.mxu1 %v3776_v31  ;;  %v3790_v7 = vld [vmem:[%s5398_s1 + $0x1cc] ss:$12 sps:$4 sm:$0xff]   ;;  %v3145_v8 = vcombine.high %v34_v6, %v34_v6  ;;  %v3826_v10 = vld [vmem:[%s5398_s1 + $0x2f0] ss:$12 sps:$4 sm:$0xff]   ;;  %v3788_v11 = vld [vmem:[%s5398_s1 + $0x1c8] ss:$12 sps:$4 sm:$0xff]   ;;  %v4474_v16 = vcombine.low %v34_v6, %v34_v6 }
  0x19   :  { %v3822_v9 = vld [vmem:[%s5398_s1 + $0x218] ss:$12 sps:$4 sm:$0xff]   ;;  %v3827_v12 = vld [vmem:[%s5398_s1 + $0x230] ss:$12 sps:$4 sm:$0xff]   ;;  %v3833_v14 = vld [vmem:[%s5398_s1 + $0x3c8] ss:$12 sps:$4 sm:$0xff]  }
  0x1a   :  { %v3795_v13 = vld [vmem:[%s5398_s1 + $0x1e4] ss:$12 sps:$4 sm:$0xff]   ;;  %v3793_v15 = vld [vmem:[%s5398_s1 + $0x1e0] ss:$12 sps:$4 sm:$0xff]   ;;  %v3808_v28 = vld [vmem:[%s5398_s1 + $0x228] ss:$12 sps:$4 sm:$0xff]  }
  0x1b   :  { %1540 = vmatpush1.bf16.msra.mxu0 %v3733_v17  ;;  %3513 = vmatpush3.bf16.msra.mxu1 %v3777_v33  ;;  %v3800_v17 = vld [vmem:[%s5398_s1 + $0x1fc] ss:$12 sps:$4 sm:$0xff]   ;;  %v3838_v19 = vld [vmem:[%s5398_s1 + $0x3e0] ss:$12 sps:$4 sm:$0xff]   ;;  %v3798_v20 = vld [vmem:[%s5398_s1 + $0x1f8] ss:$12 sps:$4 sm:$0xff]  }
  0x1c   :  { %1541 = vmatprep.subr.bf16.mxu0 %v3734_v18  ;;  %3514 = vmatprep.subr.bf16.mxu1 %v3781_v35  ;;  %v3834_v18 = vld [vmem:[%s5398_s1 + $0x308] ss:$12 sps:$4 sm:$0xff]   ;;  %v3839_v22 = vld [vmem:[%s5398_s1 + $0x320] ss:$12 sps:$4 sm:$0xff]   ;;  %v3843_v23 = vld [vmem:[%s5398_s1 + $0x3f8] ss:$12 sps:$4 sm:$0xff]  }
  0x1d   :  { %v3844_v26 = vld [vmem:[%s5398_s1 + $0x338] ss:$12 sps:$4 sm:$0xff]   ;;  %v3848_v27 = vld [vmem:[%s5398_s1 + $0x410] ss:$12 sps:$4 sm:$0xff]   ;;  %v3853_v31 = vld [vmem:[%s5398_s1 + $0x428] ss:$12 sps:$4 sm:$0xff]  }
  0x1e   :  { %v3849_v30 = vld [vmem:[%s5398_s1 + $0x350] ss:$12 sps:$4 sm:$0xff]   ;;  %v3854_v33 = vld [vmem:[%s5398_s1 + $0x368] ss:$12 sps:$4 sm:$0xff]   ;;  %v3858_v35 = vld [vmem:[%s5398_s1 + $0x440] ss:$12 sps:$4 sm:$0xff]  }
  0x1f   :  { %1542 = vmatpush1.bf16.msra.mxu0 %v3736_v21  ;;  %3515 = vmatpush3.bf16.msra.mxu1 %v3782_v38  ;;  %v3805_v21 = vld [vmem:[%s5398_s1 + $0x214] ss:$12 sps:$4 sm:$0xff]  }
  0x20   :  { %1543 = vmatprep.subr.bf16.mxu0 %v3737_v24  ;;  %3516 = vmatprep.subr.bf16.mxu1 %v3786_v39  ;;  %v3803_v24 = vld [vmem:[%s5398_s1 + $0x210] ss:$12 sps:$4 sm:$0xff]   ;;  %v3825_v39 = vld [vmem:[%s5398_s1 + $0x274] ss:$12 sps:$4 sm:$0xff]  }
  0x21   :  { %v3896_v6 = vld [vmem:[%s5398_s1 + $0x4e8] ss:$12 sps:$4 sm:$0xff]  }
  0x23   :  { %1544 = vmatpush1.bf16.msra.mxu0 %v3739_v25  ;;  %3517 = vmatpush3.bf16.msra.mxu1 %v3787_v42  ;;  %v3810_v25 = vld [vmem:[%s5398_s1 + $0x22c] ss:$12 sps:$4 sm:$0xff]   ;;  %v3823_v42 = vld [vmem:[%s5398_s1 + $0x270] ss:$12 sps:$4 sm:$0xff]  }
  0x24   :  { %1545 = vmatprep.subr.bf16.mxu0 %v3740_v29  ;;  %3524 = vmatprep.subr.bf16.mxu1 %v3791_v43  ;;  %v3815_v29 = vld [vmem:[%s5398_s1 + $0x244] ss:$12 sps:$4 sm:$0xff]   ;;  %v3830_v43 = vld [vmem:[%s5398_s1 + $0x28c] ss:$12 sps:$4 sm:$0xff]  }
  0x26   :  { %1765 = vmatmul.mubr.bf16.vlgmr.msra.gmra.mrb[0].mxu1 %v3142_v47 }
  0x27   :  { %1546 = vmatpush1.bf16.msra.mxu0 %v3742_v32  ;;  %3525 = vmatpush3.bf16.msra.mxu1 %v3792_v46  ;;  %v3813_v32 = vld [vmem:[%s5398_s1 + $0x240] ss:$12 sps:$4 sm:$0xff]   ;;  %v3828_v46 = vld [vmem:[%s5398_s1 + $0x288] ss:$12 sps:$4 sm:$0xff]  }
  0x28   :  { %1547 = vmatprep.subr.bf16.mxu0 %v3743_v34  ;;  %3526 = vmatprep.subr.bf16.mxu1 %v3796_v48  ;;  %v3820_v34 = vld [vmem:[%s5398_s1 + $0x25c] ss:$12 sps:$4 sm:$0xff]  }
  0x29   :  { %1804 = vmatprep.mubr.bf16.mxu1 %v3145_v8  ;;  %v3869_v48 = vld [vmem:[%s5398_s1 + $0x3b0] ss:$12 sps:$4 sm:$0xff]  }
  0x2b   :  { %1548 = vmatpush1.bf16.msra.mxu0 %v3745_v36  ;;  %3527 = vmatpush3.bf16.msra.mxu1 %v3797_v50  ;;  %v35_v36 = vld [vmem:[%s5399_s0 + $0x10] sm:$0xff]  ;;  %v3835_v50 = vld [vmem:[%s5398_s1 + $0x2a0] ss:$12 sps:$4 sm:$0xff]  }
  0x2c   :  { %1549 = vmatprep.subr.bf16.mxu0 %v3746_v37  ;;  %3528 = vmatprep.subr.bf16.mxu1 %v3801_v52  ;;  %v3818_v37 = vld [vmem:[%s5398_s1 + $0x258] ss:$12 sps:$4 sm:$0xff]   ;;  %v4540_v38 = vcombine.high %v35_v36, %v35_v36  ;;  %v4582_v52 = vcombine.low %v35_v36, %v35_v36  ;;  %v3904_v36 = vld [vmem:[%s5398_s1 + $0x3dc] ss:$12 sps:$4 sm:$0xff]  }
  0x2f   :  { %1550 = vmatpush1.bf16.msra.mxu0 %v3748_v40  ;;  %3529 = vmatpush3.bf16.msra.mxu1 %v3802_v55  ;;  %v3859_v40 = vld [vmem:[%s5398_s1 + $0x380] ss:$12 sps:$4 sm:$0xff]   ;;  %v3840_v55 = vld [vmem:[%s5398_s1 + $0x2b8] ss:$12 sps:$4 sm:$0xff]  }
  0x30   :  { %1551 = vmatprep.subr.bf16.mxu0 %v3751_v41  ;;  %3530 = vmatprep.subr.bf16.mxu1 %v3806_v56  ;;  %v3863_v41 = vld [vmem:[%s5398_s1 + $0x458] ss:$12 sps:$4 sm:$0xff]   ;;  %v3881_v56 = vld [vmem:[%s5398_s1 + $0x4a0] ss:$12 sps:$4 sm:$0xff]  }
  0x33   :  { %1552 = vmatpush1.bf16.msra.mxu0 %v3753_v44  ;;  %3531 = vmatpush3.bf16.msra.mxu1 %v3807_v59  ;;  %v3864_v44 = vld [vmem:[%s5398_s1 + $0x398] ss:$12 sps:$4 sm:$0xff]   ;;  %v3845_v59 = vld [vmem:[%s5398_s1 + $0x2d0] ss:$12 sps:$4 sm:$0xff]  }
  0x34   :  { %1553 = vmatprep.subr.bf16.mxu0 %v3756_v45  ;;  %3532 = vmatprep.subr.bf16.mxu1 %v3811_v60  ;;  %v3868_v45 = vld [vmem:[%s5398_s1 + $0x470] ss:$12 sps:$4 sm:$0xff]   ;;  %v3852_v60 = vld [vmem:[%s5398_s1 + $0x2ec] ss:$12 sps:$4 sm:$0xff]  }
  0x37   :  { %1554 = vmatpush1.bf16.msra.mxu0 %v3758_v49  ;;  %3533 = vmatpush3.bf16.msra.mxu1 %v3812_v63  ;;  %v3875_v49 = vld [vmem:[%s5398_s1 + $0x548] ss:$12 sps:$4 sm:$0xff]  }
  0x38   :  { %1555 = vmatprep.subr.bf16.mxu0 %v3761_v51  ;;  %3534 = vmatprep.subr.bf16.mxu1 %v3816_v0  ;;  %v3842_v51 = vld [vmem:[%s5398_s1 + $0x2bc] ss:$12 sps:$4 sm:$0xff]   ;;  %v3857_v0 = vld [vmem:[%s5398_s1 + $0x304] ss:$12 sps:$4 sm:$0xff]  }
  0x39   :  { %v3850_v63 = vld [vmem:[%s5398_s1 + $0x2e8] ss:$12 sps:$4 sm:$0xff]  }
  0x3b   :  { %1556 = vmatpush1.bf16.msra.mxu0 %v3763_v53  ;;  %3535 = vmatpush3.bf16.msra.mxu1 %v3817_v3  ;;  %v3876_v53 = vld [vmem:[%s5398_s1 + $0x488] ss:$12 sps:$4 sm:$0xff]  }
  0x3c   :  { %1557 = vmatprep.subr.bf16.mxu0 %v3766_v54  ;;  %3536 = vmatprep.subr.bf16.mxu1 %v3821_v4  ;;  %v3880_v54 = vld [vmem:[%s5398_s1 + $0x560] ss:$12 sps:$4 sm:$0xff]   ;;  %v3895_v3 = vld [vmem:[%s5398_s1 + $0x5a8] ss:$12 sps:$4 sm:$0xff]  }
  0x3f   :  { %1558 = vmatpush1.bf16.msra.mxu0 %v3768_v57  ;;  %3537 = vmatpush3.bf16.msra.mxu1 %v3822_v9  ;;  %v3847_v57 = vld [vmem:[%s5398_s1 + $0x2d4] ss:$12 sps:$4 sm:$0xff]   ;;  %v3860_v9 = vld [vmem:[%s5398_s1 + $0x318] ss:$12 sps:$4 sm:$0xff]  }
  0x40   :  { %1568 = vmatprep.subr.bf16.mxu0 %v3775_v58  ;;  %3538 = vmatprep.subr.bf16.mxu1 %v3826_v10  ;;  %v3885_v58 = vld [vmem:[%s5398_s1 + $0x578] ss:$12 sps:$4 sm:$0xff]   ;;  %v3867_v10 = vld [vmem:[%s5398_s1 + $0x334] ss:$12 sps:$4 sm:$0xff]  }
  0x42   :  { %1560 = vmatmul.mubr.bf16.vlgmr.msra.gmra.mrb[0].mxu0 %v3142_v47  ;;  %v3837_v47 = vld [vmem:[%s5398_s1 + $0x2a4] ss:$12 sps:$4 sm:$0xff]  }
  0x43   :  { %1569 = vmatpush1.bf16.msra.mxu0 %v3773_v61  ;;  %1600 = vmatprep.mubr.bf16.mxu0 %v3145_v8  ;;  %v3886_v61 = vld [vmem:[%s5398_s1 + $0x4b8] ss:$12 sps:$4 sm:$0xff]   ;;  %v3900_v8 = vld [vmem:[%s5398_s1 + $0x5c0] ss:$12 sps:$4 sm:$0xff]  }
  0x44   :  { %1570 = vmatprep.subr.bf16.mxu0 %v3780_v62  ;;  %3539 = vmatpush3.bf16.msra.mxu1 %v3827_v12  ;;  %v3890_v62 = vld [vmem:[%s5398_s1 + $0x590] ss:$12 sps:$4 sm:$0xff]   ;;  %v3905_v12 = vld [vmem:[%s5398_s1 + $0x5d8] ss:$12 sps:$4 sm:$0xff]  }
  0x45   :  { %3546 = vmatprep.subr.bf16.mxu1 %v3833_v14  ;;  %v3872_v14 = vld [vmem:[%s5398_s1 + $0x34c] ss:$12 sps:$4 sm:$0xff]  }
  0x47   :  { %1571 = vmatpush1.bf16.msra.mxu0 %v3778_v1  ;;  %1805 = vmatmul.mubr.bf16.vlgmr.msra.gmra.mrb[4].mxu1 %v4474_v16  ;;  %v3891_v1 = vld [vmem:[%s5398_s1 + $0x4d0] ss:$12 sps:$4 sm:$0xff]  }
  0x48   :  { %1572 = vmatprep.subr.bf16.mxu0 %v3785_v2  ;;  %3547 = vmatpush3.bf16.msra.mxu1 %v3834_v18  ;;  %v36_v2 = vld [vmem:[%s5399_s0 + $0x18] sm:$0xff] }
  0x49   :  { %3548 = vmatprep.subr.bf16.mxu1 %v3838_v19  ;;  %1844 = vmatprep.mubr.bf16.mxu1 %v4540_v38  ;;  %v4630_v4 = vcombine.high %v36_v2, %v36_v2  ;;  %v3911_v18 = vld [vmem:[%s5398_s1 + $0x530] ss:$12 sps:$4 sm:$0xff]  }
  0x4a   :  { %v3879_v19 = vld [vmem:[%s5398_s1 + $0x364] ss:$12 sps:$4 sm:$0xff]  }
  0x4b   :  { %1573 = vmatpush1.bf16.msra.mxu0 %v3783_v5  ;;  %v3855_v5 = vld [vmem:[%s5398_s1 + $0x300] ss:$12 sps:$4 sm:$0xff]  }
  0x4c   :  { %1574 = vmatprep.subr.bf16.mxu0 %v3790_v7  ;;  %3549 = vmatpush3.bf16.msra.mxu1 %v3839_v22  ;;  %v3862_v7 = vld [vmem:[%s5398_s1 + $0x31c] ss:$12 sps:$4 sm:$0xff]  }
  0x4d   :  { %3550 = vmatprep.subr.bf16.mxu1 %v3843_v23  ;;  %v3917_v22 = vld [vmem:[%s5398_s1 + $0x608] ss:$12 sps:$4 sm:$0xff]  }
  0x4e   :  { %v3884_v23 = vld [vmem:[%s5398_s1 + $0x37c] ss:$12 sps:$4 sm:$0xff]  }
  0x4f   :  { %1575 = vmatpush1.bf16.msra.mxu0 %v3788_v11  ;;  %v3901_v11 = vld [vmem:[%s5398_s1 + $0x500] ss:$12 sps:$4 sm:$0xff]  }
  0x50   :  { %1576 = vmatprep.subr.bf16.mxu0 %v3795_v13  ;;  %3551 = vmatpush3.bf16.msra.mxu1 %v3844_v26  ;;  %v3865_v13 = vld [vmem:[%s5398_s1 + $0x330] ss:$12 sps:$4 sm:$0xff]   ;;  %v3921_v26 = vld [vmem:[%s5398_s1 + $0x620] ss:$12 sps:$4 sm:$0xff]  }
  0x51   :  { %3552 = vmatprep.subr.bf16.mxu1 %v3848_v27  ;;  %v3889_v27 = vld [vmem:[%s5398_s1 + $0x394] ss:$12 sps:$4 sm:$0xff]  }
  0x53   :  { %1577 = vmatpush1.bf16.msra.mxu0 %v3793_v15  ;;  %v3906_v15 = vld [vmem:[%s5398_s1 + $0x518] ss:$12 sps:$4 sm:$0xff]  }
  0x54   :  { %1578 = vmatprep.subr.bf16.mxu0 %v3800_v17  ;;  %3553 = vmatpush3.bf16.msra.mxu1 %v3849_v30  ;;  %v3870_v17 = vld [vmem:[%s5398_s1 + $0x348] ss:$12 sps:$4 sm:$0xff]   ;;  %v3894_v30 = vld [vmem:[%s5398_s1 + $0x3ac] ss:$12 sps:$4 sm:$0xff]  }
  0x55   :  { %3554 = vmatprep.subr.bf16.mxu1 %v3853_v31  ;;  %v3892_v31 = vld [vmem:[%s5398_s1 + $0x3a8] ss:$12 sps:$4 sm:$0xff]  }
  0x57   :  { %1579 = vmatpush1.bf16.msra.mxu0 %v3798_v20  ;;  %v3877_v20 = vld [vmem:[%s5398_s1 + $0x360] ss:$12 sps:$4 sm:$0xff]  }
  0x58   :  { %1580 = vmatprep.subr.bf16.mxu0 %v3805_v21  ;;  %3555 = vmatpush3.bf16.msra.mxu1 %v3854_v33  ;;  %v4683_v21 = vcombine.low %v36_v2, %v36_v2  ;;  %v3899_v33 = vld [vmem:[%s5398_s1 + $0x3c4] ss:$12 sps:$4 sm:$0xff]   ;;  %v3958_v2 = vld [vmem:[%s5398_s1 + $0x514] ss:$12 sps:$4 sm:$0xff]  }
  0x59   :  { %3556 = vmatprep.subr.bf16.mxu1 %v3858_v35  ;;  %v3933_v35 = vld [vmem:[%s5398_s1 + $0x668] ss:$12 sps:$4 sm:$0xff]  }
  0x5b   :  { %1581 = vmatpush1.bf16.msra.mxu0 %v3803_v24  ;;  %v4190_v24 = vmov 0.0  }
  0x5c   :  { %1582 = vmatprep.subr.bf16.mxu0 %v3810_v25  ;;  %3557 = vmatpush3.bf16.msra.mxu1 %v3859_v40  ;;  %v3882_v25 = vld [vmem:[%s5398_s1 + $0x378] ss:$12 sps:$4 sm:$0xff]   ;;  %v3907_v40 = vld [vmem:[%s5398_s1 + $0x3f0] ss:$12 sps:$4 sm:$0xff]  }
  0x5d   :  { %3558 = vmatprep.subr.bf16.mxu1 %v3863_v41  ;;  %v3941_v41 = vld [vmem:[%s5398_s1 + $0x698] ss:$12 sps:$4 sm:$0xff]  }
  0x5f   :  { %1583 = vmatpush1.bf16.msra.mxu0 %v3808_v28  ;;  %v3887_v28 = vld [vmem:[%s5398_s1 + $0x390] ss:$12 sps:$4 sm:$0xff]  }
  0x60   :  { %1584 = vmatprep.subr.bf16.mxu0 %v3815_v29  ;;  %3559 = vmatpush3.bf16.msra.mxu1 %v3864_v44  ;;  %v3925_v29 = vld [vmem:[%s5398_s1 + $0x638] ss:$12 sps:$4 sm:$0xff]   ;;  %v3945_v44 = vld [vmem:[%s5398_s1 + $0x6b0] ss:$12 sps:$4 sm:$0xff]  }
  0x61   :  { %3560 = vmatprep.subr.bf16.mxu1 %v3868_v45  ;;  %v3920_v45 = vld [vmem:[%s5398_s1 + $0x424] ss:$12 sps:$4 sm:$0xff]  }
  0x63   :  { %1585 = vmatpush1.bf16.msra.mxu0 %v3813_v32  ;;  %v3929_v32 = vld [vmem:[%s5398_s1 + $0x650] ss:$12 sps:$4 sm:$0xff]  }
  0x64   :  { %1586 = vmatprep.subr.bf16.mxu0 %v3820_v34  ;;  %3561 = vmatpush3.bf16.msra.mxu1 %v3869_v48  ;;  %v3897_v34 = vld [vmem:[%s5398_s1 + $0x3c0] ss:$12 sps:$4 sm:$0xff]   ;;  %v3924_v48 = vld [vmem:[%s5398_s1 + $0x43c] ss:$12 sps:$4 sm:$0xff]  }
  0x65   :  { %3568 = vmatprep.subr.bf16.mxu1 %v3875_v49  ;;  %v3922_v49 = vld [vmem:[%s5398_s1 + $0x438] ss:$12 sps:$4 sm:$0xff]  }
  0x67   :  { %1587 = vmatpush1.bf16.msra.mxu0 %v3818_v37  ;;  %1845 = vmatmul.mubr.bf16.vlgmr.msra.gmra.mrb[8].mxu1 %v4582_v52  ;;  %v3902_v37 = vld [vmem:[%s5398_s1 + $0x3d8] ss:$12 sps:$4 sm:$0xff]  }
  0x68   :  { %1588 = vmatprep.subr.bf16.mxu0 %v3825_v39  ;;  %3569 = vmatpush3.bf16.msra.mxu1 %v3876_v53  ;;  %v3909_v39 = vld [vmem:[%s5398_s1 + $0x3f4] ss:$12 sps:$4 sm:$0xff]   ;;  %v3932_v53 = vld [vmem:[%s5398_s1 + $0x46c] ss:$12 sps:$4 sm:$0xff]  }
  0x69   :  { %3570 = vmatprep.subr.bf16.mxu1 %v3880_v54  ;;  %1884 = vmatprep.mubr.bf16.mxu1 %v4630_v4  ;;  %v3930_v54 = vld [vmem:[%s5398_s1 + $0x468] ss:$12 sps:$4 sm:$0xff]  }
  0x6b   :  { %1589 = vmatpush1.bf16.msra.mxu0 %v3823_v42  ;;  %v3914_v42 = vld [vmem:[%s5398_s1 + $0x40c] ss:$12 sps:$4 sm:$0xff]  }
  0x6c   :  { %1590 = vmatprep.subr.bf16.mxu0 %v3830_v43  ;;  %3571 = vmatpush3.bf16.msra.mxu1 %v3881_v56  ;;  %v3912_v43 = vld [vmem:[%s5398_s1 + $0x408] ss:$12 sps:$4 sm:$0xff]   ;;  %v3934_v56 = vld [vmem:[%s5398_s1 + $0x480] ss:$12 sps:$4 sm:$0xff]  }
  0x6d   :  { %3572 = vmatprep.subr.bf16.mxu1 %v3885_v58  ;;  %v3938_v58 = vld [vmem:[%s5398_s1 + $0x498] ss:$12 sps:$4 sm:$0xff]  }
  0x6f   :  { %1591 = vmatpush1.bf16.msra.mxu0 %v3828_v46  ;;  %v4768_v46 = vld [vmem:[%s5399_s0 + $0x20] ss:$0 sps:$4 sm:$0xff]  }
  0x70   :  { %1592 = vmatprep.subr.bf16.mxu0 %v3837_v47  ;;  %3573 = vmatpush3.bf16.msra.mxu1 %v3886_v61  ;;  %v3918_v47 = vld [vmem:[%s5398_s1 + $0x420] ss:$12 sps:$4 sm:$0xff]   ;;  %v3946_v61 = vld [vmem:[%s5398_s1 + $0x4c8] ss:$12 sps:$4 sm:$0xff]  }
  0x71   :  { %3574 = vmatprep.subr.bf16.mxu1 %v3890_v62  ;;  %v3952_v62 = vld [vmem:[%s5398_s1 + $0x4e4] ss:$12 sps:$4 sm:$0xff]  }
  0x73   :  { %1593 = vmatpush1.bf16.msra.mxu0 %v3835_v50  ;;  %v3928_v50 = vld [vmem:[%s5398_s1 + $0x454] ss:$12 sps:$4 sm:$0xff]  }
  0x74   :  { %1594 = vmatprep.subr.bf16.mxu0 %v3842_v51  ;;  %3575 = vmatpush3.bf16.msra.mxu1 %v3891_v1  ;;  %v3926_v51 = vld [vmem:[%s5398_s1 + $0x450] ss:$12 sps:$4 sm:$0xff]   ;;  %v3953_v1 = vld [vmem:[%s5398_s1 + $0x4f8] ss:$12 sps:$4 sm:$0xff]  }
  0x75   :  { %3576 = vmatprep.subr.bf16.mxu1 %v3895_v3  ;;  %v3956_v3 = vld [vmem:[%s5398_s1 + $0x510] ss:$12 sps:$4 sm:$0xff]  }
  0x77   :  { %1595 = vmatpush1.bf16.msra.mxu0 %v3840_v55  ;;  %v3936_v55 = vld [vmem:[%s5398_s1 + $0x484] ss:$12 sps:$4 sm:$0xff]  }
  0x78   :  { %1596 = vmatprep.subr.bf16.mxu0 %v3847_v57  ;;  %3577 = vmatpush3.bf16.msra.mxu1 %v3896_v6  ;;  %v3940_v57 = vld [vmem:[%s5398_s1 + $0x49c] ss:$12 sps:$4 sm:$0xff]   ;;  %v3964_v6 = vld [vmem:[%s5398_s1 + $0x544] ss:$12 sps:$4 sm:$0xff]  }
  0x79   :  { %3578 = vmatprep.subr.bf16.mxu1 %v3900_v8  ;;  %v3967_v8 = vld [vmem:[%s5398_s1 + $0x55c] ss:$12 sps:$4 sm:$0xff]  }
  0x7b   :  { %1597 = vmatpush1.bf16.msra.mxu0 %v3845_v59  ;;  %v3944_v59 = vld [vmem:[%s5398_s1 + $0x4b4] ss:$12 sps:$4 sm:$0xff]  }
  0x7c   :  { %1598 = vmatprep.subr.bf16.mxu0 %v3852_v60  ;;  %3579 = vmatpush3.bf16.msra.mxu1 %v3901_v11  ;;  %v3942_v60 = vld [vmem:[%s5398_s1 + $0x4b0] ss:$12 sps:$4 sm:$0xff]  }
  0x7d   :  { %3580 = vmatprep.subr.bf16.mxu1 %v3905_v12  ;;  %v3968_v11 = vld [vmem:[%s5398_s1 + $0x570] ss:$12 sps:$4 sm:$0xff]   ;;  %v3973_v12 = vld [vmem:[%s5398_s1 + $0x58c] ss:$12 sps:$4 sm:$0xff]  }
  0x7f   :  { %1599 = vmatpush1.bf16.msra.mxu0 %v3850_v63  ;;  %v3950_v63 = vld [vmem:[%s5398_s1 + $0x4e0] ss:$12 sps:$4 sm:$0xff]  }
  0x80   :  { %1609 = vmatprep.subr.bf16.mxu0 %v3857_v0  ;;  %3581 = vmatpush3.bf16.msra.mxu1 %v3906_v15  ;;  %v3955_v0 = vld [vmem:[%s5398_s1 + $0x4fc] ss:$12 sps:$4 sm:$0xff]   ;;  %v3974_v15 = vld [vmem:[%s5398_s1 + $0x5a0] ss:$12 sps:$4 sm:$0xff]  }
  0x82   :  { %1601 = vmatmul.mubr.bf16.vlgmr.msra.gmra.mrb[0].mxu0 %v4474_v16  ;;  %v3910_v16 = vld [vmem:[%s5398_s1 + $0x5f0] ss:$12 sps:$4 sm:$0xff]  }
  0x83   :  { %1610 = vmatpush1.bf16.msra.mxu0 %v3855_v5  ;;  %1641 = vmatprep.mubr.bf16.mxu0 %v4540_v38  ;;  %v3937_v38 = vld [vmem:[%s5398_s1 + $0x680] ss:$12 sps:$4 sm:$0xff]   ;;  %v3959_v5 = vld [vmem:[%s5398_s1 + $0x528] ss:$12 sps:$4 sm:$0xff]  }
  0x84   :  { %1611 = vmatprep.subr.bf16.mxu0 %v3862_v7  ;;  %3582 = vmatprep.subr.bf16.mxu1 %v3910_v16  ;;  %v3962_v7 = vld [vmem:[%s5398_s1 + $0x540] ss:$12 sps:$4 sm:$0xff]   ;;  %v3979_v16 = vld [vmem:[%s5398_s1 + $0x5bc] ss:$12 sps:$4 sm:$0xff]  }
  0x85   :  { %3583 = vmatpush3.bf16.msra.mxu1 %v3911_v18  ;;  %v3982_v18 = vld [vmem:[%s5398_s1 + $0x5d4] ss:$12 sps:$4 sm:$0xff]  }
  0x86   :  { %3648 = vmatprep.subr.bf16.mxu1 %v4190_v24 }
  0x87   :  { %1612 = vmatpush1.bf16.msra.mxu0 %v3860_v9  ;;  %v3965_v9 = vld [vmem:[%s5398_s1 + $0x558] ss:$12 sps:$4 sm:$0xff]  }
  0x88   :  { %1613 = vmatprep.subr.bf16.mxu0 %v3867_v10  ;;  %1885 = vmatmul.mubr.bf16.vlgmr.msra.gmra.mrb[12].mxu1 %v4683_v21  ;;  %v3970_v10 = vld [vmem:[%s5398_s1 + $0x574] ss:$12 sps:$4 sm:$0xff]  }
  0x89   :  { %3649 = vmatpush3.bf16.msra.mxu1 %v3917_v22  ;;  %3664 = vmatprep.mubr.msk.bf16.mxu1 %vm4191_vm0, %v4190_v24  ;;  %v3983_v22 = vld [vmem:[%s5398_s1 + $0x5e8] ss:$12 sps:$4 sm:$0xff]  }
  0x8a   :  { %3650 = vmatprep.subr.bf16.mxu1 %v4190_v24 }
  0x8b   :  { %1614 = vmatpush1.bf16.msra.mxu0 %v3865_v13  ;;  %v3971_v13 = vld [vmem:[%s5398_s1 + $0x588] ss:$12 sps:$4 sm:$0xff]  }
  0x8c   :  { %1615 = vmatprep.subr.bf16.mxu0 %v3872_v14  ;;  %v3976_v14 = vld [vmem:[%s5398_s1 + $0x5a4] ss:$12 sps:$4 sm:$0xff]  }
  0x8d   :  { %3651 = vmatpush3.bf16.msra.mxu1 %v3921_v26  ;;  %v3991_v26 = vld [vmem:[%s5398_s1 + $0x61c] ss:$12 sps:$4 sm:$0xff]  }
  0x8e   :  { %3652 = vmatprep.subr.bf16.mxu1 %v4190_v24 }
  0x8f   :  { %1616 = vmatpush1.bf16.msra.mxu0 %v3870_v17  ;;  %v3977_v17 = vld [vmem:[%s5398_s1 + $0x5b8] ss:$12 sps:$4 sm:$0xff]  }
  0x90   :  { %1617 = vmatprep.subr.bf16.mxu0 %v3879_v19  ;;  %v3980_v19 = vld [vmem:[%s5398_s1 + $0x5d0] ss:$12 sps:$4 sm:$0xff]  }
  0x91   :  { %3653 = vmatpush3.bf16.msra.mxu1 %v3925_v29  ;;  %v3994_v29 = vld [vmem:[%s5398_s1 + $0x634] ss:$12 sps:$4 sm:$0xff]  }
  0x92   :  { %3654 = vmatprep.subr.bf16.mxu1 %v4190_v24 }
  0x93   :  { %1618 = vmatpush1.bf16.msra.mxu0 %v3877_v20  ;;  %v3985_v20 = vld [vmem:[%s5398_s1 + $0x5ec] ss:$12 sps:$4 sm:$0xff]  }
  0x94   :  { %1619 = vmatprep.subr.bf16.mxu0 %v3884_v23  ;;  %v3988_v23 = vld [vmem:[%s5398_s1 + $0x604] ss:$12 sps:$4 sm:$0xff]  }
  0x95   :  { %3655 = vmatpush3.bf16.msra.mxu1 %v3929_v32 }
  0x96   :  { %3656 = vmatprep.subr.bf16.mxu1 %v4190_v24 }
  0x97   :  { %1620 = vmatpush1.bf16.msra.mxu0 %v3882_v25  ;;  %v3986_v25 = vld [vmem:[%s5398_s1 + $0x600] ss:$12 sps:$4 sm:$0xff]  }
  0x98   :  { %1621 = vmatprep.subr.bf16.mxu0 %v3889_v27  ;;  %v3989_v27 = vld [vmem:[%s5398_s1 + $0x618] ss:$12 sps:$4 sm:$0xff]  }
  0x99   :  { %3657 = vmatpush3.bf16.msra.mxu1 %v3933_v35 }
  0x9a   :  { %3658 = vmatprep.subr.bf16.mxu1 %v4190_v24 }
  0x9b   :  { %1622 = vmatpush1.bf16.msra.mxu0 %v3887_v28  ;;  %v4192_v28 = vmov 0  }
  0x9c   :  { %1623 = vmatprep.subr.bf16.mxu0 %v3894_v30 }
  0x9d   :  { %3659 = vmatpush3.bf16.msra.mxu1 %v3937_v38  ;;  %v4010_v38 = vld [vmem:[%s5400_s3] ss:$16 sps:$4 sm:$0xff]  }
  0x9e   :  { %3660 = vmatprep.subr.bf16.mxu1 %v4190_v24 }
  0x9f   :  { %1624 = vmatpush1.bf16.msra.mxu0 %v3892_v31 }
  0xa0   :  { %1625 = vmatprep.subr.bf16.mxu0 %v3899_v33 }
  0xa1   :  { %3661 = vmatpush3.bf16.msra.mxu1 %v3941_v41  ;;  %v3998_v41 = vld [vmem:[%s5398_s1 + $0x660] ss:$12 sps:$4 sm:$0xff]  }
  0xa2   :  { %3662 = vmatprep.subr.bf16.mxu1 %v4190_v24 }
  0xa3   :  { %1626 = vmatpush1.bf16.msra.mxu0 %v3897_v34  ;;  %v3997_v34 = vld [vmem:[%s5398_s1 + $0x64c] ss:$12 sps:$4 sm:$0xff]  }
  0xa4   :  { %1627 = vmatprep.subr.bf16.mxu0 %v3904_v36  ;;  %v3995_v36 = vld [vmem:[%s5398_s1 + $0x648] ss:$12 sps:$4 sm:$0xff]  }
  0xa5   :  { %3663 = vmatpush3.bf16.msra.mxu1 %v3945_v44  ;;  %v4018_v44 = vld [vmem:[%s5400_s3 + $0x44] ss:$16 sps:$4 sm:$0xff]  }
  0xa7   :  { %1628 = vmatpush1.bf16.msra.mxu0 %v3902_v37  ;;  %v4000_v37 = vld [vmem:[%s5398_s1 + $0x664] ss:$12 sps:$4 sm:$0xff]  }
  0xa8   :  { %1629 = vmatprep.subr.bf16.mxu0 %v3909_v39  ;;  %3665 = vmatmul.mubr.bf16.vlgmr.msra.gmra.mrb[16].mxu1 %v4768_v46  ;;  %v4012_v39 = vld [vmem:[%s5400_s3 + $0x4] ss:$16 sps:$4 sm:$0xff]  }
  0xa9   :  { %2536 = vmatprep.subr.bf16.mxu1 %v4012_v39  ;;  %v4060_v39 = vld [vmem:[%s5400_s3 + $0x204] ss:$16 sps:$4 sm:$0xff]  }
  0xaa   :  { %2537 = vmatpush1.bf16.msra.mxu1 %v4010_v38  ;;  %v4055_v38 = vld [vmem:[%s5400_s3 + $0x1e0] ss:$16 sps:$4 sm:$0xff]  }
  0xab   :  { %1630 = vmatpush1.bf16.msra.mxu0 %v3907_v40  ;;  %v4015_v40 = vld [vmem:[%s5400_s3 + $0x24] ss:$16 sps:$4 sm:$0xff]  }
  0xac   :  { %1631 = vmatprep.subr.bf16.mxu0 %v3914_v42  ;;  %v4003_v42 = vld [vmem:[%s5398_s1 + $0x67c] ss:$12 sps:$4 sm:$0xff]   ;;  %2538 = vmatprep.subr.bf16.mxu1 %v4015_v40 }
  0xaf   :  { %1632 = vmatpush1.bf16.msra.mxu0 %v3912_v43  ;;  %v4013_v43 = vld [vmem:[%s5400_s3 + $0x20] ss:$16 sps:$4 sm:$0xff]  }
  0xb0   :  { %1633 = vmatprep.subr.bf16.mxu0 %v3920_v45  ;;  %v4001_v45 = vld [vmem:[%s5398_s1 + $0x678] ss:$12 sps:$4 sm:$0xff]   ;;  %2539 = vmatpush1.bf16.msra.mxu1 %v4013_v43 }
  0xb1   :  { %2540 = vmatprep.subr.bf16.mxu1 %v4018_v44 }
  0xb3   :  { %1634 = vmatpush1.bf16.msra.mxu0 %v3918_v47  ;;  %v4006_v47 = vld [vmem:[%s5398_s1 + $0x694] ss:$12 sps:$4 sm:$0xff]  }
  0xb4   :  { %1635 = vmatprep.subr.bf16.mxu0 %v3924_v48  ;;  %v4016_v48 = vld [vmem:[%s5400_s3 + $0x40] ss:$16 sps:$4 sm:$0xff]  }
  0xb5   :  { %2541 = vmatpush1.bf16.msra.mxu1 %v4016_v48 }
  0xb7   :  { %1636 = vmatpush1.bf16.msra.mxu0 %v3922_v49  ;;  %v4021_v49 = vld [vmem:[%s5400_s3 + $0x64] ss:$16 sps:$4 sm:$0xff]  }
  0xb8   :  { %1637 = vmatprep.subr.bf16.mxu0 %v3928_v50  ;;  %v328_v50 = vlaneseq  ;;  %2542 = vmatprep.subr.bf16.mxu1 %v4021_v49 }
  0xbb   :  { %1638 = vmatpush1.bf16.msra.mxu0 %v3926_v51  ;;  %v4004_v51 = vld [vmem:[%s5398_s1 + $0x690] ss:$12 sps:$4 sm:$0xff]  }
  0xbc   :  { %1639 = vmatprep.subr.bf16.mxu0 %v3932_v53  ;;  %v4009_v53 = vld [vmem:[%s5398_s1 + $0x6ac] ss:$12 sps:$4 sm:$0xff]  }
  0xbf   :  { %1640 = vmatpush1.bf16.msra.mxu0 %v3930_v54  ;;  %v4019_v54 = vld [vmem:[%s5400_s3 + $0x60] ss:$16 sps:$4 sm:$0xff]  }
  0xc0   :  { %1650 = vmatprep.subr.bf16.mxu0 %v3936_v55  ;;  %v4024_v55 = vld [vmem:[%s5400_s3 + $0x84] ss:$16 sps:$4 sm:$0xff]   ;;  %2543 = vmatpush1.bf16.msra.mxu1 %v4019_v54 }
  0xc1   :  { %2544 = vmatprep.subr.bf16.mxu1 %v4024_v55 }
  0xc2   :  { %1642 = vmatmul.mubr.bf16.vlgmr.msra.gmra.mrb[0].mxu0 %v4582_v52  ;;  %v3948_v52 = vld [vmem:[%s5398_s1 + $0x4cc] ss:$12 sps:$4 sm:$0xff]  }
  0xc3   :  { %1651 = vmatpush1.bf16.msra.mxu0 %v3934_v56  ;;  %1682 = vmatprep.mubr.bf16.mxu0 %v4630_v4  ;;  %v3961_v4 = vld [vmem:[%s5398_s1 + $0x52c] ss:$12 sps:$4 sm:$0xff]   ;;  %v4964_v56 = vshrl.u32 %v328_v50, 7 }
  0xc4   :  { %1652 = vmatprep.subr.bf16.mxu0 %v3940_v57  ;;  %v4007_v57 = vld [vmem:[%s5398_s1 + $0x6a8] ss:$12 sps:$4 sm:$0xff]  }
  0xc7   :  { %1653 = vmatpush1.bf16.msra.mxu0 %v3938_v58  ;;  %v4022_v58 = vld [vmem:[%s5400_s3 + $0x80] ss:$16 sps:$4 sm:$0xff]  }
  0xc8   :  { %1654 = vmatprep.subr.bf16.mxu0 %v3944_v59  ;;  %v4027_v59 = vld [vmem:[%s5400_s3 + $0xa4] ss:$16 sps:$4 sm:$0xff]   ;;  %2545 = vmatpush1.bf16.msra.mxu1 %v4022_v58 }
  0xc9   :  { %2546 = vmatprep.subr.bf16.mxu1 %v4027_v59 }
  0xcb   :  { %1655 = vmatpush1.bf16.msra.mxu0 %v3942_v60  ;;  %v4978_v60 = vld [vmem:[%s5401_s2] sm:$0x7] }
  0xcc   :  { %1656 = vmatprep.subr.bf16.mxu0 %v3948_v52  ;;  %v338_v52 = vsub.s32 2, %v4964_v56 }
  0xcf   :  { %1657 = vmatpush1.bf16.msra.mxu0 %v3946_v61  ;;  %v4025_v61 = vld [vmem:[%s5400_s3 + $0xa0] ss:$16 sps:$4 sm:$0xff]  }
  0xd0   :  { %1658 = vmatprep.subr.bf16.mxu0 %v3952_v62  ;;  %v4030_v62 = vld [vmem:[%s5400_s3 + $0xc4] ss:$16 sps:$4 sm:$0xff]   ;;  %2547 = vmatpush1.bf16.msra.mxu1 %v4025_v61 }
  0xd1   :  { %2548 = vmatprep.subr.bf16.mxu1 %v4030_v62  ;;  %v4058_v62 = vld [vmem:[%s5400_s3 + $0x200] ss:$16 sps:$4 sm:$0xff]  }
  0xd3   :  { %1659 = vmatpush1.bf16.msra.mxu0 %v3950_v63  ;;  %v339_v63 = vrot.slane %v4978_v60, %v338_v52 }
  0xd4   :  { %1660 = vmatprep.subr.bf16.mxu0 %v3955_v0  ;;  %v4028_v0 = vld [vmem:[%s5400_s3 + $0xc0] ss:$16 sps:$4 sm:$0xff]  }
  0xd5   :  { %2549 = vmatpush1.bf16.msra.mxu1 %v4028_v0  ;;  %v4061_v0 = vld [vmem:[%s5400_s3 + $0x220] ss:$16 sps:$4 sm:$0xff]  }
  0xd7   :  { %1661 = vmatpush1.bf16.msra.mxu0 %v3953_v1  ;;  %v4033_v1 = vld [vmem:[%s5400_s3 + $0xe4] ss:$16 sps:$4 sm:$0xff]  }
  0xd8   :  { %1662 = vmatprep.subr.bf16.mxu0 %v3958_v2  ;;  %2550 = vmatprep.subr.bf16.mxu1 %v4033_v1  ;;  %v4066_v1 = vld [vmem:[%s5400_s3 + $0x244] ss:$16 sps:$4 sm:$0xff]  }
  0xdb   :  { %1663 = vmatpush1.bf16.msra.mxu0 %v3956_v3 }
  0xdc   :  { %1664 = vmatprep.subr.bf16.mxu0 %v3961_v4  ;;  %v4031_v4 = vld [vmem:[%s5400_s3 + $0xe0] ss:$16 sps:$4 sm:$0xff]  }
  0xdd   :  { %2551 = vmatpush1.bf16.msra.mxu1 %v4031_v4  ;;  %v4064_v4 = vld [vmem:[%s5400_s3 + $0x240] ss:$16 sps:$4 sm:$0xff]  }
  0xdf   :  { %1665 = vmatpush1.bf16.msra.mxu0 %v3959_v5 }
  0xe0   :  { %1666 = vmatprep.subr.bf16.mxu0 %v3964_v6  ;;  %v4036_v6 = vld [vmem:[%s5400_s3 + $0x104] ss:$16 sps:$4 sm:$0xff]  }
  0xe1   :  { %2552 = vmatprep.subr.bf16.mxu1 %v4036_v6  ;;  %v4157_v6 = vld [vmem:[%s5402_s5 + $0x8] sm:$0xff]  }
  0xe3   :  { %1667 = vmatpush1.bf16.msra.mxu0 %v3962_v7 }
  0xe4   :  { %1668 = vmatprep.subr.bf16.mxu0 %v3967_v8 }
  0xe7   :  { %1669 = vmatpush1.bf16.msra.mxu0 %v3965_v9 }
  0xe8   :  { %1670 = vmatprep.subr.bf16.mxu0 %v3970_v10  ;;  %v4034_v10 = vld [vmem:[%s5400_s3 + $0x100] ss:$16 sps:$4 sm:$0xff]  }
  0xe9   :  { %2553 = vmatpush1.bf16.msra.mxu1 %v4034_v10  ;;  %v4160_v10 = vld [vmem:[%s5402_s5 + $0x58] sm:$0xff]  }
  0xeb   :  { %1671 = vmatpush1.bf16.msra.mxu0 %v3968_v11  ;;  %v4039_v11 = vld [vmem:[%s5400_s3 + $0x124] ss:$16 sps:$4 sm:$0xff]  }
  0xec   :  { %1672 = vmatprep.subr.bf16.mxu0 %v3973_v12  ;;  %v4037_v12 = vld [vmem:[%s5400_s3 + $0x120] ss:$16 sps:$4 sm:$0xff]   ;;  %2554 = vmatprep.subr.bf16.mxu1 %v4039_v11  ;;  %v4072_v11 = vld [vmem:[%s5400_s3 + $0x284] ss:$16 sps:$4 sm:$0xff]  }
  0xed   :  { %2555 = vmatpush1.bf16.msra.mxu1 %v4037_v12  ;;  %v4070_v12 = vld [vmem:[%s5400_s3 + $0x280] ss:$16 sps:$4 sm:$0xff]  }
  0xef   :  { %1673 = vmatpush1.bf16.msra.mxu0 %v3971_v13  ;;  %v4042_v13 = vld [vmem:[%s5400_s3 + $0x144] ss:$16 sps:$4 sm:$0xff]  }
  0xf0   :  { %1674 = vmatprep.subr.bf16.mxu0 %v3976_v14  ;;  %v4040_v14 = vld [vmem:[%s5400_s3 + $0x140] ss:$16 sps:$4 sm:$0xff]   ;;  %2556 = vmatprep.subr.bf16.mxu1 %v4042_v13  ;;  %v4075_v13 = vld [vmem:[%s5400_s3 + $0x2a4] ss:$16 sps:$4 sm:$0xff]  }
  0xf1   :  { %2557 = vmatpush1.bf16.msra.mxu1 %v4040_v14  ;;  %v4161_v14 = vld [vmem:[%s5402_s5 + $0x18] sm:$0xff]  }
  0xf3   :  { %1675 = vmatpush1.bf16.msra.mxu0 %v3974_v15  ;;  %v4045_v15 = vld [vmem:[%s5400_s3 + $0x164] ss:$16 sps:$4 sm:$0xff]  }
  0xf4   :  { %1676 = vmatprep.subr.bf16.mxu0 %v3979_v16  ;;  %v4043_v16 = vld [vmem:[%s5400_s3 + $0x160] ss:$16 sps:$4 sm:$0xff]   ;;  %2558 = vmatprep.subr.bf16.mxu1 %v4045_v15 }
  0xf5   :  { %2559 = vmatpush1.bf16.msra.mxu1 %v4043_v16  ;;  %v4162_v16 = vld [vmem:[%s5402_s5 + $0x60] sm:$0xff]  }
  0xf7   :  { %1677 = vmatpush1.bf16.msra.mxu0 %v3977_v17  ;;  %v4048_v17 = vld [vmem:[%s5400_s3 + $0x184] ss:$16 sps:$4 sm:$0xff]  }
  0xf8   :  { %1678 = vmatprep.subr.bf16.mxu0 %v3982_v18  ;;  %v4046_v18 = vld [vmem:[%s5400_s3 + $0x180] ss:$16 sps:$4 sm:$0xff]   ;;  %2560 = vmatprep.subr.bf16.mxu1 %v4048_v17 }
  0xf9   :  { %v3518_v30 = vpop.f32.mrb[0].mxu1  ;;  %2561 = vmatpush1.bf16.msra.mxu1 %v4046_v18  ;;  %v4163_v17 = vld [vmem:[%s5402_s5 + $0x20] sm:$0xff]  }
  0xfa   :  { %v3519_v31 = vpop.f32.mrb[1].mxu1  ;;  %v4073_v18 = vld [vmem:[%s5400_s3 + $0x2a0] ss:$16 sps:$4 sm:$0xff]  }
  0xfb   :  { %1679 = vmatpush1.bf16.msra.mxu0 %v3980_v19  ;;  %v3520_v32 = vadd.f32 %v3519_v31, %v3518_v30  ;;  %v3521_v33 = vpop.f32.mrb[2].mxu1  ;;  %v4051_v19 = vld [vmem:[%s5400_s3 + $0x1a4] ss:$16 sps:$4 sm:$0xff]  }
  0xfc   :  { %1680 = vmatprep.subr.bf16.mxu0 %v3985_v20  ;;  %v3522_v35 = vpop.f32.mrb[3].mxu1  ;;  %v4049_v20 = vld [vmem:[%s5400_s3 + $0x1a0] ss:$16 sps:$4 sm:$0xff]   ;;  %2562 = vmatprep.subr.bf16.mxu1 %v4051_v19  ;;  %v4164_v19 = vld [vmem:[%s5402_s5 + $0x68] sm:$0xff]  }
  0xfd   :  { %v1767_v2 = vadd.f32 %v3520_v32, %v339_v63  ;;  %2563 = vmatpush1.bf16.msra.mxu1 %v4049_v20  ;;  %v4054_v35 = vld [vmem:[%s5400_s3 + $0x1c4] ss:$16 sps:$4 sm:$0xff]  }
  0xfe   :  { %2564 = vmatprep.subr.bf16.mxu1 %v4054_v35  ;;  %v4078_v20 = vld [vmem:[%s5400_s3 + $0x2c4] ss:$16 sps:$4 sm:$0xff]   ;;  %v4091_v35 = vld [vmem:[%s5400_s3 + $0x68] ss:$16 sps:$4 sm:$0xff]  }
  0xff   :  { %1681 = vmatpush1.bf16.msra.mxu0 %v3983_v22 }
 0x100   :  { %1691 = vmatprep.subr.bf16.mxu0 %v3988_v23 }
 0x102   :  { %1683 = vmatmul.mubr.bf16.vlgmr.msra.gmra.mrb[0].mxu0 %v4683_v21  ;;  %v3992_v21 = vld [vmem:[%s5398_s1 + $0x630] ss:$12 sps:$4 sm:$0xff]  }
 0x103   :  { %1692 = vmatpush1.bf16.msra.mxu0 %v3986_v25  ;;  %1723 = vmatprep.mubr.bf16.mxu0 %v4192_v28 }
 0x104   :  { %1693 = vmatprep.subr.bf16.mxu0 %v3991_v26 }
 0x107   :  { %1694 = vmatpush1.bf16.msra.mxu0 %v3989_v27 }
 0x108   :  { %1695 = vmatprep.subr.bf16.mxu0 %v3994_v29 }
 0x10b   :  { %1696 = vmatpush1.bf16.msra.mxu0 %v3992_v21 }
 0x10c   :  { %1697 = vmatprep.subr.bf16.mxu0 %v3997_v34 }
 0x10f   :  { %1698 = vmatpush1.bf16.msra.mxu0 %v3995_v36  ;;  %v4052_v36 = vld [vmem:[%s5400_s3 + $0x1c0] ss:$16 sps:$4 sm:$0xff]  }
 0x110   :  { %1699 = vmatprep.subr.bf16.mxu0 %v4000_v37  ;;  %2565 = vmatpush1.bf16.msra.mxu1 %v4052_v36  ;;  %v4057_v37 = vld [vmem:[%s5400_s3 + $0x1e4] ss:$16 sps:$4 sm:$0xff]   ;;  %v4096_v36 = vld [vmem:[%s5400_s3 + $0x8c] ss:$16 sps:$4 sm:$0xff]  }
 0x111   :  { %2566 = vmatprep.subr.bf16.mxu1 %v4057_v37  ;;  %v4094_v37 = vld [vmem:[%s5400_s3 + $0x88] ss:$16 sps:$4 sm:$0xff]  }
 0x113   :  { %1700 = vmatpush1.bf16.msra.mxu0 %v3998_v41 }
 0x114   :  { %1701 = vmatprep.subr.bf16.mxu0 %v4003_v42  ;;  %2567 = vmatpush1.bf16.msra.mxu1 %v4055_v38  ;;  %v4099_v38 = vld [vmem:[%s5400_s3 + $0xac] ss:$16 sps:$4 sm:$0xff]  }
 0x115   :  { %2577 = vmatprep.subr.bf16.mxu1 %v4060_v39  ;;  %v4097_v39 = vld [vmem:[%s5400_s3 + $0xa8] ss:$16 sps:$4 sm:$0xff]  }
 0x117   :  { %1702 = vmatpush1.bf16.msra.mxu0 %v4001_v45  ;;  %v330_v45 = vsub.s32 0, %v4964_v56 }
 0x118   :  { %1703 = vmatprep.subr.bf16.mxu0 %v4006_v47  ;;  %v334_v47 = vsub.s32 1, %v4964_v56 }
 0x119   :  { %v331_v48 = vrot.slane %v4978_v60, %v330_v45 }
 0x11a   :  { %v3540_v3 = vpop.f32.mrb[4].mxu1  ;;  %v335_v49 = vrot.slane %v4978_v60, %v334_v47  ;;  %v4063_v60 = vld [vmem:[%s5400_s3 + $0x224] ss:$16 sps:$4 sm:$0xff]  }
 0x11b   :  { %1704 = vmatpush1.bf16.msra.mxu0 %v4004_v51  ;;  %v3541_v5 = vpop.f32.mrb[5].mxu1 }
 0x11c   :  { %1705 = vmatprep.subr.bf16.mxu0 %v4009_v53  ;;  %v3542_v7 = vadd.f32 %v3541_v5, %v3540_v3  ;;  %v3543_v8 = vpop.f32.mrb[6].mxu1  ;;  %v4155_v3 = vld [vmem:[%s5402_s5] sm:$0xff]   ;;  %v4156_v5 = vld [vmem:[%s5402_s5 + $0x48] sm:$0xff]  }
 0x11d   :  { %v4069_v8 = vld [vmem:[%s5400_s3 + $0x264] ss:$16 sps:$4 sm:$0xff]  }
 0x11e   :  { %v1807_v9 = vadd.f32 %v3542_v7, %v1767_v2  ;;  %v4154_v2 = vld [vmem:[%s5402_s5 + $0x40] sm:$0xff]   ;;  %v4158_v7 = vld [vmem:[%s5402_s5 + $0x50] sm:$0xff]  }
 0x11f   :  { %1706 = vmatpush1.bf16.msra.mxu0 %v4007_v57 }
 0x120   :  { %3599 = vmatprep.subr.bf16.mxu0 %v4154_v2  ;;  %v4132_v2 = vld [vmem:[%s5400_s3 + $0x20c] ss:$16 sps:$4 sm:$0xff]  }
 0x122   :  { %1724 = vmatmul.mubr.bf16.vlgmr.msra.gmra.mrb[0].mxu0 %v4768_v46  ;;  %v3544_v46 = vpop.f32.mrb[7].mxu1 }
 0x123   :  { %3600 = vmatpush3.bf16.msra.mxu0 %v4155_v3  ;;  %v4067_v46 = vld [vmem:[%s5400_s3 + $0x260] ss:$16 sps:$4 sm:$0xff]   ;;  %v4130_v3 = vld [vmem:[%s5400_s3 + $0x208] ss:$16 sps:$4 sm:$0xff]  }
 0x124   :  { %3601 = vmatprep.subr.bf16.mxu0 %v4156_v5  ;;  %v4133_v5 = vld [vmem:[%s5400_s3 + $0x228] ss:$16 sps:$4 sm:$0xff]  }
 0x127   :  { %3602 = vmatpush3.bf16.msra.mxu0 %v4157_v6  ;;  %v4138_v6 = vld [vmem:[%s5400_s3 + $0x24c] ss:$16 sps:$4 sm:$0xff]  }
 0x128   :  { %3603 = vmatprep.subr.bf16.mxu0 %v4158_v7  ;;  %v4136_v7 = vld [vmem:[%s5400_s3 + $0x248] ss:$16 sps:$4 sm:$0xff]  }
 0x13a   :  { %v3562_v22 = vpop.f32.mrb[8].mxu1 }
 0x13b   :  { %v3563_v23 = vpop.f32.mrb[9].mxu1 }
 0x13c   :  { %v3564_v25 = vadd.f32 %v3563_v23, %v3562_v22  ;;  %v3565_v26 = vpop.f32.mrb[10].mxu1  ;;  %v4165_v22 = vld [vmem:[%s5402_s5 + $0x28] sm:$0xff]   ;;  %v4076_v23 = vld [vmem:[%s5400_s3 + $0x2c0] ss:$16 sps:$4 sm:$0xff]  }
 0x13d   :  { %v3566_v27 = vpop.f32.mrb[11].mxu1  ;;  %v4079_v26 = vld [vmem:[%s5400_s3 + $0x2e0] ss:$16 sps:$4 sm:$0xff]  }
 0x13e   :  { %v1847_v29 = vadd.f32 %v3564_v25, %v1807_v9  ;;  %v4159_v9 = vld [vmem:[%s5402_s5 + $0x10] sm:$0xff]   ;;  %v4084_v27 = vld [vmem:[%s5400_s3 + $0xc] ss:$16 sps:$4 sm:$0xff]  }
 0x13f   :  { %3604 = vmatpush3.bf16.msra.mxu0 %v4159_v9  ;;  %v4081_v25 = vld [vmem:[%s5400_s3 + $0x2e4] ss:$16 sps:$4 sm:$0xff]   ;;  %v4147_v9 = vld [vmem:[%s5400_s3 + $0x2ac] ss:$16 sps:$4 sm:$0xff]  }
 0x140   :  { %3605 = vmatprep.subr.bf16.mxu0 %v4160_v10  ;;  %v4145_v10 = vld [vmem:[%s5400_s3 + $0x2a8] ss:$16 sps:$4 sm:$0xff]  }
 0x143   :  { %3606 = vmatpush3.bf16.msra.mxu0 %v4161_v14  ;;  %v4148_v14 = vld [vmem:[%s5400_s3 + $0x2c8] ss:$16 sps:$4 sm:$0xff]  }
 0x144   :  { %3607 = vmatprep.subr.bf16.mxu0 %v4162_v16  ;;  %v4168_v16 = vld [vmem:[%s5402_s5 + $0x78] sm:$0xff]  }
 0x147   :  { %3608 = vmatpush3.bf16.msra.mxu0 %v4163_v17  ;;  %v4169_v17 = vld [vmem:[%s5402_s5 + $0x38] sm:$0xff]  }
 0x148   :  { %3609 = vmatprep.subr.bf16.mxu0 %v4164_v19  ;;  %v4170_v19 = vld [vmem:[%s5402_s5 + $0xc0] sm:$0xff]  }
 0x14b   :  { %3610 = vmatpush3.bf16.msra.mxu0 %v4165_v22 }
 0x15b   :  { %v3584_v30 = vpop.f32.mrb[12].mxu1 }
 0x15c   :  { %v3585_v31 = vpop.f32.mrb[13].mxu1 }
 0x15d   :  { %v3586_v21 = vadd.f32 %v3585_v31, %v3584_v30  ;;  %v3587_v32 = vpop.f32.mrb[14].mxu1  ;;  %v4087_v31 = vld [vmem:[%s5400_s3 + $0x2c] ss:$16 sps:$4 sm:$0xff]  }
 0x15e   :  { %v3588_v33 = vpop.f32.mrb[15].mxu1  ;;  %v4090_v32 = vld [vmem:[%s5400_s3 + $0x4c] ss:$16 sps:$4 sm:$0xff]  }
 0x15f   :  { %v1887_v34 = vadd.f32 %v3586_v21, %v1847_v29  ;;  %v4082_v29 = vld [vmem:[%s5400_s3 + $0x8] ss:$16 sps:$4 sm:$0xff]  }
 0x160   :  { %v4085_v21 = vld [vmem:[%s5400_s3 + $0x28] ss:$16 sps:$4 sm:$0xff]  }
 0x161   :  { %v4088_v33 = vld [vmem:[%s5400_s3 + $0x48] ss:$16 sps:$4 sm:$0xff]  }
 0x17b   :  { %v1926_v40 = vpop.f32.mrb[16].mxu1 }
 0x17c   :  { %v5051_v41 = vadd.f32 %v1926_v40, %v1887_v34  ;;  %v3666_v42 = vpop.f32.mrb[17].mxu1  ;;  %v4093_v34 = vld [vmem:[%s5400_s3 + $0x6c] ss:$16 sps:$4 sm:$0xff]  }
 0x17d   :  { %v1929_v43 = vpop.f32.mrb[18].mxu1  ;;  %v4102_v40 = vld [vmem:[%s5400_s3 + $0xcc] ss:$16 sps:$4 sm:$0xff]  }
 0x17e   :  { %v3667_v44 = vpop.f32.mrb[19].mxu1  ;;  %v1934_v15 = vmax.f32 %v5051_v41, 0.0  ;;  %v4100_v41 = vld [vmem:[%s5400_s3 + $0xc8] ss:$16 sps:$4 sm:$0xff]   ;;  %v4105_v42 = vld [vmem:[%s5400_s3 + $0xec] ss:$16 sps:$4 sm:$0xff]  }
 0x17f   :  { %v4103_v43 = vld [vmem:[%s5400_s3 + $0xe8] ss:$16 sps:$4 sm:$0xff]   ;;  %v4108_v44 = vld [vmem:[%s5400_s3 + $0x10c] ss:$16 sps:$4 sm:$0xff]  }
 0x180   :  { %v5156_v30 = vpack.c.bf16 %v1934_v15, %v1934_v15  ;;  %v4153_v15 = vld [vmem:[%s5400_s3 + $0x2ec] ss:$16 sps:$4 sm:$0xff]  }
 0x1f5   :  { %v1725_v50 = vpop.f32.mrb[0].mxu0 }
 0x1f6   :  { %v3680_v51 = vadd.f32 %v1725_v50, %v331_v48  ;;  %v1727_v53 = vpop.f32.mrb[1].mxu0  ;;  %v4106_v48 = vld [vmem:[%s5400_s3 + $0x108] ss:$16 sps:$4 sm:$0xff]  }
 0x1f7   :  { %v3681_v54 = vadd.f32 %v1727_v53, %v335_v49  ;;  %v1729_v55 = vpop.f32.mrb[2].mxu0  ;;  %v4111_v49 = vld [vmem:[%s5400_s3 + $0x12c] ss:$16 sps:$4 sm:$0xff]   ;;  %v4109_v50 = vld [vmem:[%s5400_s3 + $0x128] ss:$16 sps:$4 sm:$0xff]  }
 0x1f8   :  { %v1932_v57 = vmax.f32 %v3680_v51, 0.0  ;;  %v1730_v58 = vpop.f32.mrb[3].mxu0  ;;  %v4114_v51 = vld [vmem:[%s5400_s3 + $0x14c] ss:$16 sps:$4 sm:$0xff]   ;;  %v4112_v53 = vld [vmem:[%s5400_s3 + $0x148] ss:$16 sps:$4 sm:$0xff]  }
 0x1f9   :  { %v1933_v59 = vmax.f32 %v3681_v54, 0.0  ;;  %v4117_v54 = vld [vmem:[%s5400_s3 + $0x16c] ss:$16 sps:$4 sm:$0xff]   ;;  %v4115_v55 = vld [vmem:[%s5400_s3 + $0x168] ss:$16 sps:$4 sm:$0xff]  }
 0x1fa   :  { %v5066_v63 = vpack.c.bf16 %v1932_v57, %v1932_v57  ;;  %v4120_v57 = vld [vmem:[%s5400_s3 + $0x18c] ss:$16 sps:$4 sm:$0xff]   ;;  %v4118_v58 = vld [vmem:[%s5400_s3 + $0x188] ss:$16 sps:$4 sm:$0xff]  }
 0x1fb   :  { %v5061_v61 = vpack.c.bf16 %v1933_v59, %v1933_v59  ;;  %v4123_v59 = vld [vmem:[%s5400_s3 + $0x1ac] ss:$16 sps:$4 sm:$0xff]  }
 0x1fd   :  { %2568 = vmatprep.mubr.bf16.mxu1 %v5061_v61 }
 0x1fe   :  { %2569 = vmatmul.mubr.bf16.vlgmr.msra.gmra.mrb[20].mxu1 %v5066_v63 }
 0x1ff   :  { %2578 = vmatpush1.bf16.msra.mxu1 %v4058_v62  ;;  %2609 = vmatprep.mubr.bf16.mxu1 %v4192_v28  ;;  %v4126_v62 = vld [vmem:[%s5400_s3 + $0x1cc] ss:$16 sps:$4 sm:$0xff]  }
 0x200   :  { %2579 = vmatprep.subr.bf16.mxu1 %v4063_v60  ;;  %v4124_v60 = vld [vmem:[%s5400_s3 + $0x1c8] ss:$16 sps:$4 sm:$0xff]  }
 0x203   :  { %2580 = vmatpush1.bf16.msra.mxu1 %v4061_v0  ;;  %v4129_v0 = vld [vmem:[%s5400_s3 + $0x1ec] ss:$16 sps:$4 sm:$0xff]  }
 0x204   :  { %2581 = vmatprep.subr.bf16.mxu1 %v4066_v1  ;;  %v4127_v1 = vld [vmem:[%s5400_s3 + $0x1e8] ss:$16 sps:$4 sm:$0xff]  }
 0x207   :  { %2582 = vmatpush1.bf16.msra.mxu1 %v4064_v4  ;;  %v4135_v4 = vld [vmem:[%s5400_s3 + $0x22c] ss:$16 sps:$4 sm:$0xff]  }
 0x208   :  { %2583 = vmatprep.subr.bf16.mxu1 %v4069_v8  ;;  %v4144_v8 = vld [vmem:[%s5400_s3 + $0x28c] ss:$16 sps:$4 sm:$0xff]  }
 0x20b   :  { %2584 = vmatpush1.bf16.msra.mxu1 %v4067_v46  ;;  %v4142_v46 = vld [vmem:[%s5400_s3 + $0x288] ss:$16 sps:$4 sm:$0xff]  }
 0x20c   :  { %2585 = vmatprep.subr.bf16.mxu1 %v4072_v11  ;;  %v4150_v11 = vld [vmem:[%s5400_s3 + $0x2cc] ss:$16 sps:$4 sm:$0xff]  }
 0x20f   :  { %2586 = vmatpush1.bf16.msra.mxu1 %v4070_v12  ;;  %v4166_v12 = vld [vmem:[%s5402_s5 + $0x70] sm:$0xff]  }
 0x210   :  { %2587 = vmatprep.subr.bf16.mxu1 %v4075_v13  ;;  %v4167_v13 = vld [vmem:[%s5402_s5 + $0x30] sm:$0xff]   ;;  %3611 = vmatprep.subr.bf16.mxu0 %v4166_v12 }
 0x211   :  { %3612 = vmatpush3.bf16.msra.mxu0 %v4167_v13 }
 0x212   :  { %3613 = vmatprep.subr.bf16.mxu0 %v4168_v16  ;;  %v3496_v16 = vld [vmem:[%s5406_s8] ss:$0 sm:$0xff] }
 0x213   :  { %2588 = vmatpush1.bf16.msra.mxu1 %v4073_v18  ;;  %v4151_v18 = vld [vmem:[%s5400_s3 + $0x2e8] ss:$16 sps:$4 sm:$0xff]  }
 0x214   :  { %2589 = vmatprep.subr.bf16.mxu1 %v4078_v20  ;;  %v2034_v20 = vld [vmem:[%s5403_s4] sm:$0xf] }
 0x215   :  { %3614 = vmatpush3.bf16.msra.mxu0 %v4169_v17  ;;  %v2039_v22 = vrot.slane %v2034_v20, %v330_v45  ;;  %v4172_v45 = vld [vmem:[%s5402_s5 + $0xc8] sm:$0xff]  }
 0x216   :  { %3621 = vmatprep.subr.bf16.mxu0 %v4170_v19 }
 0x217   :  { %2590 = vmatpush1.bf16.msra.mxu1 %v4076_v23  ;;  %v2043_v23 = vrot.slane %v2034_v20, %v334_v47  ;;  %v4173_v47 = vld [vmem:[%s5402_s5 + $0x88] sm:$0xff]  }
 0x218   :  { %2591 = vmatprep.subr.bf16.mxu1 %v4081_v25 }
 0x21b   :  { %2592 = vmatpush1.bf16.msra.mxu1 %v4079_v26 }
 0x21c   :  { %2618 = vmatprep.subr.bf16.mxu1 %v4084_v27 }
 0x21e   :  { %2610 = vmatmul.mubr.bf16.vlgmr.msra.gmra.mrb[20].mxu1 %v5156_v30 }
 0x21f   :  { %2619 = vmatpush1.bf16.msra.mxu1 %v4082_v29  ;;  %2650 = vmatprep.mubr.bf16.mxu1 %v5061_v61  ;;  %v4121_v61 = vld [vmem:[%s5400_s3 + $0x1a8] ss:$16 sps:$4 sm:$0xff]  }
 0x220   :  { %2620 = vmatprep.subr.bf16.mxu1 %v4087_v31 }
 0x223   :  { %2621 = vmatpush1.bf16.msra.mxu1 %v4085_v21 }
 0x224   :  { %2622 = vmatprep.subr.bf16.mxu1 %v4090_v32 }
 0x227   :  { %2623 = vmatpush1.bf16.msra.mxu1 %v4088_v33 }
 0x228   :  { %2624 = vmatprep.subr.bf16.mxu1 %v4093_v34 }
 0x22b   :  { %2625 = vmatpush1.bf16.msra.mxu1 %v4091_v35 }
 0x22c   :  { %2626 = vmatprep.subr.bf16.mxu1 %v4096_v36  ;;  %v4174_v36 = vld [vmem:[%s5402_s5 + $0xd0] sm:$0xff]  }
 0x22f   :  { %2627 = vmatpush1.bf16.msra.mxu1 %v4094_v37  ;;  %v4175_v37 = vld [vmem:[%s5402_s5 + $0x90] sm:$0xff]  }
 0x230   :  { %2628 = vmatprep.subr.bf16.mxu1 %v4099_v38  ;;  %v4176_v38 = vld [vmem:[%s5402_s5 + $0xd8] sm:$0xff]  }
 0x233   :  { %2629 = vmatpush1.bf16.msra.mxu1 %v4097_v39  ;;  %v4177_v39 = vld [vmem:[%s5402_s5 + $0x98] sm:$0xff]  }
 0x234   :  { %2630 = vmatprep.subr.bf16.mxu1 %v4102_v40  ;;  %v4178_v40 = vld [vmem:[%s5402_s5 + $0xe0] sm:$0xff]  }
 0x237   :  { %2631 = vmatpush1.bf16.msra.mxu1 %v4100_v41  ;;  %v4179_v41 = vld [vmem:[%s5402_s5 + $0xa0] sm:$0xff]  }
 0x238   :  { %2632 = vmatprep.subr.bf16.mxu1 %v4105_v42  ;;  %v4180_v42 = vld [vmem:[%s5402_s5 + $0xe8] sm:$0xff]  }
 0x23b   :  { %2633 = vmatpush1.bf16.msra.mxu1 %v4103_v43  ;;  %v4181_v43 = vld [vmem:[%s5402_s5 + $0xa8] sm:$0xff]  }
 0x23c   :  { %2634 = vmatprep.subr.bf16.mxu1 %v4108_v44  ;;  %v4182_v44 = vld [vmem:[%s5402_s5 + $0xf0] sm:$0xff]  }
 0x23f   :  { %2635 = vmatpush1.bf16.msra.mxu1 %v4106_v48  ;;  %v4183_v48 = vld [vmem:[%s5402_s5 + $0xb0] sm:$0xff]  }
 0x240   :  { %2636 = vmatprep.subr.bf16.mxu1 %v4111_v49  ;;  %v4184_v49 = vld [vmem:[%s5402_s5 + $0xf8] sm:$0xff]  }
 0x243   :  { %2637 = vmatpush1.bf16.msra.mxu1 %v4109_v50  ;;  %v4185_v50 = vld [vmem:[%s5402_s5 + $0xb8] sm:$0xff]  }
 0x244   :  { %2638 = vmatprep.subr.bf16.mxu1 %v4114_v51  ;;  %v2050_v51 = vsub.s32 3, %v4964_v56  ;;  %v4187_v56 = vld [vmem:[%s5404_s7 + $0x8] sm:$0xff]  }
 0x247   :  { %2639 = vmatpush1.bf16.msra.mxu1 %v4112_v53  ;;  %v2047_v53 = vrot.slane %v2034_v20, %v338_v52  ;;  %v4188_v52 = vld [vmem:[%s5404_s7 + $0x10] sm:$0xff]  }
 0x248   :  { %2640 = vmatprep.subr.bf16.mxu1 %v4117_v54  ;;  %v2051_v54 = vrot.slane %v2034_v20, %v2050_v51 }
 0x24b   :  { %2641 = vmatpush1.bf16.msra.mxu1 %v4115_v55 }
 0x24c   :  { %2642 = vmatprep.subr.bf16.mxu1 %v4120_v57 }
 0x24f   :  { %2643 = vmatpush1.bf16.msra.mxu1 %v4118_v58 }
 0x250   :  { %2644 = vmatprep.subr.bf16.mxu1 %v4123_v59 }
 0x253   :  { %2645 = vmatpush1.bf16.msra.mxu1 %v4121_v61 }
 0x254   :  { %2646 = vmatprep.subr.bf16.mxu1 %v4126_v62 }
 0x257   :  { %2647 = vmatpush1.bf16.msra.mxu1 %v4124_v60 }
 0x258   :  { %2648 = vmatprep.subr.bf16.mxu1 %v4129_v0 }
 0x25b   :  { %2649 = vmatpush1.bf16.msra.mxu1 %v4127_v1 }
 0x25c   :  { %2659 = vmatprep.subr.bf16.mxu1 %v4132_v2  ;;  %v4186_v2 = vld [vmem:[%s5404_s7] sm:$0xff]  }
 0x25e   :  { %2651 = vmatmul.mubr.bf16.vlgmr.msra.gmra.mrb[24].mxu1 %v5066_v63  ;;  %v4141_v63 = vld [vmem:[%s5400_s3 + $0x26c] ss:$16 sps:$4 sm:$0xff]  }
 0x25f   :  { %2660 = vmatpush1.bf16.msra.mxu1 %v4130_v3  ;;  %2691 = vmatprep.mubr.bf16.mxu1 %v4192_v28  ;;  %v4139_v28 = vld [vmem:[%s5400_s3 + $0x268] ss:$16 sps:$4 sm:$0xff]  }
 0x260   :  { %2661 = vmatprep.subr.bf16.mxu1 %v4135_v4  ;;  %v4189_v4 = vld [vmem:[%s5404_s7 + $0x18] sm:$0xff]  }
 0x263   :  { %2662 = vmatpush1.bf16.msra.mxu1 %v4133_v5 }
 0x264   :  { %2663 = vmatprep.subr.bf16.mxu1 %v4138_v6 }
 0x267   :  { %2664 = vmatpush1.bf16.msra.mxu1 %v4136_v7 }
 0x268   :  { %2665 = vmatprep.subr.bf16.mxu1 %v4141_v63 }
 0x26b   :  { %2666 = vmatpush1.bf16.msra.mxu1 %v4139_v28 }
 0x26c   :  { %2667 = vmatprep.subr.bf16.mxu1 %v4144_v8  ;;  %v3463_v8 = vld [vmem:[%s5405_s6] ss:$0 sm:$0xff] }
 0x26f   :  { %2668 = vmatpush1.bf16.msra.mxu1 %v4142_v46 }
 0x270   :  { %2669 = vmatprep.subr.bf16.mxu1 %v4147_v9 }
 0x273   :  { %2670 = vmatpush1.bf16.msra.mxu1 %v4145_v10 }
 0x274   :  { %2671 = vmatprep.subr.bf16.mxu1 %v4150_v11 }
 0x277   :  { %2672 = vmatpush1.bf16.msra.mxu1 %v4148_v14 }
 0x278   :  { %2673 = vmatprep.subr.bf16.mxu1 %v4153_v15 }
 0x27b   :  { %2674 = vmatpush1.bf16.msra.mxu1 %v4151_v18 }
 0x27e   :  { %2692 = vmatmul.mubr.bf16.vlgmr.msra.gmra.mrb[24].mxu1 %v5156_v30  ;;  %v4171_v30 = vld [vmem:[%s5402_s5 + $0x80] sm:$0xff]  }
 0x2f1   :  { %v2611_v25 = vpop.f32.mrb[20].mxu1 }
 0x2f2   :  { %v3682_v26 = vadd.f32 %v2611_v25, %v2039_v22  ;;  %v2613_v27 = vpop.f32.mrb[21].mxu1 }
 0x2f3   :  { %v3683_v29 = vadd.f32 %v2613_v27, %v2043_v23  ;;  %v2615_v31 = vpop.f32.mrb[22].mxu1 }
 0x2f4   :  { %v2700_v21 = vmax.f32 %v3682_v26, 0.0  ;;  %v2616_v32 = vpop.f32.mrb[23].mxu1 }
 0x2f5   :  { %v2701_v33 = vmax.f32 %v3683_v29, 0.0 }
 0x2f6   :  { %v2704_v35 = vpack.c.bf16 %v2700_v21, %v2700_v21 }
 0x2f7   :  { %v2705_v34 = vpack.c.bf16 %v2701_v33, %v2701_v33 }
 0x2f9   :  { %3003 = vmatprep.mubr.bf16.mxu0 %v2705_v34 }
 0x2fa   :  { %3004 = vmatmul.mubr.bf16.vlgmr.msra.gmra.mrb[4].mxu0 %v2704_v35 }
 0x2fb   :  { %3622 = vmatpush3.bf16.msra.mxu0 %v4171_v30 }
 0x2fc   :  { %3623 = vmatprep.subr.bf16.mxu0 %v4172_v45 }
 0x2ff   :  { %3624 = vmatpush3.bf16.msra.mxu0 %v4173_v47 }
 0x300   :  { %3625 = vmatprep.subr.bf16.mxu0 %v4174_v36 }
 0x303   :  { %3626 = vmatpush3.bf16.msra.mxu0 %v4175_v37 }
 0x304   :  { %3627 = vmatprep.subr.bf16.mxu0 %v4176_v38 }
 0x307   :  { %3628 = vmatpush3.bf16.msra.mxu0 %v4177_v39 }
 0x308   :  { %3629 = vmatprep.subr.bf16.mxu0 %v4178_v40 }
 0x30b   :  { %3630 = vmatpush3.bf16.msra.mxu0 %v4179_v41 }
 0x30c   :  { %3631 = vmatprep.subr.bf16.mxu0 %v4180_v42 }
 0x30f   :  { %3632 = vmatpush3.bf16.msra.mxu0 %v4181_v43 }
 0x310   :  { %3633 = vmatprep.subr.bf16.mxu0 %v4182_v44 }
 0x313   :  { %3634 = vmatpush3.bf16.msra.mxu0 %v4183_v48 }
 0x314   :  { %3635 = vmatprep.subr.bf16.mxu0 %v4184_v49 }
 0x317   :  { %3636 = vmatpush3.bf16.msra.mxu0 %v4185_v50 }
 0x318   :  { %3668 = vmatprep.subr.bf16.mxu0 %v4190_v24 }
 0x351   :  { %v2693_v55 = vpop.f32.mrb[24].mxu1 }
 0x352   :  { %v3684_v57 = vadd.f32 %v2693_v55, %v2047_v53  ;;  %v2695_v58 = vpop.f32.mrb[25].mxu1 }
 0x353   :  { %v3685_v59 = vadd.f32 %v2695_v58, %v2051_v54  ;;  %v2697_v61 = vpop.f32.mrb[26].mxu1 }
 0x354   :  { %v2702_v62 = vmax.f32 %v3684_v57, 0.0  ;;  %v2698_v60 = vpop.f32.mrb[27].mxu1 }
 0x355   :  { %v2703_v0 = vmax.f32 %v3685_v59, 0.0 }
 0x356   :  { %v2706_v3 = vpack.c.bf16 %v2702_v62, %v2702_v62 }
 0x357   :  { %v2707_v1 = vpack.c.bf16 %v2703_v0, %v2703_v0 }
 0x359   :  { %3043 = vmatprep.mubr.bf16.mxu0 %v2707_v1 }
 0x35a   :  { %3044 = vmatmul.mubr.bf16.vlgmr.msra.gmra.mrb[8].mxu0 %v2706_v3 }
 0x35b   :  { %3669 = vmatpush3.bf16.msra.mxu0 %v4186_v2  ;;  %3676 = vmatprep.mubr.msk.bf16.mxu0 %vm4191_vm0, %v4190_v24 }
 0x35c   :  { %3670 = vmatprep.subr.bf16.mxu0 %v4190_v24 }
 0x35f   :  { %3671 = vmatpush3.bf16.msra.mxu0 %v4187_v56 }
 0x360   :  { %3672 = vmatprep.subr.bf16.mxu0 %v4190_v24 }
 0x363   :  { %3673 = vmatpush3.bf16.msra.mxu0 %v4188_v52 }
 0x364   :  { %3674 = vmatprep.subr.bf16.mxu0 %v4190_v24 }
 0x367   :  { %3675 = vmatpush3.bf16.msra.mxu0 %v4189_v4 }
 0x3cd   :  { %v3615_v5 = vpop.f32.mrb[4].mxu0 }
 0x3ce   :  { %v3616_v6 = vpop.f32.mrb[5].mxu0 }
 0x3cf   :  { %v3617_v7 = vadd.f32 %v3616_v6, %v3615_v5  ;;  %v3618_v63 = vpop.f32.mrb[6].mxu0 }
 0x3d0   :  { %v3619_v28 = vpop.f32.mrb[7].mxu0 }
 0x3d1   :  { %v3006_v10 = vadd.f32 %v3617_v7, %v3463_v8 }
 0x42d   :  { %v3637_v46 = vpop.f32.mrb[8].mxu0 }
 0x42e   :  { %v3638_v9 = vpop.f32.mrb[9].mxu0 }
 0x42f   :  { %v3639_v11 = vadd.f32 %v3638_v9, %v3637_v46  ;;  %v3640_v12 = vpop.f32.mrb[10].mxu0 }
 0x430   :  { %v3641_v24 = vpop.f32.mrb[11].mxu0 }
 0x431   :  { %v3046_v13 = vadd.f32 %v3639_v11, %v3006_v10 }
 0x433   :  { %v3051_v14 = vmax.f32 %v3046_v13, 0.0 }
 0x435   :  { %v3052_v15 = vpack.c.bf16 %v3051_v14, %v3051_v14 }
 0x437   :  { %3677 = vmatmul.mubr.msk.bf16.vlgmr.msra.gmra.mrb[12].mxu0 %vm3092_vm1, %v3052_v15 }
 0x50a   :  { %v3130_v17 = vpop.f32.mrb[12].mxu0 }
 0x50b   :  { %v3131_v18 = vadd.f32 %v3496_v16, %v3130_v17  ;;  %v3678_v19 = vpop.f32.mrb[13].mxu0 }
 0x50c   :  { %v3133_v20 = vpop.f32.mrb[14].mxu0 }
 0x50d   :  { %v3136_v22 = vmax.f32 %v3131_v18, 0.0  ;;  %v3679_v23 = vpop.f32.mrb[15].mxu0 }
 0x50f   :  { %3137 = vst.msk [vmem:[%s5407_s9] sm:$0xff] %vm3092_vm1, %v3136_v22 }

</bundles_post_ra>
